<compile_context>
chip_gen: v7x
topology: tpu7x:2x2x1
jax: 0.10.0
libtpu: 0.0.40
codegen_flags: <defaults>
</compile_context>

<pallas_src>
import jax
import jax.numpy as jnp
from jax import lax
from jax.experimental import pallas as pl
from jax.experimental.pallas import tpu as pltpu

E = 64          # embedding_dim / d_model
FF = 64         # dim_feedforward (== E, relied upon for weight packing)
NUM_ENC = 6     # num_encoder_layers
NUM_EMB = 69    # num_embeddings
LN_EPS = 1e-5   # must stay > 0: all-zero batch-padding rows rely on rsqrt(eps) being finite


# ---------------------------------------------------------------------------
# in-kernel helpers (pure jnp, traced inside the Pallas kernel body)
# ---------------------------------------------------------------------------
def _layer_norm(x, w, b):
    mu = jnp.mean(x, axis=-1, keepdims=True)
    xc = x - mu
    var = jnp.mean(xc * xc, axis=-1, keepdims=True)
    return xc * lax.rsqrt(var + LN_EPS) * w + b


def _softmax_attention(q, k, v):
    # q: (BB, Sq, E); k, v: (BB, Sk, E) -> (BB, Sq, E); single head (n_head == 1).
    # The 1/sqrt(E) scale is folded into W_q / b_q at weight-prep time.
    # bf16 operands, f32 accumulation; softmax math stays f32.
    s = jnp.einsum('bqd,bkd->bqk', q.astype(jnp.bfloat16), k.astype(jnp.bfloat16),
                   preferred_element_type=jnp.float32)
    s = s - jnp.max(s, axis=-1, keepdims=True)
    p = jnp.exp(s)
    # approx reciprocal runs on the EUP slot; tiny deviation from exact division.
    p = p * pl.reciprocal(jnp.sum(p, axis=-1, keepdims=True), approx=True)
    return jnp.einsum('bqk,bkd->bqd', p.astype(jnp.bfloat16), v.astype(jnp.bfloat16),
                      preferred_element_type=jnp.float32)


# ---------------------------------------------------------------------------
# Pallas kernel: BB batch elements per grid step
# ---------------------------------------------------------------------------
def met_kernel(unm_ref, msk_ref,
               enc_wqkv_ref, enc_wrest_ref, enc_b_ref,
               dec_wsaqkv_ref, dec_wcakv_ref, dec_wrest_ref, dec_b_ref,
               misc_ref,
               xhat_ref, pool_ref,
               tgt_scratch):
    BB, S_u, _ = unm_ref.shape
    S_m = msk_ref.shape[1]
    T = S_u + S_m
    Nu = BB * S_u
    Nt = BB * T
    bf16 = jnp.bfloat16

    def proj(x2, w, b):
        # bf16 operands (weights already bf16), f32 accumulation, f32 bias add.
        return jnp.dot(x2.astype(bf16), w, preferred_element_type=jnp.float32) + b

    # ---- transformer encoder: 6 post-norm layers, ReLU FF, fused QKV ----
    # fori_loop bounds vreg live ranges / code footprint (vs. a 6x unrolled body).
    def enc_layer(l, x2):
        Bv = enc_b_ref[l]                                          # (10, E) f32
        qkv = jnp.dot(x2.astype(bf16), enc_wqkv_ref[l],
                      preferred_element_type=jnp.float32)          # (Nu, 3E)
        q = (qkv[:, 0:E] + Bv[0]).reshape(BB, S_u, E)
        k = (qkv[:, E:2 * E] + Bv[1]).reshape(BB, S_u, E)
        v = (qkv[:, 2 * E:3 * E] + Bv[2]).reshape(BB, S_u, E)
        attn = _softmax_attention(q, k, v).reshape(Nu, E)
        sa = proj(attn, enc_wrest_ref[l, 0:E, :], Bv[3])
        x2 = _layer_norm(x2 + sa, Bv[6], Bv[7])
        h = jnp.maximum(proj(x2, enc_wrest_ref[l, E:2 * E, :], Bv[4]), 0.0)
        ff = proj(h, enc_wrest_ref[l, 2 * E:3 * E, :], Bv[5])
        return _layer_norm(x2 + ff, Bv[8], Bv[9])

    x2 = lax.fori_loop(0, NUM_ENC, enc_layer,
                       unm_ref[...].reshape(Nu, E))                # (BB*S_u, E) f32
    enc2 = x2
    enc3 = enc2.reshape(BB, S_u, E)

    misc = misc_ref[...]                                           # (4, E) f32

    # ---- pooled output: LayerNorm(enc_out)[:, -1] ----
    pool_ref[...] = _layer_norm(enc3[:, S_u - 1, :], misc[0], misc[1])   # (BB, E)

    # ---- decoder input: concat([enc_out, masked_inputs]) via VMEM scratch ----
    tgt_scratch[:, 0:S_u, :] = enc3
    tgt_scratch[:, S_u:T, :] = msk_ref[...]
    tgt2 = tgt_scratch[...].reshape(Nt, E)                         # (BB*T, E) f32

    DB = dec_b_ref[...]                                            # (16, E) f32

    # self-attention (fused QKV, unmasked — matches torch tgt_mask=None)
    qkv = jnp.dot(tgt2.astype(bf16), dec_wsaqkv_ref[...],
                  preferred_element_type=jnp.float32)
    q = (qkv[:, 0:E] + DB[0]).reshape(BB, T, E)
    k = (qkv[:, E:2 * E] + DB[1]).reshape(BB, T, E)
    v = (qkv[:, 2 * E:3 * E] + DB[2]).reshape(BB, T, E)
    sa = _softmax_attention(q, k, v).reshape(Nt, E)
    sa = proj(sa, dec_wrest_ref[0:E, :], DB[3])
    tgt2 = _layer_norm(tgt2 + sa, DB[10], DB[11])

    # cross-attention over encoder memory (fused K/V)
    q = (jnp.dot(tgt2.astype(bf16), dec_wrest_ref[E:2 * E, :],
                 preferred_element_type=jnp.float32) + DB[4]).reshape(BB, T, E)
    kv = jnp.dot(enc2.astype(bf16), dec_wcakv_ref[...],
                 preferred_element_type=jnp.float32)
    k = (kv[:, 0:E] + DB[5]).reshape(BB, S_u, E)
    v = (kv[:, E:2 * E] + DB[6]).reshape(BB, S_u, E)
    ca = _softmax_attention(q, k, v).reshape(Nt, E)
    ca = proj(ca, dec_wrest_ref[2 * E:3 * E, :], DB[7])
    tgt2 = _layer_norm(tgt2 + ca, DB[12], DB[13])

    # feed-forward
    h = jnp.maximum(proj(tgt2, dec_wrest_ref[3 * E:4 * E, :], DB[8]), 0.0)
    ff = proj(h, dec_wrest_ref[4 * E:5 * E, :], DB[9])
    tgt2 = _layer_norm(tgt2 + ff, DB[14], DB[15])

    # ---- head: Linear(E,1) as VPU multiply + lane reduce, then sigmoid ----
    logits = jnp.sum(tgt2.reshape(BB, T, E) * misc[2], axis=-1)    # (BB, T)
    logits = logits + misc[3:4, 0:1]                               # head bias
    xhat_ref[...] = jax.nn.sigmoid(logits)


# ---------------------------------------------------------------------------
# weight prep: fold 1/sqrt(E) into the Q projections, cast matmul weights to
# bf16 (f32 accumulation happens in-kernel); biases / LN params stay f32.
# ---------------------------------------------------------------------------
def _prepare_weights(params):
    scale = 1.0 / (E ** 0.5)
    bf16 = jnp.bfloat16

    enc_wqkv = params["enc_wqkv"].at[:, :, 0:E].multiply(scale)
    enc_b = params["enc_b"].at[:, 0, :].multiply(scale)             # b_q
    dec_wsaqkv = params["dec_wsaqkv"].at[:, 0:E].multiply(scale)
    dec_wrest = params["dec_wrest"].at[E:2 * E, :].multiply(scale)  # W_q (cross-attn)
    dec_b = params["dec_b"].at[0, :].multiply(scale)                # b_q (self-attn)
    dec_b = dec_b.at[4, :].multiply(scale)                          # b_q (cross-attn)

    return (enc_wqkv.astype(bf16), params["enc_wrest"].astype(bf16), enc_b,
            dec_wsaqkv.astype(bf16), params["dec_wcakv"].astype(bf16),
            dec_wrest.astype(bf16), dec_b, params["misc"])


# ---------------------------------------------------------------------------
# wrapper (embedding gather / packing / Flatten are JAX glue)
# ---------------------------------------------------------------------------
def met_forward(params, unmasked_x, unmasked_idx, masked_x, masked_idx,
                block_b=64):
    B, S_u = unmasked_x.shape
    S_m = masked_x.shape[1]      # masked_x values are unused by the torch forward (shape only)
    T = S_u + S_m

    emb = params["embedding"]                                     # (NUM_EMB, E-1)
    unm_in = jnp.concatenate(
        [unmasked_x[..., None].astype(jnp.float32),
         jnp.take(emb, unmasked_idx, axis=0)], axis=-1)           # (B, S_u, E)

    # mask_embed = Linear(1,1)(ones(B,1)) repeated over seq  -> a single scalar
    mask_val = params["mask_w"][0, 0] + params["mask_b"][0]
    msk_in = jnp.concatenate(
        [jnp.broadcast_to(mask_val, (B, S_m, 1)).astype(jnp.float32),
         jnp.take(emb, masked_idx, axis=0)], axis=-1)             # (B, S_m, E)

    # batch tiling: BB examples per grid step (pad batch only; no seq padding,
    # so softmax / LayerNorm denominators are never polluted; all-zero pad rows
    # stay finite through LayerNorm because LN_EPS > 0).
    BB = max(1, min(block_b, B))
    n_blocks = -(-B // BB)
    # v7x megacore: make sure the parallel batch axis has >= 2 grid steps when
    # the batch is big enough to split across the two TensorCores.
    if n_blocks == 1 and B >= 16:
        BB = -(-B // 2)
        n_blocks = 2
    B_pad = n_blocks * BB
    if B_pad != B:
        pad = ((0, B_pad - B), (0, 0), (0, 0))
        unm_in = jnp.pad(unm_in, pad)
        msk_in = jnp.pad(msk_in, pad)

    (enc_wqkv, enc_wrest, enc_b,
     dec_wsaqkv, dec_wcakv, dec_wrest, dec_b, misc) = _prepare_weights(params)

    # --- advisory cost estimate (helps XLA overlap the gather/pad glue) ---
    flops = B_pad * (
        NUM_ENC * (2 * S_u * E * 3 * E          # fused QKV
                   + 4 * S_u * S_u * E          # attention scores + weighted sum
                   + 2 * S_u * E * E            # output projection
                   + 4 * S_u * E * FF)          # feed-forward (2 matmuls)
        + 2 * T * E * 3 * E + 4 * T * T * E + 2 * T * E * E        # dec self-attn
        + 2 * T * E * E + 2 * S_u * E * 2 * E + 4 * T * S_u * E    # dec cross-attn
        + 2 * T * E * E                                            # cross out proj
        + 4 * T * E * FF                                           # dec feed-forward
        + 2 * T * E)                                               # head
    transcendentals = B_pad * (NUM_ENC * S_u * S_u + T * T + T * S_u + T)
    w_bytes = sum(int(w.size) * w.dtype.itemsize
                  for w in (enc_wqkv, enc_wrest, enc_b, dec_wsaqkv,
                            dec_wcakv, dec_wrest, dec_b, misc))
    bytes_accessed = (int(unm_in.size) + int(msk_in.size)) * 4 \
                     + B_pad * (T + E) * 4 + w_bytes
    cost = pl.CostEstimate(flops=int(flops),
                           transcendentals=int(transcendentals),
                           bytes_accessed=int(bytes_accessed))

    xhat, pooled = pl.pallas_call(
        met_kernel,
        out_shape=(jax.ShapeDtypeStruct((B_pad, T), jnp.float32),
                   jax.ShapeDtypeStruct((B_pad, E), jnp.float32)),
        grid_spec=pltpu.PrefetchScalarGridSpec(
            num_scalar_prefetch=0,
            grid=(n_blocks,),
            in_specs=[
                pl.BlockSpec((BB, S_u, E), lambda b: (b, 0, 0)),         # unmasked inputs
                pl.BlockSpec((BB, S_m, E), lambda b: (b, 0, 0)),         # masked inputs
                pl.BlockSpec((NUM_ENC, E, 3 * E), lambda b: (0, 0, 0)),  # enc fused QKV (bf16)
                pl.BlockSpec((NUM_ENC, 3 * E, E), lambda b: (0, 0, 0)),  # enc Wo|W1|W2  (bf16)
                pl.BlockSpec((NUM_ENC, 10, E), lambda b: (0, 0, 0)),     # enc biases/LN (f32)
                pl.BlockSpec((E, 3 * E), lambda b: (0, 0)),              # dec self-attn QKV (bf16)
                pl.BlockSpec((E, 2 * E), lambda b: (0, 0)),              # dec cross-attn KV (bf16)
                pl.BlockSpec((5 * E, E), lambda b: (0, 0)),              # dec Wo|Wq_ca|Wo_ca|W1|W2
                pl.BlockSpec((16, E), lambda b: (0, 0)),                 # dec biases/LN (f32)
                pl.BlockSpec((4, E), lambda b: (0, 0)),                  # fln_w, fln_b, head_w, head_b
            ],
            out_specs=[
                pl.BlockSpec((BB, T), lambda b: (b, 0)),                 # x_hat
                pl.BlockSpec((BB, E), lambda b: (b, 0)),                 # pooled
            ],
            scratch_shapes=[pltpu.VMEM((BB, T, E), jnp.float32)],        # decoder input slab
        ),
        compiler_params=pltpu.CompilerParams(
            dimension_semantics=("parallel",),
            vmem_limit_bytes=48 * 1024 * 1024),
        cost_estimate=cost,
    )(unm_in, msk_in,
      enc_wqkv, enc_wrest, enc_b,
      dec_wsaqkv, dec_wcakv, dec_wrest, dec_b, misc)

    return xhat[:B], pooled[:B]          # (B, T) == nn.Flatten() output, (B, E)


# ---------------------------------------------------------------------------
# deterministic synthetic parameter init (shapes match the torch module)
# ---------------------------------------------------------------------------
def init_params(key):
    ks = jax.random.split(key, 8)

    def nrm(k, shape, std=0.02):
        return std * jax.random.normal(k, shape, jnp.float32)

    emb = nrm(ks[0], (NUM_EMB, E - 1))

    zeros_e = jnp.zeros((E,), jnp.float32)
    ones_e = jnp.ones((E,), jnp.float32)

    # encoder: fused QKV (E,3E), [WoT;W1T;W2T] (3E,E), biases+LN (10,E)
    enc_wqkv = nrm(ks[1], (NUM_ENC, E, 3 * E))
    enc_wrest = nrm(ks[2], (NUM_ENC, 3 * E, E))
    enc_b_layer = jnp.stack([zeros_e] * 6                      # bq,bk,bv,bo,b1,b2
                            + [ones_e, zeros_e,                # ln1 w/b
                               ones_e, zeros_e], axis=0)       # ln2 w/b
    enc_b = jnp.tile(enc_b_layer[None], (NUM_ENC, 1, 1))       # (6, 10, E)

    # decoder: fused self-attn QKV, fused cross-attn KV, the rest row-stacked
    dec_wsaqkv = nrm(ks[3], (E, 3 * E))
    dec_wcakv = nrm(ks[4], (E, 2 * E))
    dec_wrest = nrm(ks[5], (5 * E, E))                         # sa_o|ca_q|ca_o|lin1|lin2 (pre-T)
    dec_b = jnp.stack([zeros_e] * 10                           # bsa_{q,k,v,o}, bca_{q,k,v,o}, b1, b2
                      + [ones_e, zeros_e] * 3, axis=0)         # ln1, ln2, ln3 w/b  -> (16, E)

    head_w = nrm(ks[6], (E,))                                  # Linear(E,1).weight flattened
    head_b = 0.0
    misc = jnp.stack([ones_e, zeros_e,                         # final LN weight / bias
                      head_w,
                      jnp.full((E,), head_b, jnp.float32)], axis=0)   # (4, E)

    mask_w = nrm(ks[7], (1, 1))                                # mask_embed_layer.weight
    mask_b = jnp.zeros((1,), jnp.float32)                      # mask_embed_layer.bias

    return dict(embedding=emb,
                enc_wqkv=enc_wqkv, enc_wrest=enc_wrest, enc_b=enc_b,
                dec_wsaqkv=dec_wsaqkv, dec_wcakv=dec_wcakv,
                dec_wrest=dec_wrest, dec_b=dec_b,
                misc=misc, mask_w=mask_w, mask_b=mask_b)


if __name__ == "__main__":
    key = jax.random.PRNGKey(0)
    kp, kx = jax.random.split(key)
    params = init_params(kp)

    B, S_u, S_m = 8, 8, 8
    k1, k2, k3, k4 = jax.random.split(kx, 4)
    unmasked_x = jax.random.uniform(k1, (B, S_u), jnp.float32)
    unmasked_idx = jax.random.randint(k2, (B, S_u), 0, NUM_EMB)
    masked_x = jax.random.uniform(k3, (B, S_m), jnp.float32)   # only shape is used (as in torch)
    masked_idx = jax.random.randint(k4, (B, S_m), 0, NUM_EMB)

    x_hat, pooled = jax.jit(met_forward)(params, unmasked_x, unmasked_idx,
                                         masked_x, masked_idx)
    jax.block_until_ready((x_hat, pooled))
    assert x_hat.shape == (B, S_u + S_m)
    assert pooled.shape == (B, E)
    assert bool(jnp.all(jnp.isfinite(x_hat))) and bool(jnp.all(jnp.isfinite(pooled)))
    print("KERNEL_OK")
</pallas_src>

<mosaic_0001>
module attributes {stable_mosaic.version = 11 : i64} {
  func.func @met_kernel(%arg0: i32, %arg1: memref<8x8x64xf32, #tpu.memory_space<vmem>>, %arg2: memref<8x8x64xf32, #tpu.memory_space<vmem>>, %arg3: memref<6x64x192xbf16, #tpu.memory_space<vmem>>, %arg4: memref<6x192x64xbf16, #tpu.memory_space<vmem>>, %arg5: memref<6x10x64xf32, #tpu.memory_space<vmem>>, %arg6: memref<64x192xbf16, #tpu.memory_space<vmem>>, %arg7: memref<64x128xbf16, #tpu.memory_space<vmem>>, %arg8: memref<320x64xbf16, #tpu.memory_space<vmem>>, %arg9: memref<16x64xf32, #tpu.memory_space<vmem>>, %arg10: memref<4x64xf32, #tpu.memory_space<vmem>>, %arg11: memref<8x16xf32, #tpu.memory_space<vmem>>, %arg12: memref<8x64xf32, #tpu.memory_space<vmem>>, %arg13: memref<8x16x64xf32, #tpu.memory_space<vmem>>) attributes {dimension_semantics = [#tpu.dimension_semantics<parallel>], iteration_bounds = array<i64: 1>, scalar_prefetch = 0 : i64, scratch_operands = 1 : i64, tpu.core_type = #tpu.core_type<tc>, window_params = [{transform_indices = @transform_0, window_bounds = array<i64: 8, 8, 64>}, {transform_indices = @transform_1, window_bounds = array<i64: 8, 8, 64>}, {pipeline_mode = #tpu.pipeline_mode<synchronous>, transform_indices = @transform_2, window_bounds = array<i64: 6, 64, 192>}, {pipeline_mode = #tpu.pipeline_mode<synchronous>, transform_indices = @transform_3, window_bounds = array<i64: 6, 192, 64>}, {pipeline_mode = #tpu.pipeline_mode<synchronous>, transform_indices = @transform_4, window_bounds = array<i64: 6, 10, 64>}, {pipeline_mode = #tpu.pipeline_mode<synchronous>, transform_indices = @transform_5, window_bounds = array<i64: 64, 192>}, {pipeline_mode = #tpu.pipeline_mode<synchronous>, transform_indices = @transform_6, window_bounds = array<i64: 64, 128>}, {pipeline_mode = #tpu.pipeline_mode<synchronous>, transform_indices = @transform_7, window_bounds = array<i64: 320, 64>}, {pipeline_mode = #tpu.pipeline_mode<synchronous>, transform_indices = @transform_8, window_bounds = array<i64: 16, 64>}, {pipeline_mode = #tpu.pipeline_mode<synchronous>, transform_indices = @transform_9, window_bounds = array<i64: 4, 64>}, {transform_indices = @transform_10, window_bounds = array<i64: 8, 16>}, {transform_indices = @transform_11, window_bounds = array<i64: 8, 64>}]} {
    %c0 = arith.constant 0 : index
    %c0_0 = arith.constant 0 : index
    %c0_1 = arith.constant 0 : index
    %0 = vector.load %arg1[%c0, %c0_0, %c0_1] : memref<8x8x64xf32, #tpu.memory_space<vmem>>, vector<8x8x64xf32>
    %1 = vector.shape_cast %0 : vector<8x8x64xf32> to vector<64x64xf32>
    %c0_i32 = arith.constant 0 : i32
    %c6_i32 = arith.constant 6 : i32
    %2 = arith.addi %c0_i32, %c6_i32 : i32
    %c1_i32 = arith.constant 1 : i32
    %3 = scf.for %arg14 = %c0_i32 to %2 step %c1_i32 iter_args(%arg15 = %1) -> (vector<64x64xf32>)  : i32 {
      %256 = arith.index_cast %arg14 : i32 to index
      %c0_69 = arith.constant 0 : index
      %c0_70 = arith.constant 0 : index
      %257 = vector.load %arg5[%256, %c0_69, %c0_70] : memref<6x10x64xf32, #tpu.memory_space<vmem>>, vector<1x10x64xf32>
      %258 = vector.shape_cast %257 : vector<1x10x64xf32> to vector<10x64xf32>
      %259 = arith.truncf %arg15 : vector<64x64xf32> to vector<64x64xbf16>
      %260 = arith.index_cast %arg14 : i32 to index
      %c0_71 = arith.constant 0 : index
      %c0_72 = arith.constant 0 : index
      %261 = vector.load %arg3[%260, %c0_71, %c0_72] : memref<6x64x192xbf16, #tpu.memory_space<vmem>>, vector<1x64x192xbf16>
      %262 = vector.shape_cast %261 : vector<1x64x192xbf16> to vector<64x192xbf16>
      %cst_73 = arith.constant dense<0.000000e+00> : vector<64x192xf32>
      %263 = tpu.matmul %259, %262, %cst_73 {dimension_numbers = #tpu.dot_dimension_numbers<[1], [0], [0], [1], [0, 0, 1, 1], [], []>} : vector<64x64xbf16>, vector<64x192xbf16>, vector<64x192xf32> -> vector<64x192xf32>
      %264 = vector.extract_strided_slice %263 {offsets = [0, 0], sizes = [64, 64], strides = [1, 1]} : vector<64x192xf32> to vector<64x64xf32>
      %265 = vector.extract_strided_slice %258 {offsets = [0, 0], sizes = [1, 64], strides = [1, 1]} : vector<10x64xf32> to vector<1x64xf32>
      %266 = vector.shape_cast %265 : vector<1x64xf32> to vector<64xf32>
      %267 = vector.shape_cast %266 : vector<64xf32> to vector<1x64xf32>
      %268 = vector.broadcast %267 : vector<1x64xf32> to vector<64x64xf32>
      %269 = arith.addf %264, %268 : vector<64x64xf32>
      %270 = vector.shape_cast %269 : vector<64x64xf32> to vector<8x8x64xf32>
      %271 = vector.extract_strided_slice %263 {offsets = [0, 64], sizes = [64, 64], strides = [1, 1]} : vector<64x192xf32> to vector<64x64xf32>
      %272 = vector.extract_strided_slice %258 {offsets = [1, 0], sizes = [1, 64], strides = [1, 1]} : vector<10x64xf32> to vector<1x64xf32>
      %273 = vector.shape_cast %272 : vector<1x64xf32> to vector<64xf32>
      %274 = vector.shape_cast %273 : vector<64xf32> to vector<1x64xf32>
      %275 = vector.broadcast %274 : vector<1x64xf32> to vector<64x64xf32>
      %276 = arith.addf %271, %275 : vector<64x64xf32>
      %277 = vector.shape_cast %276 : vector<64x64xf32> to vector<8x8x64xf32>
      %278 = vector.extract_strided_slice %263 {offsets = [0, 128], sizes = [64, 64], strides = [1, 1]} : vector<64x192xf32> to vector<64x64xf32>
      %279 = vector.extract_strided_slice %258 {offsets = [2, 0], sizes = [1, 64], strides = [1, 1]} : vector<10x64xf32> to vector<1x64xf32>
      %280 = vector.shape_cast %279 : vector<1x64xf32> to vector<64xf32>
      %281 = vector.shape_cast %280 : vector<64xf32> to vector<1x64xf32>
      %282 = vector.broadcast %281 : vector<1x64xf32> to vector<64x64xf32>
      %283 = arith.addf %278, %282 : vector<64x64xf32>
      %284 = vector.shape_cast %283 : vector<64x64xf32> to vector<8x8x64xf32>
      %285 = arith.truncf %270 : vector<8x8x64xf32> to vector<8x8x64xbf16>
      %286 = arith.truncf %277 : vector<8x8x64xf32> to vector<8x8x64xbf16>
      "tpu.trace_start"() <{level = 10 : i32, message = "bqd,bkd->bqk"}> : () -> ()
      %cst_74 = arith.constant dense<0.000000e+00> : vector<8x8x8xf32>
      %287 = tpu.matmul %285, %286, %cst_74 {dimension_numbers = #tpu.dot_dimension_numbers<[2], [2], [1], [1], [0, 0, 0, 1, 1, 1], [0], [0]>} : vector<8x8x64xbf16>, vector<8x8x64xbf16>, vector<8x8x8xf32> -> vector<8x8x8xf32>
      "tpu.trace_stop"() : () -> ()
      %cst_75 = arith.constant dense<0xFF800000> : vector<8x8xf32>
      %288 = vector.multi_reduction <maximumf>, %287, %cst_75 [2] : vector<8x8x8xf32> to vector<8x8xf32>
      %289 = vector.shape_cast %288 : vector<8x8xf32> to vector<8x8x1xf32>
      %290 = vector.broadcast %289 : vector<8x8x1xf32> to vector<8x8x8xf32>
      %291 = arith.subf %287, %290 : vector<8x8x8xf32>
      %292 = math.exp %291 : vector<8x8x8xf32>
      %cst_76 = arith.constant dense<0.000000e+00> : vector<8x8xf32>
      %293 = vector.multi_reduction <add>, %292, %cst_76 [2] : vector<8x8x8xf32> to vector<8x8xf32>
      %294 = vector.shape_cast %293 : vector<8x8xf32> to vector<8x8x1xf32>
      %295 = tpu.reciprocal %294 {approx = true} : vector<8x8x1xf32> -> vector<8x8x1xf32>
      %296 = vector.broadcast %295 : vector<8x8x1xf32> to vector<8x8x8xf32>
      %297 = arith.mulf %292, %296 : vector<8x8x8xf32>
      %298 = arith.truncf %297 : vector<8x8x8xf32> to vector<8x8x8xbf16>
      %299 = arith.truncf %284 : vector<8x8x64xf32> to vector<8x8x64xbf16>
      "tpu.trace_start"() <{level = 10 : i32, message = "bqk,bkd->bqd"}> : () -> ()
      %cst_77 = arith.constant dense<0.000000e+00> : vector<8x8x64xf32>
      %300 = tpu.matmul %298, %299, %cst_77 {dimension_numbers = #tpu.dot_dimension_numbers<[2], [1], [1], [2], [0, 0, 0, 1, 1, 2], [0], [0]>} : vector<8x8x8xbf16>, vector<8x8x64xbf16>, vector<8x8x64xf32> -> vector<8x8x64xf32>
      "tpu.trace_stop"() : () -> ()
      %301 = vector.shape_cast %300 : vector<8x8x64xf32> to vector<64x64xf32>
      %302 = arith.index_cast %arg14 : i32 to index
      %c0_78 = arith.constant 0 : index
      %c0_79 = arith.constant 0 : index
      %303 = vector.load %arg4[%302, %c0_78, %c0_79] : memref<6x192x64xbf16, #tpu.memory_space<vmem>>, vector<1x64x64xbf16>
      %304 = vector.shape_cast %303 : vector<1x64x64xbf16> to vector<64x64xbf16>
      %305 = vector.extract_strided_slice %258 {offsets = [3, 0], sizes = [1, 64], strides = [1, 1]} : vector<10x64xf32> to vector<1x64xf32>
      %306 = vector.shape_cast %305 : vector<1x64xf32> to vector<64xf32>
      %307 = arith.truncf %301 : vector<64x64xf32> to vector<64x64xbf16>
      %cst_80 = arith.constant dense<0.000000e+00> : vector<64x64xf32>
      %308 = tpu.matmul %307, %304, %cst_80 {dimension_numbers = #tpu.dot_dimension_numbers<[1], [0], [0], [1], [0, 0, 1, 1], [], []>} : vector<64x64xbf16>, vector<64x64xbf16>, vector<64x64xf32> -> vector<64x64xf32>
      %309 = vector.shape_cast %306 : vector<64xf32> to vector<1x64xf32>
      %310 = vector.broadcast %309 : vector<1x64xf32> to vector<64x64xf32>
      %311 = arith.addf %308, %310 : vector<64x64xf32>
      %312 = arith.addf %arg15, %311 : vector<64x64xf32>
      %313 = vector.extract_strided_slice %258 {offsets = [6, 0], sizes = [1, 64], strides = [1, 1]} : vector<10x64xf32> to vector<1x64xf32>
      %314 = vector.shape_cast %313 : vector<1x64xf32> to vector<64xf32>
      %315 = vector.extract_strided_slice %258 {offsets = [7, 0], sizes = [1, 64], strides = [1, 1]} : vector<10x64xf32> to vector<1x64xf32>
      %316 = vector.shape_cast %315 : vector<1x64xf32> to vector<64xf32>
      %cst_81 = arith.constant dense<0.000000e+00> : vector<64xf32>
      %317 = vector.multi_reduction <add>, %312, %cst_81 [1] : vector<64x64xf32> to vector<64xf32>
      %318 = vector.shape_cast %317 : vector<64xf32> to vector<64x1xf32>
      %cst_82 = arith.constant 6.400000e+01 : f32
      %319 = vector.broadcast %cst_82 : f32 to vector<64x1xf32>
      %320 = arith.divf %318, %319 : vector<64x1xf32>
      %321 = vector.broadcast %320 : vector<64x1xf32> to vector<64x64xf32>
      %322 = arith.subf %312, %321 : vector<64x64xf32>
      %323 = arith.mulf %322, %322 : vector<64x64xf32>
      %cst_83 = arith.constant dense<0.000000e+00> : vector<64xf32>
      %324 = vector.multi_reduction <add>, %323, %cst_83 [1] : vector<64x64xf32> to vector<64xf32>
      %325 = vector.shape_cast %324 : vector<64xf32> to vector<64x1xf32>
      %cst_84 = arith.constant 6.400000e+01 : f32
      %326 = vector.broadcast %cst_84 : f32 to vector<64x1xf32>
      %327 = arith.divf %325, %326 : vector<64x1xf32>
      %cst_85 = arith.constant 9.99999974E-6 : f32
      %328 = vector.broadcast %cst_85 : f32 to vector<64x1xf32>
      %329 = arith.addf %327, %328 : vector<64x1xf32>
      %330 = math.rsqrt %329 : vector<64x1xf32>
      %331 = vector.broadcast %330 : vector<64x1xf32> to vector<64x64xf32>
      %332 = arith.mulf %322, %331 : vector<64x64xf32>
      %333 = vector.shape_cast %314 : vector<64xf32> to vector<1x64xf32>
      %334 = vector.broadcast %333 : vector<1x64xf32> to vector<64x64xf32>
      %335 = arith.mulf %332, %334 : vector<64x64xf32>
      %336 = vector.shape_cast %316 : vector<64xf32> to vector<1x64xf32>
      %337 = vector.broadcast %336 : vector<1x64xf32> to vector<64x64xf32>
      %338 = arith.addf %335, %337 : vector<64x64xf32>
      %339 = arith.index_cast %arg14 : i32 to index
      %c64_86 = arith.constant 64 : index
      %c0_87 = arith.constant 0 : index
      %340 = vector.load %arg4[%339, %c64_86, %c0_87] : memref<6x192x64xbf16, #tpu.memory_space<vmem>>, vector<1x64x64xbf16>
      %341 = vector.shape_cast %340 : vector<1x64x64xbf16> to vector<64x64xbf16>
      %342 = vector.extract_strided_slice %258 {offsets = [4, 0], sizes = [1, 64], strides = [1, 1]} : vector<10x64xf32> to vector<1x64xf32>
      %343 = vector.shape_cast %342 : vector<1x64xf32> to vector<64xf32>
      %344 = arith.truncf %338 : vector<64x64xf32> to vector<64x64xbf16>
      %cst_88 = arith.constant dense<0.000000e+00> : vector<64x64xf32>
      %345 = tpu.matmul %344, %341, %cst_88 {dimension_numbers = #tpu.dot_dimension_numbers<[1], [0], [0], [1], [0, 0, 1, 1], [], []>} : vector<64x64xbf16>, vector<64x64xbf16>, vector<64x64xf32> -> vector<64x64xf32>
      %346 = vector.shape_cast %343 : vector<64xf32> to vector<1x64xf32>
      %347 = vector.broadcast %346 : vector<1x64xf32> to vector<64x64xf32>
      %348 = arith.addf %345, %347 : vector<64x64xf32>
      %cst_89 = arith.constant 0.000000e+00 : f32
      %349 = vector.broadcast %cst_89 : f32 to vector<64x64xf32>
      %350 = arith.maximumf %348, %349 : vector<64x64xf32>
      %351 = arith.index_cast %arg14 : i32 to index
      %c128_90 = arith.constant 128 : index
      %c0_91 = arith.constant 0 : index
      %352 = vector.load %arg4[%351, %c128_90, %c0_91] : memref<6x192x64xbf16, #tpu.memory_space<vmem>>, vector<1x64x64xbf16>
      %353 = vector.shape_cast %352 : vector<1x64x64xbf16> to vector<64x64xbf16>
      %354 = vector.extract_strided_slice %258 {offsets = [5, 0], sizes = [1, 64], strides = [1, 1]} : vector<10x64xf32> to vector<1x64xf32>
      %355 = vector.shape_cast %354 : vector<1x64xf32> to vector<64xf32>
      %356 = arith.truncf %350 : vector<64x64xf32> to vector<64x64xbf16>
      %cst_92 = arith.constant dense<0.000000e+00> : vector<64x64xf32>
      %357 = tpu.matmul %356, %353, %cst_92 {dimension_numbers = #tpu.dot_dimension_numbers<[1], [0], [0], [1], [0, 0, 1, 1], [], []>} : vector<64x64xbf16>, vector<64x64xbf16>, vector<64x64xf32> -> vector<64x64xf32>
      %358 = vector.shape_cast %355 : vector<64xf32> to vector<1x64xf32>
      %359 = vector.broadcast %358 : vector<1x64xf32> to vector<64x64xf32>
      %360 = arith.addf %357, %359 : vector<64x64xf32>
      %361 = arith.addf %338, %360 : vector<64x64xf32>
      %362 = vector.extract_strided_slice %258 {offsets = [8, 0], sizes = [1, 64], strides = [1, 1]} : vector<10x64xf32> to vector<1x64xf32>
      %363 = vector.shape_cast %362 : vector<1x64xf32> to vector<64xf32>
      %364 = vector.extract_strided_slice %258 {offsets = [9, 0], sizes = [1, 64], strides = [1, 1]} : vector<10x64xf32> to vector<1x64xf32>
      %365 = vector.shape_cast %364 : vector<1x64xf32> to vector<64xf32>
      %cst_93 = arith.constant dense<0.000000e+00> : vector<64xf32>
      %366 = vector.multi_reduction <add>, %361, %cst_93 [1] : vector<64x64xf32> to vector<64xf32>
      %367 = vector.shape_cast %366 : vector<64xf32> to vector<64x1xf32>
      %cst_94 = arith.constant 6.400000e+01 : f32
      %368 = vector.broadcast %cst_94 : f32 to vector<64x1xf32>
      %369 = arith.divf %367, %368 : vector<64x1xf32>
      %370 = vector.broadcast %369 : vector<64x1xf32> to vector<64x64xf32>
      %371 = arith.subf %361, %370 : vector<64x64xf32>
      %372 = arith.mulf %371, %371 : vector<64x64xf32>
      %cst_95 = arith.constant dense<0.000000e+00> : vector<64xf32>
      %373 = vector.multi_reduction <add>, %372, %cst_95 [1] : vector<64x64xf32> to vector<64xf32>
      %374 = vector.shape_cast %373 : vector<64xf32> to vector<64x1xf32>
      %cst_96 = arith.constant 6.400000e+01 : f32
      %375 = vector.broadcast %cst_96 : f32 to vector<64x1xf32>
      %376 = arith.divf %374, %375 : vector<64x1xf32>
      %cst_97 = arith.constant 9.99999974E-6 : f32
      %377 = vector.broadcast %cst_97 : f32 to vector<64x1xf32>
      %378 = arith.addf %376, %377 : vector<64x1xf32>
      %379 = math.rsqrt %378 : vector<64x1xf32>
      %380 = vector.broadcast %379 : vector<64x1xf32> to vector<64x64xf32>
      %381 = arith.mulf %371, %380 : vector<64x64xf32>
      %382 = vector.shape_cast %363 : vector<64xf32> to vector<1x64xf32>
      %383 = vector.broadcast %382 : vector<1x64xf32> to vector<64x64xf32>
      %384 = arith.mulf %381, %383 : vector<64x64xf32>
      %385 = vector.shape_cast %365 : vector<64xf32> to vector<1x64xf32>
      %386 = vector.broadcast %385 : vector<1x64xf32> to vector<64x64xf32>
      %387 = arith.addf %384, %386 : vector<64x64xf32>
      scf.yield %387 : vector<64x64xf32>
    }
    %c6_i32_2 = arith.constant 6 : i32
    %4 = vector.shape_cast %3 : vector<64x64xf32> to vector<8x8x64xf32>
    %c0_3 = arith.constant 0 : index
    %c0_4 = arith.constant 0 : index
    %5 = vector.load %arg10[%c0_3, %c0_4] : memref<4x64xf32, #tpu.memory_space<vmem>>, vector<4x64xf32>
    %6 = vector.extract_strided_slice %4 {offsets = [0, 7, 0], sizes = [8, 1, 64], strides = [1, 1, 1]} : vector<8x8x64xf32> to vector<8x1x64xf32>
    %7 = vector.shape_cast %6 : vector<8x1x64xf32> to vector<8x64xf32>
    %8 = vector.extract_strided_slice %5 {offsets = [0, 0], sizes = [1, 64], strides = [1, 1]} : vector<4x64xf32> to vector<1x64xf32>
    %9 = vector.shape_cast %8 : vector<1x64xf32> to vector<64xf32>
    %10 = vector.extract_strided_slice %5 {offsets = [1, 0], sizes = [1, 64], strides = [1, 1]} : vector<4x64xf32> to vector<1x64xf32>
    %11 = vector.shape_cast %10 : vector<1x64xf32> to vector<64xf32>
    %cst = arith.constant dense<0.000000e+00> : vector<8xf32>
    %12 = vector.multi_reduction <add>, %7, %cst [1] : vector<8x64xf32> to vector<8xf32>
    %13 = vector.shape_cast %12 : vector<8xf32> to vector<8x1xf32>
    %cst_5 = arith.constant 6.400000e+01 : f32
    %14 = vector.broadcast %cst_5 : f32 to vector<8x1xf32>
    %15 = arith.divf %13, %14 : vector<8x1xf32>
    %16 = vector.broadcast %15 : vector<8x1xf32> to vector<8x64xf32>
    %17 = arith.subf %7, %16 : vector<8x64xf32>
    %18 = arith.mulf %17, %17 : vector<8x64xf32>
    %cst_6 = arith.constant dense<0.000000e+00> : vector<8xf32>
    %19 = vector.multi_reduction <add>, %18, %cst_6 [1] : vector<8x64xf32> to vector<8xf32>
    %20 = vector.shape_cast %19 : vector<8xf32> to vector<8x1xf32>
    %cst_7 = arith.constant 6.400000e+01 : f32
    %21 = vector.broadcast %cst_7 : f32 to vector<8x1xf32>
    %22 = arith.divf %20, %21 : vector<8x1xf32>
    %cst_8 = arith.constant 9.99999974E-6 : f32
    %23 = vector.broadcast %cst_8 : f32 to vector<8x1xf32>
    %24 = arith.addf %22, %23 : vector<8x1xf32>
    %25 = math.rsqrt %24 : vector<8x1xf32>
    %26 = vector.broadcast %25 : vector<8x1xf32> to vector<8x64xf32>
    %27 = arith.mulf %17, %26 : vector<8x64xf32>
    %28 = vector.shape_cast %9 : vector<64xf32> to vector<1x64xf32>
    %29 = vector.broadcast %28 : vector<1x64xf32> to vector<8x64xf32>
    %30 = arith.mulf %27, %29 : vector<8x64xf32>
    %31 = vector.shape_cast %11 : vector<64xf32> to vector<1x64xf32>
    %32 = vector.broadcast %31 : vector<1x64xf32> to vector<8x64xf32>
    %33 = arith.addf %30, %32 : vector<8x64xf32>
    %c0_9 = arith.constant 0 : index
    %c0_10 = arith.constant 0 : index
    %34 = vector.load %arg12[%c0_9, %c0_10] : memref<8x64xf32, #tpu.memory_space<vmem>>, vector<8x64xf32>
    tpu.vector_store %arg12[%c0_9, %c0_10], %33 {strides = array<i32>} : memref<8x64xf32, #tpu.memory_space<vmem>>, vector<8x64xf32>,
    %c0_11 = arith.constant 0 : index
    %c0_12 = arith.constant 0 : index
    %c0_13 = arith.constant 0 : index
    %35 = vector.load %arg13[%c0_11, %c0_12, %c0_13] : memref<8x16x64xf32, #tpu.memory_space<vmem>>, vector<8x8x64xf32>
    tpu.vector_store %arg13[%c0_11, %c0_12, %c0_13], %4 {strides = array<i32>} : memref<8x16x64xf32, #tpu.memory_space<vmem>>, vector<8x8x64xf32>,
    %c0_14 = arith.constant 0 : index
    %c0_15 = arith.constant 0 : index
    %c0_16 = arith.constant 0 : index
    %36 = vector.load %arg2[%c0_14, %c0_15, %c0_16] : memref<8x8x64xf32, #tpu.memory_space<vmem>>, vector<8x8x64xf32>
    %c0_17 = arith.constant 0 : index
    %c8 = arith.constant 8 : index
    %c0_18 = arith.constant 0 : index
    %37 = vector.load %arg13[%c0_17, %c8, %c0_18] : memref<8x16x64xf32, #tpu.memory_space<vmem>>, vector<8x8x64xf32>
    tpu.vector_store %arg13[%c0_17, %c8, %c0_18], %36 {strides = array<i32>} : memref<8x16x64xf32, #tpu.memory_space<vmem>>, vector<8x8x64xf32>,
    %c0_19 = arith.constant 0 : index
    %c0_20 = arith.constant 0 : index
    %c0_21 = arith.constant 0 : index
    %38 = vector.load %arg13[%c0_19, %c0_20, %c0_21] : memref<8x16x64xf32, #tpu.memory_space<vmem>>, vector<8x16x64xf32>
    %39 = vector.shape_cast %38 : vector<8x16x64xf32> to vector<128x64xf32>
    %c0_22 = arith.constant 0 : index
    %c0_23 = arith.constant 0 : index
    %40 = vector.load %arg9[%c0_22, %c0_23] : memref<16x64xf32, #tpu.memory_space<vmem>>, vector<16x64xf32>
    %41 = arith.truncf %39 : vector<128x64xf32> to vector<128x64xbf16>
    %c0_24 = arith.constant 0 : index
    %c0_25 = arith.constant 0 : index
    %42 = vector.load %arg6[%c0_24, %c0_25] : memref<64x192xbf16, #tpu.memory_space<vmem>>, vector<64x192xbf16>
    %cst_26 = arith.constant dense<0.000000e+00> : vector<128x192xf32>
    %43 = tpu.matmul %41, %42, %cst_26 {dimension_numbers = #tpu.dot_dimension_numbers<[1], [0], [0], [1], [0, 0, 1, 1], [], []>} : vector<128x64xbf16>, vector<64x192xbf16>, vector<128x192xf32> -> vector<128x192xf32>
    %44 = vector.extract_strided_slice %43 {offsets = [0, 0], sizes = [128, 64], strides = [1, 1]} : vector<128x192xf32> to vector<128x64xf32>
    %45 = vector.extract_strided_slice %40 {offsets = [0, 0], sizes = [1, 64], strides = [1, 1]} : vector<16x64xf32> to vector<1x64xf32>
    %46 = vector.shape_cast %45 : vector<1x64xf32> to vector<64xf32>
    %47 = vector.shape_cast %46 : vector<64xf32> to vector<1x64xf32>
    %48 = vector.broadcast %47 : vector<1x64xf32> to vector<128x64xf32>
    %49 = arith.addf %44, %48 : vector<128x64xf32>
    %50 = vector.shape_cast %49 : vector<128x64xf32> to vector<8x16x64xf32>
    %51 = vector.extract_strided_slice %43 {offsets = [0, 64], sizes = [128, 64], strides = [1, 1]} : vector<128x192xf32> to vector<128x64xf32>
    %52 = vector.extract_strided_slice %40 {offsets = [1, 0], sizes = [1, 64], strides = [1, 1]} : vector<16x64xf32> to vector<1x64xf32>
    %53 = vector.shape_cast %52 : vector<1x64xf32> to vector<64xf32>
    %54 = vector.shape_cast %53 : vector<64xf32> to vector<1x64xf32>
    %55 = vector.broadcast %54 : vector<1x64xf32> to vector<128x64xf32>
    %56 = arith.addf %51, %55 : vector<128x64xf32>
    %57 = vector.shape_cast %56 : vector<128x64xf32> to vector<8x16x64xf32>
    %58 = vector.extract_strided_slice %43 {offsets = [0, 128], sizes = [128, 64], strides = [1, 1]} : vector<128x192xf32> to vector<128x64xf32>
    %59 = vector.extract_strided_slice %40 {offsets = [2, 0], sizes = [1, 64], strides = [1, 1]} : vector<16x64xf32> to vector<1x64xf32>
    %60 = vector.shape_cast %59 : vector<1x64xf32> to vector<64xf32>
    %61 = vector.shape_cast %60 : vector<64xf32> to vector<1x64xf32>
    %62 = vector.broadcast %61 : vector<1x64xf32> to vector<128x64xf32>
    %63 = arith.addf %58, %62 : vector<128x64xf32>
    %64 = vector.shape_cast %63 : vector<128x64xf32> to vector<8x16x64xf32>
    %65 = arith.truncf %50 : vector<8x16x64xf32> to vector<8x16x64xbf16>
    %66 = arith.truncf %57 : vector<8x16x64xf32> to vector<8x16x64xbf16>
    "tpu.trace_start"() <{level = 10 : i32, message = "bqd,bkd->bqk"}> : () -> ()
    %cst_27 = arith.constant dense<0.000000e+00> : vector<8x16x16xf32>
    %67 = tpu.matmul %65, %66, %cst_27 {dimension_numbers = #tpu.dot_dimension_numbers<[2], [2], [1], [1], [0, 0, 0, 1, 1, 1], [0], [0]>} : vector<8x16x64xbf16>, vector<8x16x64xbf16>, vector<8x16x16xf32> -> vector<8x16x16xf32>
    "tpu.trace_stop"() : () -> ()
    %cst_28 = arith.constant dense<0xFF800000> : vector<8x16xf32>
    %68 = vector.multi_reduction <maximumf>, %67, %cst_28 [2] : vector<8x16x16xf32> to vector<8x16xf32>
    %69 = vector.shape_cast %68 : vector<8x16xf32> to vector<8x16x1xf32>
    %70 = vector.broadcast %69 : vector<8x16x1xf32> to vector<8x16x16xf32>
    %71 = arith.subf %67, %70 : vector<8x16x16xf32>
    %72 = math.exp %71 : vector<8x16x16xf32>
    %cst_29 = arith.constant dense<0.000000e+00> : vector<8x16xf32>
    %73 = vector.multi_reduction <add>, %72, %cst_29 [2] : vector<8x16x16xf32> to vector<8x16xf32>
    %74 = vector.shape_cast %73 : vector<8x16xf32> to vector<8x16x1xf32>
    %75 = tpu.reciprocal %74 {approx = true} : vector<8x16x1xf32> -> vector<8x16x1xf32>
    %76 = vector.broadcast %75 : vector<8x16x1xf32> to vector<8x16x16xf32>
    %77 = arith.mulf %72, %76 : vector<8x16x16xf32>
    %78 = arith.truncf %77 : vector<8x16x16xf32> to vector<8x16x16xbf16>
    %79 = arith.truncf %64 : vector<8x16x64xf32> to vector<8x16x64xbf16>
    "tpu.trace_start"() <{level = 10 : i32, message = "bqk,bkd->bqd"}> : () -> ()
    %cst_30 = arith.constant dense<0.000000e+00> : vector<8x16x64xf32>
    %80 = tpu.matmul %78, %79, %cst_30 {dimension_numbers = #tpu.dot_dimension_numbers<[2], [1], [1], [2], [0, 0, 0, 1, 1, 2], [0], [0]>} : vector<8x16x16xbf16>, vector<8x16x64xbf16>, vector<8x16x64xf32> -> vector<8x16x64xf32>
    "tpu.trace_stop"() : () -> ()
    %81 = vector.shape_cast %80 : vector<8x16x64xf32> to vector<128x64xf32>
    %c0_31 = arith.constant 0 : index
    %c0_32 = arith.constant 0 : index
    %82 = vector.load %arg8[%c0_31, %c0_32] : memref<320x64xbf16, #tpu.memory_space<vmem>>, vector<64x64xbf16>
    %83 = vector.extract_strided_slice %40 {offsets = [3, 0], sizes = [1, 64], strides = [1, 1]} : vector<16x64xf32> to vector<1x64xf32>
    %84 = vector.shape_cast %83 : vector<1x64xf32> to vector<64xf32>
    %85 = arith.truncf %81 : vector<128x64xf32> to vector<128x64xbf16>
    %cst_33 = arith.constant dense<0.000000e+00> : vector<128x64xf32>
    %86 = tpu.matmul %85, %82, %cst_33 {dimension_numbers = #tpu.dot_dimension_numbers<[1], [0], [0], [1], [0, 0, 1, 1], [], []>} : vector<128x64xbf16>, vector<64x64xbf16>, vector<128x64xf32> -> vector<128x64xf32>
    %87 = vector.shape_cast %84 : vector<64xf32> to vector<1x64xf32>
    %88 = vector.broadcast %87 : vector<1x64xf32> to vector<128x64xf32>
    %89 = arith.addf %86, %88 : vector<128x64xf32>
    %90 = arith.addf %39, %89 : vector<128x64xf32>
    %91 = vector.extract_strided_slice %40 {offsets = [10, 0], sizes = [1, 64], strides = [1, 1]} : vector<16x64xf32> to vector<1x64xf32>
    %92 = vector.shape_cast %91 : vector<1x64xf32> to vector<64xf32>
    %93 = vector.extract_strided_slice %40 {offsets = [11, 0], sizes = [1, 64], strides = [1, 1]} : vector<16x64xf32> to vector<1x64xf32>
    %94 = vector.shape_cast %93 : vector<1x64xf32> to vector<64xf32>
    %cst_34 = arith.constant dense<0.000000e+00> : vector<128xf32>
    %95 = vector.multi_reduction <add>, %90, %cst_34 [1] : vector<128x64xf32> to vector<128xf32>
    %96 = vector.shape_cast %95 : vector<128xf32> to vector<128x1xf32>
    %cst_35 = arith.constant 6.400000e+01 : f32
    %97 = vector.broadcast %cst_35 : f32 to vector<128x1xf32>
    %98 = arith.divf %96, %97 : vector<128x1xf32>
    %99 = vector.broadcast %98 : vector<128x1xf32> to vector<128x64xf32>
    %100 = arith.subf %90, %99 : vector<128x64xf32>
    %101 = arith.mulf %100, %100 : vector<128x64xf32>
    %cst_36 = arith.constant dense<0.000000e+00> : vector<128xf32>
    %102 = vector.multi_reduction <add>, %101, %cst_36 [1] : vector<128x64xf32> to vector<128xf32>
    %103 = vector.shape_cast %102 : vector<128xf32> to vector<128x1xf32>
    %cst_37 = arith.constant 6.400000e+01 : f32
    %104 = vector.broadcast %cst_37 : f32 to vector<128x1xf32>
    %105 = arith.divf %103, %104 : vector<128x1xf32>
    %cst_38 = arith.constant 9.99999974E-6 : f32
    %106 = vector.broadcast %cst_38 : f32 to vector<128x1xf32>
    %107 = arith.addf %105, %106 : vector<128x1xf32>
    %108 = math.rsqrt %107 : vector<128x1xf32>
    %109 = vector.broadcast %108 : vector<128x1xf32> to vector<128x64xf32>
    %110 = arith.mulf %100, %109 : vector<128x64xf32>
    %111 = vector.shape_cast %92 : vector<64xf32> to vector<1x64xf32>
    %112 = vector.broadcast %111 : vector<1x64xf32> to vector<128x64xf32>
    %113 = arith.mulf %110, %112 : vector<128x64xf32>
    %114 = vector.shape_cast %94 : vector<64xf32> to vector<1x64xf32>
    %115 = vector.broadcast %114 : vector<1x64xf32> to vector<128x64xf32>
    %116 = arith.addf %113, %115 : vector<128x64xf32>
    %117 = arith.truncf %116 : vector<128x64xf32> to vector<128x64xbf16>
    %c64 = arith.constant 64 : index
    %c0_39 = arith.constant 0 : index
    %118 = vector.load %arg8[%c64, %c0_39] : memref<320x64xbf16, #tpu.memory_space<vmem>>, vector<64x64xbf16>
    %cst_40 = arith.constant dense<0.000000e+00> : vector<128x64xf32>
    %119 = tpu.matmul %117, %118, %cst_40 {dimension_numbers = #tpu.dot_dimension_numbers<[1], [0], [0], [1], [0, 0, 1, 1], [], []>} : vector<128x64xbf16>, vector<64x64xbf16>, vector<128x64xf32> -> vector<128x64xf32>
    %120 = vector.extract_strided_slice %40 {offsets = [4, 0], sizes = [1, 64], strides = [1, 1]} : vector<16x64xf32> to vector<1x64xf32>
    %121 = vector.shape_cast %120 : vector<1x64xf32> to vector<64xf32>
    %122 = vector.shape_cast %121 : vector<64xf32> to vector<1x64xf32>
    %123 = vector.broadcast %122 : vector<1x64xf32> to vector<128x64xf32>
    %124 = arith.addf %119, %123 : vector<128x64xf32>
    %125 = vector.shape_cast %124 : vector<128x64xf32> to vector<8x16x64xf32>
    %126 = arith.truncf %3 : vector<64x64xf32> to vector<64x64xbf16>
    %c0_41 = arith.constant 0 : index
    %c0_42 = arith.constant 0 : index
    %127 = vector.load %arg7[%c0_41, %c0_42] : memref<64x128xbf16, #tpu.memory_space<vmem>>, vector<64x128xbf16>
    %cst_43 = arith.constant dense<0.000000e+00> : vector<64x128xf32>
    %128 = tpu.matmul %126, %127, %cst_43 {dimension_numbers = #tpu.dot_dimension_numbers<[1], [0], [0], [1], [0, 0, 1, 1], [], []>} : vector<64x64xbf16>, vector<64x128xbf16>, vector<64x128xf32> -> vector<64x128xf32>
    %129 = vector.extract_strided_slice %128 {offsets = [0, 0], sizes = [64, 64], strides = [1, 1]} : vector<64x128xf32> to vector<64x64xf32>
    %130 = vector.extract_strided_slice %40 {offsets = [5, 0], sizes = [1, 64], strides = [1, 1]} : vector<16x64xf32> to vector<1x64xf32>
    %131 = vector.shape_cast %130 : vector<1x64xf32> to vector<64xf32>
    %132 = vector.shape_cast %131 : vector<64xf32> to vector<1x64xf32>
    %133 = vector.broadcast %132 : vector<1x64xf32> to vector<64x64xf32>
    %134 = arith.addf %129, %133 : vector<64x64xf32>
    %135 = vector.shape_cast %134 : vector<64x64xf32> to vector<8x8x64xf32>
    %136 = vector.extract_strided_slice %128 {offsets = [0, 64], sizes = [64, 64], strides = [1, 1]} : vector<64x128xf32> to vector<64x64xf32>
    %137 = vector.extract_strided_slice %40 {offsets = [6, 0], sizes = [1, 64], strides = [1, 1]} : vector<16x64xf32> to vector<1x64xf32>
    %138 = vector.shape_cast %137 : vector<1x64xf32> to vector<64xf32>
    %139 = vector.shape_cast %138 : vector<64xf32> to vector<1x64xf32>
    %140 = vector.broadcast %139 : vector<1x64xf32> to vector<64x64xf32>
    %141 = arith.addf %136, %140 : vector<64x64xf32>
    %142 = vector.shape_cast %141 : vector<64x64xf32> to vector<8x8x64xf32>
    %143 = arith.truncf %125 : vector<8x16x64xf32> to vector<8x16x64xbf16>
    %144 = arith.truncf %135 : vector<8x8x64xf32> to vector<8x8x64xbf16>
    "tpu.trace_start"() <{level = 10 : i32, message = "bqd,bkd->bqk"}> : () -> ()
    %cst_44 = arith.constant dense<0.000000e+00> : vector<8x16x8xf32>
    %145 = tpu.matmul %143, %144, %cst_44 {dimension_numbers = #tpu.dot_dimension_numbers<[2], [2], [1], [1], [0, 0, 0, 1, 1, 1], [0], [0]>} : vector<8x16x64xbf16>, vector<8x8x64xbf16>, vector<8x16x8xf32> -> vector<8x16x8xf32>
    "tpu.trace_stop"() : () -> ()
    %cst_45 = arith.constant dense<0xFF800000> : vector<8x16xf32>
    %146 = vector.multi_reduction <maximumf>, %145, %cst_45 [2] : vector<8x16x8xf32> to vector<8x16xf32>
    %147 = vector.shape_cast %146 : vector<8x16xf32> to vector<8x16x1xf32>
    %148 = vector.broadcast %147 : vector<8x16x1xf32> to vector<8x16x8xf32>
    %149 = arith.subf %145, %148 : vector<8x16x8xf32>
    %150 = math.exp %149 : vector<8x16x8xf32>
    %cst_46 = arith.constant dense<0.000000e+00> : vector<8x16xf32>
    %151 = vector.multi_reduction <add>, %150, %cst_46 [2] : vector<8x16x8xf32> to vector<8x16xf32>
    %152 = vector.shape_cast %151 : vector<8x16xf32> to vector<8x16x1xf32>
    %153 = tpu.reciprocal %152 {approx = true} : vector<8x16x1xf32> -> vector<8x16x1xf32>
    %154 = vector.broadcast %153 : vector<8x16x1xf32> to vector<8x16x8xf32>
    %155 = arith.mulf %150, %154 : vector<8x16x8xf32>
    %156 = arith.truncf %155 : vector<8x16x8xf32> to vector<8x16x8xbf16>
    %157 = arith.truncf %142 : vector<8x8x64xf32> to vector<8x8x64xbf16>
    "tpu.trace_start"() <{level = 10 : i32, message = "bqk,bkd->bqd"}> : () -> ()
    %cst_47 = arith.constant dense<0.000000e+00> : vector<8x16x64xf32>
    %158 = tpu.matmul %156, %157, %cst_47 {dimension_numbers = #tpu.dot_dimension_numbers<[2], [1], [1], [2], [0, 0, 0, 1, 1, 2], [0], [0]>} : vector<8x16x8xbf16>, vector<8x8x64xbf16>, vector<8x16x64xf32> -> vector<8x16x64xf32>
    "tpu.trace_stop"() : () -> ()
    %159 = vector.shape_cast %158 : vector<8x16x64xf32> to vector<128x64xf32>
    %c128 = arith.constant 128 : index
    %c0_48 = arith.constant 0 : index
    %160 = vector.load %arg8[%c128, %c0_48] : memref<320x64xbf16, #tpu.memory_space<vmem>>, vector<64x64xbf16>
    %161 = vector.extract_strided_slice %40 {offsets = [7, 0], sizes = [1, 64], strides = [1, 1]} : vector<16x64xf32> to vector<1x64xf32>
    %162 = vector.shape_cast %161 : vector<1x64xf32> to vector<64xf32>
    %163 = arith.truncf %159 : vector<128x64xf32> to vector<128x64xbf16>
    %cst_49 = arith.constant dense<0.000000e+00> : vector<128x64xf32>
    %164 = tpu.matmul %163, %160, %cst_49 {dimension_numbers = #tpu.dot_dimension_numbers<[1], [0], [0], [1], [0, 0, 1, 1], [], []>} : vector<128x64xbf16>, vector<64x64xbf16>, vector<128x64xf32> -> vector<128x64xf32>
    %165 = vector.shape_cast %162 : vector<64xf32> to vector<1x64xf32>
    %166 = vector.broadcast %165 : vector<1x64xf32> to vector<128x64xf32>
    %167 = arith.addf %164, %166 : vector<128x64xf32>
    %168 = arith.addf %116, %167 : vector<128x64xf32>
    %169 = vector.extract_strided_slice %40 {offsets = [12, 0], sizes = [1, 64], strides = [1, 1]} : vector<16x64xf32> to vector<1x64xf32>
    %170 = vector.shape_cast %169 : vector<1x64xf32> to vector<64xf32>
    %171 = vector.extract_strided_slice %40 {offsets = [13, 0], sizes = [1, 64], strides = [1, 1]} : vector<16x64xf32> to vector<1x64xf32>
    %172 = vector.shape_cast %171 : vector<1x64xf32> to vector<64xf32>
    %cst_50 = arith.constant dense<0.000000e+00> : vector<128xf32>
    %173 = vector.multi_reduction <add>, %168, %cst_50 [1] : vector<128x64xf32> to vector<128xf32>
    %174 = vector.shape_cast %173 : vector<128xf32> to vector<128x1xf32>
    %cst_51 = arith.constant 6.400000e+01 : f32
    %175 = vector.broadcast %cst_51 : f32 to vector<128x1xf32>
    %176 = arith.divf %174, %175 : vector<128x1xf32>
    %177 = vector.broadcast %176 : vector<128x1xf32> to vector<128x64xf32>
    %178 = arith.subf %168, %177 : vector<128x64xf32>
    %179 = arith.mulf %178, %178 : vector<128x64xf32>
    %cst_52 = arith.constant dense<0.000000e+00> : vector<128xf32>
    %180 = vector.multi_reduction <add>, %179, %cst_52 [1] : vector<128x64xf32> to vector<128xf32>
    %181 = vector.shape_cast %180 : vector<128xf32> to vector<128x1xf32>
    %cst_53 = arith.constant 6.400000e+01 : f32
    %182 = vector.broadcast %cst_53 : f32 to vector<128x1xf32>
    %183 = arith.divf %181, %182 : vector<128x1xf32>
    %cst_54 = arith.constant 9.99999974E-6 : f32
    %184 = vector.broadcast %cst_54 : f32 to vector<128x1xf32>
    %185 = arith.addf %183, %184 : vector<128x1xf32>
    %186 = math.rsqrt %185 : vector<128x1xf32>
    %187 = vector.broadcast %186 : vector<128x1xf32> to vector<128x64xf32>
    %188 = arith.mulf %178, %187 : vector<128x64xf32>
    %189 = vector.shape_cast %170 : vector<64xf32> to vector<1x64xf32>
    %190 = vector.broadcast %189 : vector<1x64xf32> to vector<128x64xf32>
    %191 = arith.mulf %188, %190 : vector<128x64xf32>
    %192 = vector.shape_cast %172 : vector<64xf32> to vector<1x64xf32>
    %193 = vector.broadcast %192 : vector<1x64xf32> to vector<128x64xf32>
    %194 = arith.addf %191, %193 : vector<128x64xf32>
    %c192 = arith.constant 192 : index
    %c0_55 = arith.constant 0 : index
    %195 = vector.load %arg8[%c192, %c0_55] : memref<320x64xbf16, #tpu.memory_space<vmem>>, vector<64x64xbf16>
    %196 = vector.extract_strided_slice %40 {offsets = [8, 0], sizes = [1, 64], strides = [1, 1]} : vector<16x64xf32> to vector<1x64xf32>
    %197 = vector.shape_cast %196 : vector<1x64xf32> to vector<64xf32>
    %198 = arith.truncf %194 : vector<128x64xf32> to vector<128x64xbf16>
    %cst_56 = arith.constant dense<0.000000e+00> : vector<128x64xf32>
    %199 = tpu.matmul %198, %195, %cst_56 {dimension_numbers = #tpu.dot_dimension_numbers<[1], [0], [0], [1], [0, 0, 1, 1], [], []>} : vector<128x64xbf16>, vector<64x64xbf16>, vector<128x64xf32> -> vector<128x64xf32>
    %200 = vector.shape_cast %197 : vector<64xf32> to vector<1x64xf32>
    %201 = vector.broadcast %200 : vector<1x64xf32> to vector<128x64xf32>
    %202 = arith.addf %199, %201 : vector<128x64xf32>
    %cst_57 = arith.constant 0.000000e+00 : f32
    %203 = vector.broadcast %cst_57 : f32 to vector<128x64xf32>
    %204 = arith.maximumf %202, %203 : vector<128x64xf32>
    %c256 = arith.constant 256 : index
    %c0_58 = arith.constant 0 : index
    %205 = vector.load %arg8[%c256, %c0_58] : memref<320x64xbf16, #tpu.memory_space<vmem>>, vector<64x64xbf16>
    %206 = vector.extract_strided_slice %40 {offsets = [9, 0], sizes = [1, 64], strides = [1, 1]} : vector<16x64xf32> to vector<1x64xf32>
    %207 = vector.shape_cast %206 : vector<1x64xf32> to vector<64xf32>
    %208 = arith.truncf %204 : vector<128x64xf32> to vector<128x64xbf16>
    %cst_59 = arith.constant dense<0.000000e+00> : vector<128x64xf32>
    %209 = tpu.matmul %208, %205, %cst_59 {dimension_numbers = #tpu.dot_dimension_numbers<[1], [0], [0], [1], [0, 0, 1, 1], [], []>} : vector<128x64xbf16>, vector<64x64xbf16>, vector<128x64xf32> -> vector<128x64xf32>
    %210 = vector.shape_cast %207 : vector<64xf32> to vector<1x64xf32>
    %211 = vector.broadcast %210 : vector<1x64xf32> to vector<128x64xf32>
    %212 = arith.addf %209, %211 : vector<128x64xf32>
    %213 = arith.addf %194, %212 : vector<128x64xf32>
    %214 = vector.extract_strided_slice %40 {offsets = [14, 0], sizes = [1, 64], strides = [1, 1]} : vector<16x64xf32> to vector<1x64xf32>
    %215 = vector.shape_cast %214 : vector<1x64xf32> to vector<64xf32>
    %216 = vector.extract_strided_slice %40 {offsets = [15, 0], sizes = [1, 64], strides = [1, 1]} : vector<16x64xf32> to vector<1x64xf32>
    %217 = vector.shape_cast %216 : vector<1x64xf32> to vector<64xf32>
    %cst_60 = arith.constant dense<0.000000e+00> : vector<128xf32>
    %218 = vector.multi_reduction <add>, %213, %cst_60 [1] : vector<128x64xf32> to vector<128xf32>
    %219 = vector.shape_cast %218 : vector<128xf32> to vector<128x1xf32>
    %cst_61 = arith.constant 6.400000e+01 : f32
    %220 = vector.broadcast %cst_61 : f32 to vector<128x1xf32>
    %221 = arith.divf %219, %220 : vector<128x1xf32>
    %222 = vector.broadcast %221 : vector<128x1xf32> to vector<128x64xf32>
    %223 = arith.subf %213, %222 : vector<128x64xf32>
    %224 = arith.mulf %223, %223 : vector<128x64xf32>
    %cst_62 = arith.constant dense<0.000000e+00> : vector<128xf32>
    %225 = vector.multi_reduction <add>, %224, %cst_62 [1] : vector<128x64xf32> to vector<128xf32>
    %226 = vector.shape_cast %225 : vector<128xf32> to vector<128x1xf32>
    %cst_63 = arith.constant 6.400000e+01 : f32
    %227 = vector.broadcast %cst_63 : f32 to vector<128x1xf32>
    %228 = arith.divf %226, %227 : vector<128x1xf32>
    %cst_64 = arith.constant 9.99999974E-6 : f32
    %229 = vector.broadcast %cst_64 : f32 to vector<128x1xf32>
    %230 = arith.addf %228, %229 : vector<128x1xf32>
    %231 = math.rsqrt %230 : vector<128x1xf32>
    %232 = vector.broadcast %231 : vector<128x1xf32> to vector<128x64xf32>
    %233 = arith.mulf %223, %232 : vector<128x64xf32>
    %234 = vector.shape_cast %215 : vector<64xf32> to vector<1x64xf32>
    %235 = vector.broadcast %234 : vector<1x64xf32> to vector<128x64xf32>
    %236 = arith.mulf %233, %235 : vector<128x64xf32>
    %237 = vector.shape_cast %217 : vector<64xf32> to vector<1x64xf32>
    %238 = vector.broadcast %237 : vector<1x64xf32> to vector<128x64xf32>
    %239 = arith.addf %236, %238 : vector<128x64xf32>
    %240 = vector.shape_cast %239 : vector<128x64xf32> to vector<8x16x64xf32>
    %241 = vector.extract_strided_slice %5 {offsets = [2, 0], sizes = [1, 64], strides = [1, 1]} : vector<4x64xf32> to vector<1x64xf32>
    %242 = vector.shape_cast %241 : vector<1x64xf32> to vector<64xf32>
    %243 = vector.shape_cast %242 : vector<64xf32> to vector<1x1x64xf32>
    %244 = vector.broadcast %243 : vector<1x1x64xf32> to vector<8x16x64xf32>
    %245 = arith.mulf %240, %244 : vector<8x16x64xf32>
    %cst_65 = arith.constant dense<0.000000e+00> : vector<8x16xf32>
    %246 = vector.multi_reduction <add>, %245, %cst_65 [2] : vector<8x16x64xf32> to vector<8x16xf32>
    %247 = vector.extract_strided_slice %5 {offsets = [3, 0], sizes = [1, 1], strides = [1, 1]} : vector<4x64xf32> to vector<1x1xf32>
    %248 = vector.broadcast %247 : vector<1x1xf32> to vector<8x16xf32>
    %249 = arith.addf %246, %248 : vector<8x16xf32>
    %250 = arith.negf %249 : vector<8x16xf32>
    %251 = math.exp %250 : vector<8x16xf32>
    %cst_66 = arith.constant 1.000000e+00 : f32
    %252 = vector.broadcast %cst_66 : f32 to vector<8x16xf32>
    %253 = arith.addf %252, %251 : vector<8x16xf32>
    %254 = arith.divf %252, %253 : vector<8x16xf32>
    %c0_67 = arith.constant 0 : index
    %c0_68 = arith.constant 0 : index
    %255 = vector.load %arg11[%c0_67, %c0_68] : memref<8x16xf32, #tpu.memory_space<vmem>>, vector<8x16xf32>
    tpu.vector_store %arg11[%c0_67, %c0_68], %254 {strides = array<i32>} : memref<8x16xf32, #tpu.memory_space<vmem>>, vector<8x16xf32>,
    return
  }
  func.func @transform_0(%arg0: i32) -> (i32, i32, i32) {
    %c0_i32 = arith.constant 0 : i32
    %c0_i32_0 = arith.constant 0 : i32
    %c0_i32_1 = arith.constant 0 : i32
    return %arg0, %c0_i32, %c0_i32_0 : i32, i32, i32
  }
  func.func @transform_1(%arg0: i32) -> (i32, i32, i32) {
    %c0_i32 = arith.constant 0 : i32
    %c0_i32_0 = arith.constant 0 : i32
    %c0_i32_1 = arith.constant 0 : i32
    return %arg0, %c0_i32, %c0_i32_0 : i32, i32, i32
  }
  func.func @transform_2(%arg0: i32) -> (i32, i32, i32) {
    %c0_i32 = arith.constant 0 : i32
    %c0_i32_0 = arith.constant 0 : i32
    %c0_i32_1 = arith.constant 0 : i32
    %c0_i32_2 = arith.constant 0 : i32
    return %c0_i32, %c0_i32_0, %c0_i32_1 : i32, i32, i32
  }
  func.func @transform_3(%arg0: i32) -> (i32, i32, i32) {
    %c0_i32 = arith.constant 0 : i32
    %c0_i32_0 = arith.constant 0 : i32
    %c0_i32_1 = arith.constant 0 : i32
    %c0_i32_2 = arith.constant 0 : i32
    return %c0_i32, %c0_i32_0, %c0_i32_1 : i32, i32, i32
  }
  func.func @transform_4(%arg0: i32) -> (i32, i32, i32) {
    %c0_i32 = arith.constant 0 : i32
    %c0_i32_0 = arith.constant 0 : i32
    %c0_i32_1 = arith.constant 0 : i32
    %c0_i32_2 = arith.constant 0 : i32
    return %c0_i32, %c0_i32_0, %c0_i32_1 : i32, i32, i32
  }
  func.func @transform_5(%arg0: i32) -> (i32, i32) {
    %c0_i32 = arith.constant 0 : i32
    %c0_i32_0 = arith.constant 0 : i32
    %c0_i32_1 = arith.constant 0 : i32
    return %c0_i32, %c0_i32_0 : i32, i32
  }
  func.func @transform_6(%arg0: i32) -> (i32, i32) {
    %c0_i32 = arith.constant 0 : i32
    %c0_i32_0 = arith.constant 0 : i32
    %c0_i32_1 = arith.constant 0 : i32
    return %c0_i32, %c0_i32_0 : i32, i32
  }
  func.func @transform_7(%arg0: i32) -> (i32, i32) {
    %c0_i32 = arith.constant 0 : i32
    %c0_i32_0 = arith.constant 0 : i32
    %c0_i32_1 = arith.constant 0 : i32
    return %c0_i32, %c0_i32_0 : i32, i32
  }
  func.func @transform_8(%arg0: i32) -> (i32, i32) {
    %c0_i32 = arith.constant 0 : i32
    %c0_i32_0 = arith.constant 0 : i32
    %c0_i32_1 = arith.constant 0 : i32
    return %c0_i32, %c0_i32_0 : i32, i32
  }
  func.func @transform_9(%arg0: i32) -> (i32, i32) {
    %c0_i32 = arith.constant 0 : i32
    %c0_i32_0 = arith.constant 0 : i32
    %c0_i32_1 = arith.constant 0 : i32
    return %c0_i32, %c0_i32_0 : i32, i32
  }
  func.func @transform_10(%arg0: i32) -> (i32, i32) {
    %c0_i32 = arith.constant 0 : i32
    %c0_i32_0 = arith.constant 0 : i32
    return %arg0, %c0_i32 : i32, i32
  }
  func.func @transform_11(%arg0: i32) -> (i32, i32) {
    %c0_i32 = arith.constant 0 : i32
    %c0_i32_0 = arith.constant 0 : i32
    return %arg0, %c0_i32 : i32, i32
  }
}

</mosaic_0001>

<bundles_post_ra>
// kernel: met_forward.1
= control target key start
LH: loop header
LB: loop body
LE: loop exit
PB: predicated region body
PF: predicated region fallthrough
CT: control target
= control target key end

     0   :  { %17 = vsyncpa [#allocation4], 0  ;;  %s10510_s0 = inlined_call_operand.vmem [shape: f32[8,8,64], index: 0, kind: input, shape index: {}]   ;;  %s10511_s1 = inlined_call_operand.vmem [shape: f32[8,8,64], index: 1, kind: input, shape index: {}]   ;;  %s10512_s2 = inlined_call_operand.vmem [shape: bf16[6,64,192], index: 2, kind: input, shape index: {}]   ;;  %s10513_s3 = inlined_call_operand.vmem [shape: bf16[6,192,64], index: 3, kind: input, shape index: {}]   ;;  %s10514_s4 = inlined_call_operand.vmem [shape: f32[6,10,64], index: 4, kind: input, shape index: {}]   ;;  %s10515_s5 = inlined_call_operand.vmem [shape: bf16[64,192], index: 5, kind: input, shape index: {}]   ;;  %s10516_s6 = inlined_call_operand.vmem [shape: bf16[64,128], index: 6, kind: input, shape index: {}]   ;;  %s10517_s7 = inlined_call_operand.vmem [shape: bf16[320,64], index: 7, kind: input, shape index: {}]   ;;  %s10518_s8 = inlined_call_operand.vmem [shape: f32[16,64], index: 8, kind: input, shape index: {}]   ;;  %s10519_s9 = inlined_call_operand.vmem [shape: f32[4,64], index: 9, kind: input, shape index: {}]   ;;  %s10520_s10 = inlined_call_operand.hbm [shape: f32[8,16], index: 10, kind: output, shape index: {0}]   ;;  %s10521_s11 = inlined_call_operand.hbm [shape: f32[8,64], index: 11, kind: output, shape index: {1}]  }
   0x1   :  { %18 = vsyncpa [#allocation6], 0  ;;  %v40_v0 = vld [vmem:[%s10510_s0] sm:$0xff]   ;;  %v41_v1 = vld [vmem:[%s10510_s0 + $0x8] sm:$0xff]   ;;  %s7915_s14 = smov 0  }
   0x2   :  { %v42_v2 = vld [vmem:[%s10510_s0 + $0x10] sm:$0xff]   ;;  %v43_v3 = vld [vmem:[%s10510_s0 + $0x18] sm:$0xff]   ;;  %v44_v4 = vld [vmem:[%s10510_s0 + $0x20] sm:$0xff]  }
   0x3   :  { %v45_v5 = vld [vmem:[%s10510_s0 + $0x28] sm:$0xff]   ;;  %v46_v6 = vld [vmem:[%s10510_s0 + $0x30] sm:$0xff]   ;;  %v47_v7 = vld [vmem:[%s10510_s0 + $0x38] sm:$0xff]  }
   0x4 LB: > { %v7805_v8 = vmov 0   ;;  %s6504_s0 = sshll.u32 %s7803_s14, 6  ;;  %s6317_s18 = sshll.u32 %s7803_s14, 4  ;;  %v10522_v10 = vlaneseq  ;;  %v66_v39 = vpack.c.bf16 %v7795_v1, %v7799_v0  ;;  %vm120_vm0 = vcmask 523264   ;;  %s7803_s14 = sphi %s7915_s14, %s53_s14   ;;  %v7799_v0 = vphi %v40_v0, %v10561_v0   ;;  %v7795_v1 = vphi %v41_v1, %v10560_v1   ;;  %v7791_v2 = vphi %v42_v2, %v10559_v2   ;;  %v7787_v3 = vphi %v43_v3, %v10558_v3   ;;  %v7783_v4 = vphi %v44_v4, %v10557_v4   ;;  %v7779_v5 = vphi %v45_v5, %v10556_v5   ;;  %v7775_v6 = vphi %v46_v6, %v10555_v6   ;;  %v7771_v7 = vphi %v47_v7, %v10554_v7  }
   0x5   : > { %165 = vmatprep.mubr.bf16.mxu0 %v7805_v8  ;;  %s7948_s17 = scalar_lea.vmem %s10512_s2, %s6504_s0  ;;  %s6505_s19 = smul.u32 96, %s7803_s14  ;;  %v67_v40 = vpack.c.bf16 %v7787_v3, %v7791_v2  ;;  %v68_v41 = vpack.c.bf16 %v7779_v5, %v7783_v4  ;;  %v69_v42 = vpack.c.bf16 %v7771_v7, %v7775_v6  ;;  %v7807_v43 = vmov 0.0  }
   0x6   : > { %v7250_v9 = vld [vmem:[%s7948_s17 + $0x4] ss:$8 sps:$4 sm:$0xff]   ;;  %v7252_v11 = vld [vmem:[%s7948_s17] ss:$8 sps:$4 sm:$0xff]   ;;  %v7253_v12 = vld [vmem:[%s7948_s17 + $0x14] ss:$8 sps:$4 sm:$0xff]   ;;  %s63_s22 = scalar_lea.vmem %s10514_s4, %s6317_s18  ;;  %6694 = vmatprep.subr.bf16.mxu1 %v7807_v43 }
   0x7   : > { %133 = vmatprep.subr.bf16.mxu0 %v7250_v9  ;;  %v7959_v13 = vshrl.u32 %v10522_v10, 7  ;;  %v7255_v14 = vld [vmem:[%s7948_s17 + $0x10] ss:$8 sps:$4 sm:$0xff]   ;;  %v7256_v15 = vld [vmem:[%s7948_s17 + $0x24] ss:$8 sps:$4 sm:$0xff]   ;;  %s7969_s25 = scalar_lea.vmem %s10513_s3, %s6505_s19  ;;  %s7806_s26 = smov 64  }
   0x8   : > { %134 = vmatpush1.bf16.msra.mxu0 %v7252_v11  ;;  %v7258_v17 = vld [vmem:[%s7948_s17 + $0x20] ss:$8 sps:$4 sm:$0xff]   ;;  %v7259_v22 = vld [vmem:[%s7948_s17 + $0x34] ss:$8 sps:$4 sm:$0xff]   ;;  %v7261_v35 = vld [vmem:[%s7948_s17 + $0x30] ss:$8 sps:$4 sm:$0xff]  }
   0x9   : > { %10539 = vst [vmem:[#allocation9_spill] sm:$0xff] %v7959_v13  ;;  %135 = vmatprep.subr.bf16.mxu0 %v7253_v12  ;;  %v7964_v16 = vsub.s32 1, %v7959_v13  ;;  %v64_v18 = vld [vmem:[%s63_s22] sm:$0xff]  ;;  %v65_v19 = vld [vmem:[%s63_s22 + $0x8] sm:$0x3]  ;;  %v7973_v20 = vsub.s32 0, %v7959_v13 }
   0xa   : > { %v7976_v21 = vsub.s32 2, %v7959_v13  ;;  %v7981_v24 = vsub.s32 3, %v7959_v13  ;;  %v7984_v25 = vsub.s32 6, %v7959_v13  ;;  %v7987_v26 = vsub.s32 7, %v7959_v13  ;;  %s53_s14 = sadd.s32 1, %s7803_s14  }
   0xb   : > { %v221_v23 = vrot.slane %v64_v18, %v7964_v16  ;;  %v7993_v28 = vsub.s32 4, %v7959_v13  ;;  %v7996_v29 = vsub.s32 5, %v7959_v13  ;;  %v7999_v30 = vrot.slane %v65_v19, %v7973_v20  ;;  %p50_p0 = scmp.ge.s32.totalorder %s53_s14, 6  }
   0xc   : > { %10540 = vst [vmem:[#allocation10_spill] sm:$0xff] %v7976_v21  ;;  %10541 = vst [vmem:[#allocation11_spill] sm:$0xff] %v7984_v25  ;;  %136 = vmatpush1.bf16.msra.mxu0 %v7255_v14  ;;  %v7990_v27 = vrot.slane %v64_v18, %v7976_v21  ;;  %v8002_v31 = vrot.slane %v64_v18, %v7981_v24  ;;  %v8005_v32 = vrot.slane %v64_v18, %v7984_v25  ;;  %vm7808_vm1 = vmmov 0   ;;  %s7813_s18 = smov (%p50_p0), [#allocation3]   ;;  %s7814_s20 = smov (%p50_p0), [#allocation5]  }
   0xd   : > { %137 = vmatprep.subr.bf16.mxu0 %v7256_v15  ;;  %v8008_v33 = vrot.slane %v64_v18, %v7987_v26  ;;  %v8011_v34 = vrot.slane %v65_v19, %v7964_v16  ;;  %v8015_v36 = vrot.slane %v64_v18, %v7993_v28  ;;  %v8018_v37 = vrot.slane %v64_v18, %v7996_v29  ;;  %s6260_s19 = sshll.u32 (%p50_p0), %s7813_s18, 4  ;;  %s6270_s21 = sshll.u32 (%p50_p0), %s7814_s20, 4  ;;  %s6261_s19 = int_to_ptr.vmem [resolvable:$true] %s6260_s19  ;;  %s10476_s21 = int_to_ptr.vmem [resolvable:$true] %s6270_s21 }
   0xe   : > { %223 = vrot.lane.b32.xlu0 %v221_v23, %s7806_s26  ;;  %v8022_v38 = vrot.slane %v64_v18, %v7973_v20  ;;  %6696 = vmatprep.mubr.msk.bf16.mxu1 %vm7808_vm1, %v7807_v43  ;;  %vm762_vm2 = vcmask 1043456   ;;  %vm654_vm3 = vcmask 64512   ;;  %vm7812_vm4 = vmmov (%p50_p0), 0   ;;  %s7685_s22 = scalar_lea.vmem (%p50_p0), %s6261_s19, 128  ;;  %p7690_p2 = scmp.lt.s32.totalorder (%p50_p0), %s6261_s19, %s6261_s19 }
   0xf   :  { %vm2662_vm5 = vcmask (%p50_p0), 130048   ;;  %vm1774_vm6 = vcmask (%p50_p0), 1041409   ;;  %vm1777_vm7 = vcmask (%p50_p0), 1042434   ;;  %vm1780_vm8 = vcmask (%p50_p0), 1043459   ;;  %p7686_p1 = scmp.ne.s32.totalorder (%p50_p0), %s6261_s19, %s7685_s22  ;;  %p7691_p3 = scmp.lt.s32.totalorder (%p50_p0), %s7685_s22, %s7685_s22 }
  0x10   : > { %138 = vmatpush1.bf16.msra.mxu0 %v7258_v17  ;;  %vm1783_vm9 = vcmask (%p50_p0), 1044484   ;;  %vm1786_vm10 = vcmask (%p50_p0), 1045509   ;;  %vm1789_vm11 = vcmask (%p50_p0), 1046534   ;;  %vm1797_vm12 = vcmask (%p50_p0), 522240  }
  0x11   : > { %139 = vmatprep.subr.bf16.mxu0 %v7259_v22  ;;  %vm1793_vm13 = vcmask (%p50_p0), 523271   ;;  %vm6179_vm14 = vcmask (%p50_p0), 130112   ;;  %vm6250_vm15 = vcmask (%p50_p0), 1047559   ;;  %p7692_p4 = por (%p50_p0), %p7691_p3, %p7690_p2 }
  0x13   :  { %p7693_p5 = pnand (%p50_p0), %p7692_p4, %p7686_p1 }
  0x14   : > { %140 = vmatpush1.bf16.msra.mxu0 %v7261_v35 }
  0x15   : > { %6724 = vmatprep.subr.bf16.mxu0 %v7807_v43 }
  0x17   : > { %6327 = vmatmul.mubr.msk.bf16.vlgmr.msra.gmra.mrb[0].mxu0 %vm120_vm0, %v66_v39 }
  0x18   : > { %175 = vmatprep.mubr.bf16.mxu0 %v7805_v8 }
  0x1f   : > { %6328 = vmatmul.mubr.msk.bf16.gmra.mrb[4].mxu0 %vm120_vm0, %v67_v40 }
  0x20   : > { %185 = vmatprep.mubr.bf16.mxu0 %v7805_v8 }
  0x27   : > { %6329 = vmatmul.mubr.msk.bf16.gmra.mrb[8].mxu0 %vm120_vm0, %v68_v41 }
  0x28   : > { %195 = vmatprep.mubr.bf16.mxu0 %v7805_v8 }
  0x2f   : > { %6330 = vmatmul.mubr.msk.bf16.gmra.mrb[12].mxu0 %vm120_vm0, %v69_v42 }
  0x30   : > { %6726 = vmatprep.mubr.msk.bf16.mxu0 %vm7808_vm1, %v7807_v43 }
  0x80   : > { %v224_v44 = vpop.permute.xlu0 %223 }
  0xea   : > { %v167_v45 = vpop.f32.mrb[0].mxu0 }
  0xeb   : > { %v8043_v46 = vadd.f32 %v8022_v38, %v167_v45  ;;  %v226_v47 = vadd.f32 %v224_v44, %v167_v45  ;;  %v169_v48 = vpop.f32.mrb[1].mxu0 }
  0xec   : > { %v8046_v49 = vadd.f32 %v7990_v27, %v169_v48  ;;  %v171_v50 = vpop.f32.mrb[2].mxu0 }
  0xed   : > { %v254_v51 = vpack.c.bf16 %v226_v47, %v226_v47  ;;  %v8049_v52 = vadd.f32 %v8022_v38, %v171_v50  ;;  %v227_v53 = vadd.f32 %v224_v44, %v171_v50  ;;  %v173_v54 = vpop.f32.mrb[3].mxu0 }
  0xee   : > { %v8052_v55 = vadd.f32 %v7990_v27, %v173_v54 }
  0xef   : > { %263 = vrot.lane.b32.xlu0 %v254_v51, %s7806_s26  ;;  %v255_v56 = vpack.c.bf16 %v227_v53, %v227_v53 }
  0xf1   : > { %312 = vrot.lane.b32.xlu1 %v255_v56, %s7806_s26 }
  0xf2   : > { %v177_v57 = vpop.f32.mrb[4].mxu0 }
  0xf3   : > { %v8057_v58 = vadd.f32 %v8022_v38, %v177_v57  ;;  %v228_v59 = vadd.f32 %v224_v44, %v177_v57  ;;  %v179_v60 = vpop.f32.mrb[5].mxu0 }
  0xf4   : > { %v240_v61 = vadd.f32 %v7990_v27, %v179_v60  ;;  %v181_v62 = vpop.f32.mrb[6].mxu0 }
  0xf5   : > { %v256_v63 = vpack.c.bf16 %v228_v59, %v228_v59  ;;  %v8061_v8 = vadd.f32 %v8022_v38, %v181_v62  ;;  %v229_v9 = vadd.f32 %v224_v44, %v181_v62  ;;  %v183_v11 = vpop.f32.mrb[7].mxu0 }
  0xf6   : > { %v753_v12 = vpack.c.bf16 %v240_v61, %v240_v61  ;;  %v241_v14 = vadd.f32 %v7990_v27, %v183_v11 }
  0xf7   : > { %v257_v15 = vpack.c.bf16 %v229_v9, %v229_v9  ;;  %361 = vrot.lane.b32.xlu1 %v256_v63, %s7806_s26 }
  0xf8   : > { %v8066_v17 = vsel %vm762_vm2, %v753_v12, 0  ;;  %v754_v18 = vpack.c.bf16 %v241_v14, %v241_v14 }
  0xf9   : > { %410 = vrot.lane.b32.xlu0 %v257_v15, %s7806_s26 }
  0xfa   : > { %v8070_v19 = vsel %vm762_vm2, %v754_v18, 0  ;;  %v187_v22 = vpop.f32.mrb[8].mxu0 }
  0xfb   : > { %v8073_v23 = vadd.f32 %v8022_v38, %v187_v22  ;;  %v230_v35 = vadd.f32 %v224_v44, %v187_v22  ;;  %v189_v39 = vpop.f32.mrb[9].mxu0 }
  0xfc   : > { %v242_v40 = vadd.f32 %v7990_v27, %v189_v39  ;;  %v191_v41 = vpop.f32.mrb[10].mxu0 }
  0xfd   : > { %v258_v42 = vpack.c.bf16 %v230_v35, %v230_v35  ;;  %v215_v45 = vadd.f32 %v8022_v38, %v191_v41  ;;  %v231_v47 = vadd.f32 %v224_v44, %v191_v41  ;;  %v193_v48 = vpop.f32.mrb[11].mxu0 }
  0xfe   : > { %v755_v50 = vpack.c.bf16 %v242_v40, %v242_v40  ;;  %v243_v51 = vadd.f32 %v7990_v27, %v193_v48 }
  0xff   : > { %v259_v53 = vpack.c.bf16 %v231_v47, %v231_v47  ;;  %459 = vrot.lane.b32.xlu1 %v258_v42, %s7806_s26 }
 0x100   : > { %v8080_v54 = vsel %vm762_vm2, %v755_v50, 0  ;;  %v756_v56 = vpack.c.bf16 %v243_v51, %v243_v51  ;;  %v247_v51 = vpack.c.bf16 %v8049_v52, %v8049_v52  ;;  %v251_v52 = vpack.c.bf16 %v215_v45, %v215_v45 }
 0x101   : > { %508 = vrot.lane.b32.xlu0 %v259_v53, %s7806_s26  ;;  %v752_v45 = vpack.c.bf16 %v8052_v55, %v8052_v55 }
 0x102   : > { %v8084_v57 = vsel %vm762_vm2, %v756_v56, 0  ;;  %v197_v59 = vpop.f32.mrb[12].mxu0 }
 0x103   : > { %v8087_v60 = vadd.f32 %v8022_v38, %v197_v59  ;;  %v232_v61 = vadd.f32 %v224_v44, %v197_v59  ;;  %v199_v62 = vpop.f32.mrb[13].mxu0  ;;  %v248_v59 = vpack.c.bf16 %v8057_v58, %v8057_v58 }
 0x104   : > { %v244_v63 = vadd.f32 %v7990_v27, %v199_v62  ;;  %v201_v9 = vpop.f32.mrb[14].mxu0 }
 0x105   : > { %v260_v11 = vpack.c.bf16 %v232_v61, %v232_v61  ;;  %v217_v12 = vadd.f32 %v8022_v38, %v201_v9  ;;  %v233_v14 = vadd.f32 %v224_v44, %v201_v9  ;;  %v203_v15 = vpop.f32.mrb[15].mxu0  ;;  %v249_v9 = vpack.c.bf16 %v8061_v8, %v8061_v8 }
 0x106   : > { %v757_v18 = vpack.c.bf16 %v244_v63, %v244_v63  ;;  %v245_v22 = vadd.f32 %v7990_v27, %v203_v15  ;;  %v246_v27 = vpack.c.bf16 %v8043_v46, %v8043_v46  ;;  %v810_v15 = vsel %vm762_vm2, %v752_v45, 0 }
 0x107   : > { %v261_v35 = vpack.c.bf16 %v233_v14, %v233_v14  ;;  %557 = vrot.lane.b32.xlu1 %v260_v11, %s7806_s26  ;;  %v253_v11 = vpack.c.bf16 %v217_v12, %v217_v12  ;;  %v250_v8 = vpack.c.bf16 %v8073_v23, %v8073_v23 }
 0x108   : > { %v8094_v39 = vsel %vm762_vm2, %v757_v18, 0  ;;  %v758_v40 = vpack.c.bf16 %v245_v22, %v245_v22  ;;  %v751_v18 = vpack.c.bf16 %v8046_v49, %v8046_v49  ;;  %v252_v22 = vpack.c.bf16 %v8087_v60, %v8087_v60 }
 0x109   : > { %606 = vrot.lane.b32.xlu0 %v261_v35, %s7806_s26 }
 0x10a   : > { %v8098_v41 = vsel %vm762_vm2, %v758_v40, 0  ;;  %v764_v35 = vsel %vm762_vm2, %v751_v18, 0 }
 0x161   : > { %v264_v42 = vpop.permute.xlu0 %263 }
 0x162   : > { %v269_v38 = vsel %vm120_vm0, %v264_v42, 0 }
 0x163   : > { %6695 = vmatpush3.bf16.xpose.msra.mxu1 %v269_v38  ;;  %v313_v44 = vpop.permute.xlu1 %312 }
 0x164   : > { %6700 = vmatprep.subr.bf16.mxu1 %v7807_v43  ;;  %v318_v47 = vsel %vm120_vm0, %v313_v44, 0 }
 0x169   : > { %v362_v48 = vpop.permute.xlu1 %361 }
 0x16a   : > { %6697 = vmatmul.mubr.msk.bf16.vlgmr.msra.gmra.mrb[0].mxu1 %vm120_vm0, %v246_v27  ;;  %v367_v53 = vsel %vm120_vm0, %v362_v48, 0 }
 0x16b   : > { %6701 = vmatpush3.bf16.xpose.msra.mxu1 %v318_v47  ;;  %6702 = vmatprep.mubr.msk.bf16.mxu1 %vm7808_vm1, %v7807_v43  ;;  %v411_v50 = vpop.permute.xlu0 %410 }
 0x16c   : > { %6706 = vmatprep.subr.bf16.mxu1 %v7807_v43  ;;  %v416_v61 = vsel %vm120_vm0, %v411_v50, 0 }
 0x171   : > { %v460_v58 = vpop.permute.xlu1 %459 }
 0x172   : > { %6703 = vmatmul.mubr.msk.bf16.vlgmr.msra.gmra.mrb[4].mxu1 %vm120_vm0, %v247_v51  ;;  %v465_v14 = vsel %vm120_vm0, %v460_v58, 0 }
 0x173   : > { %6707 = vmatpush3.bf16.xpose.msra.mxu1 %v367_v53  ;;  %v509_v46 = vpop.permute.xlu0 %508  ;;  %6708 = vmatprep.mubr.msk.bf16.mxu1 %vm7808_vm1, %v7807_v43 }
 0x174   : > { %v514_v56 = vsel %vm120_vm0, %v509_v46, 0  ;;  %6712 = vmatprep.subr.bf16.mxu1 %v7807_v43 }
 0x175   : > { %6725 = vmatpush3.bf16.xpose.msra.mxu0 %v514_v56 }
 0x176   : > { %6736 = vmatprep.subr.bf16.mxu0 %v7807_v43 }
 0x179   : > { %v558_v55 = vpop.permute.xlu1 %557 }
 0x17a   : > { %6709 = vmatmul.mubr.msk.bf16.vlgmr.msra.gmra.mrb[8].mxu1 %vm120_vm0, %v248_v59  ;;  %v563_v12 = vsel %vm120_vm0, %v558_v55, 0 }
 0x17b   : > { %6713 = vmatpush3.bf16.xpose.msra.mxu1 %v416_v61  ;;  %v607_v62 = vpop.permute.xlu0 %606  ;;  %6714 = vmatprep.mubr.msk.bf16.mxu1 %vm7808_vm1, %v7807_v43 }
 0x17c   : > { %v612_v63 = vsel %vm120_vm0, %v607_v62, 0  ;;  %6727 = vmatmul.mubr.msk.bf16.vlgmr.msra.gmra.mrb[16].mxu0 %vm120_vm0, %v251_v52  ;;  %6718 = vmatprep.subr.bf16.mxu1 %v7807_v43 }
 0x17d   : > { %6737 = vmatpush3.bf16.xpose.msra.mxu0 %v612_v63  ;;  %6738 = vmatprep.mubr.msk.bf16.mxu0 %vm7808_vm1, %v7807_v43 }
 0x17e   : > { %6748 = vmatprep.subr.bf16.mxu0 %v7807_v43 }
 0x182   : > { %6715 = vmatmul.mubr.msk.bf16.vlgmr.msra.gmra.mrb[12].mxu1 %vm120_vm0, %v249_v9 }
 0x183   : > { %6719 = vmatpush3.bf16.xpose.msra.mxu1 %v465_v14  ;;  %6720 = vmatprep.mubr.msk.bf16.mxu1 %vm7808_vm1, %v7807_v43 }
 0x184   : > { %6739 = vmatmul.mubr.msk.bf16.vlgmr.msra.gmra.mrb[20].mxu0 %vm120_vm0, %v253_v11  ;;  %6730 = vmatprep.subr.bf16.mxu1 %v7807_v43 }
 0x185   : > { %6749 = vmatpush3.bf16.msra.mxu0 %v810_v15  ;;  %6750 = vmatprep.mubr.msk.bf16.mxu0 %vm7808_vm1, %v7807_v43 }
 0x186   : > { %6760 = vmatprep.subr.bf16.mxu0 %v7807_v43 }
 0x18a   : > { %6721 = vmatmul.mubr.msk.bf16.vlgmr.msra.gmra.mrb[16].mxu1 %vm120_vm0, %v250_v8 }
 0x18b   : > { %6731 = vmatpush3.bf16.xpose.msra.mxu1 %v563_v12  ;;  %6732 = vmatprep.mubr.msk.bf16.mxu1 %vm7808_vm1, %v7807_v43 }
 0x18c   : > { %6742 = vmatprep.subr.bf16.mxu1 %v7807_v43 }
 0x192   : > { %6733 = vmatmul.mubr.msk.bf16.vlgmr.msra.gmra.mrb[20].mxu1 %vm120_vm0, %v252_v22 }
 0x193   : > { %6743 = vmatpush3.bf16.msra.mxu1 %v764_v35  ;;  %6744 = vmatprep.mubr.msk.bf16.mxu1 %vm7808_vm1, %v7807_v43 }
 0x194   : > { %6754 = vmatprep.subr.bf16.mxu1 %v7807_v43 }
 0x23d   : > { %v305_v23 = vpop.f32.mrb[0].mxu1 }
 0x23e   : > { %v6698_v40 = vpop.f32.mrb[1].mxu1  ;;  %v655_v42 = vsel %vm654_vm3, %v305_v23, -inf }
 0x23f   : > { %v308_v38 = vpop.f32.mrb[2].mxu1  ;;  %656 = vmax.xlane.f32.xlu1 %v655_v42 }
 0x240   : > { %v6699_v49 = vpop.f32.mrb[3].mxu1 }
 0x245   : > { %v354_v44 = vpop.f32.mrb[4].mxu1 }
 0x246   : > { %v6704_v60 = vpop.f32.mrb[5].mxu1  ;;  %v658_v27 = vsel %vm654_vm3, %v354_v44, -inf }
 0x247   : > { %v357_v47 = vpop.f32.mrb[6].mxu1  ;;  %659 = vmax.xlane.f32.xlu0 %v658_v27 }
 0x248   : > { %v6705_v48 = vpop.f32.mrb[7].mxu1 }
 0x24d   : > { %v403_v50 = vpop.f32.mrb[8].mxu1 }
 0x24e   : > { %v6710_v51 = vpop.f32.mrb[9].mxu1  ;;  %v661_v53 = vsel %vm654_vm3, %v403_v50, -inf }
 0x24f   : > { %v406_v46 = vpop.f32.mrb[10].mxu1  ;;  %662 = vmax.xlane.f32.xlu0 %v661_v53  ;;  %v550_v56 = vpop.f32.mrb[16].mxu0 }
 0x250   : > { %v6711_v59 = vpop.f32.mrb[11].mxu1  ;;  %v6728_v52 = vpop.f32.mrb[17].mxu0  ;;  %v670_v12 = vsel %vm654_vm3, %v550_v56, -inf }
 0x251   : > { %v553_v61 = vpop.f32.mrb[18].mxu0 }
 0x252   : > { %v6729_v62 = vpop.f32.mrb[19].mxu0 }
 0x255   : > { %v452_v63 = vpop.f32.mrb[12].mxu1 }
 0x256   : > { %v6716_v58 = vpop.f32.mrb[13].mxu1  ;;  %v664_v45 = vsel %vm654_vm3, %v452_v63, -inf }
 0x257   : > { %v455_v9 = vpop.f32.mrb[14].mxu1  ;;  %665 = vmax.xlane.f32.xlu1 %v664_v45  ;;  %v648_v11 = vpop.f32.mrb[20].mxu0 }
 0x258   : > { %v6717_v14 = vpop.f32.mrb[15].mxu1  ;;  %v6740_v15 = vpop.f32.mrb[21].mxu0  ;;  %v676_v40 = vsel %vm654_vm3, %v648_v11, -inf }
 0x259   : > { %v651_v55 = vpop.f32.mrb[22].mxu0 }
 0x25a   : > { %v6741_v8 = vpop.f32.mrb[23].mxu0 }
 0x25b   : > { %671 = vmax.xlane.f32.xlu1 %v670_v12 }
 0x25d   : > { %v501_v18 = vpop.f32.mrb[16].mxu1 }
 0x25e   : > { %v6722_v22 = vpop.f32.mrb[17].mxu1  ;;  %v667_v35 = vsel %vm654_vm3, %v501_v18, -inf }
 0x25f   : > { %v504_v42 = vpop.f32.mrb[18].mxu1  ;;  %668 = vmax.xlane.f32.xlu0 %v667_v35  ;;  %677 = vmax.xlane.f32.xlu1 %v676_v40 }
 0x260   : > { %v6723_v38 = vpop.f32.mrb[19].mxu1 }
 0x265   : > { %v599_v49 = vpop.f32.mrb[20].mxu1 }
 0x266   : > { %v6734_v60 = vpop.f32.mrb[21].mxu1  ;;  %v673_v27 = vsel %vm654_vm3, %v599_v49, -inf }
 0x267   : > { %v602_v47 = vpop.f32.mrb[22].mxu1  ;;  %674 = vmax.xlane.f32.xlu0 %v673_v27 }
 0x268   : > { %v6735_v48 = vpop.f32.mrb[23].mxu1 }
 0x2cc   : > { %v657_v51 = vpop.xlane.xlu1 %656 }
 0x2cd   : > { %v679_v53 = vsub.f32 %v305_v23, %v657_v51 }
 0x2cf   : > { %v687_v46 = vmul.f32 1.442695, %v679_v53 }
 0x2d1   : > { %7274 = vpow2.f32 %v687_v46 }
 0x2d4   : > { %v660_v59 = vpop.xlane.xlu0 %659 }
 0x2d5   : > { %v680_v52 = vsub.f32 %v354_v44, %v660_v59 }
 0x2d7   : > { %v689_v61 = vmul.f32 1.442695, %v680_v52 }
 0x2d9   : > { %7276 = vpow2.f32 %v689_v61 }
 0x2db   : > { %v7275_v62 = vpop.eup %7274 }
 0x2dc   : > { %v663_v58 = vpop.xlane.xlu0 %662  ;;  %v703_v45 = vsel %vm654_vm3, %v7275_v62, 0.0 }
 0x2dd   : > { %v681_v9 = vsub.f32 %v403_v50, %v663_v58  ;;  %704 = vadd.xlane.f32.xlu0 %v703_v45 }
 0x2df   : > { %v691_v14 = vmul.f32 1.442695, %v681_v9 }
 0x2e1   : > { %7278 = vpow2.f32 %v691_v14 }
 0x2e3   : > { %v7277_v15 = vpop.eup %7276 }
 0x2e4   : > { %v666_v55 = vpop.xlane.xlu1 %665  ;;  %v706_v8 = vsel %vm654_vm3, %v7277_v15, 0.0 }
 0x2e5   : > { %v682_v12 = vsub.f32 %v452_v63, %v666_v55  ;;  %707 = vadd.xlane.f32.xlu1 %v706_v8 }
 0x2e7   : > { %v693_v23 = vmul.f32 1.442695, %v682_v12 }
 0x2e8   : > { %v672_v22 = vpop.xlane.xlu1 %671 }
 0x2e9   : > { %7280 = vpow2.f32 %v693_v23  ;;  %v684_v44 = vsub.f32 %v550_v56, %v672_v22 }
 0x2eb   : > { %v7279_v35 = vpop.eup %7278  ;;  %v697_v40 = vmul.f32 1.442695, %v684_v44 }
 0x2ec   : > { %v669_v42 = vpop.xlane.xlu0 %668  ;;  %v678_v38 = vpop.xlane.xlu1 %677  ;;  %v709_v60 = vsel %vm654_vm3, %v7279_v35, 0.0 }
 0x2ed   : > { %7282 = vpow2.f32 %v697_v40  ;;  %v683_v50 = vsub.f32 %v501_v18, %v669_v42  ;;  %v686_v27 = vsub.f32 %v648_v11, %v678_v38  ;;  %710 = vadd.xlane.f32.xlu0 %v709_v60 }
 0x2ef   : > { %v695_v47 = vmul.f32 1.442695, %v683_v50  ;;  %v701_v48 = vmul.f32 1.442695, %v686_v27 }
 0x2f1   : > { %7284 = vpow2.f32 %v695_v47 }
 0x2f2   : > { %7286 = vpow2.f32 %v701_v48 }
 0x2f3   : > { %v7281_v63 = vpop.eup %7280 }
 0x2f4   : > { %v675_v51 = vpop.xlane.xlu0 %674  ;;  %v712_v53 = vsel %vm654_vm3, %v7281_v63, 0.0 }
 0x2f5   : > { %v685_v46 = vsub.f32 %v599_v49, %v675_v51  ;;  %713 = vadd.xlane.f32.xlu1 %v712_v53 }
 0x2f7   : > { %v7283_v56 = vpop.eup %7282  ;;  %v699_v59 = vmul.f32 1.442695, %v685_v46 }
 0x2f8   : > { %v718_v52 = vsel %vm654_vm3, %v7283_v56, 0.0 }
 0x2f9   : > { %7288 = vpow2.f32 %v699_v59  ;;  %719 = vadd.xlane.f32.xlu1 %v718_v52 }
 0x2fb   : > { %v7285_v61 = vpop.eup %7284 }
 0x2fc   : > { %v8173_v18 = vpop.eup %7286  ;;  %v715_v11 = vsel %vm654_vm3, %v7285_v61, 0.0 }
 0x2fd   : > { %716 = vadd.xlane.f32.xlu0 %v715_v11  ;;  %v724_v58 = vsel %vm654_vm3, %v8173_v18, 0.0 }
 0x2fe   : > { %725 = vadd.xlane.f32.xlu1 %v724_v58  ;;  %v7265_v58 = vld [vmem:[%s7969_s25 + $0x18] sm:$0xff]  }
 0x303   : > { %v7289_v45 = vpop.eup %7288 }
 0x304   : > { %v721_v49 = vsel %vm654_vm3, %v7289_v45, 0.0 }
 0x305   : > { %722 = vadd.xlane.f32.xlu0 %v721_v49 }
 0x36a   : > { %v705_v9 = vpop.xlane.xlu0 %704 }
 0x36b   : > { %7290 = vrcp.f32 %v705_v9 }
 0x372   : > { %v708_v14 = vpop.xlane.xlu1 %707 }
 0x373   : > { %7292 = vrcp.f32 %v708_v14 }
 0x375   : > { %v7291_v55 = vpop.eup %7290 }
 0x376   : > { %v735_v8 = vmul.f32 %v7291_v55, %v7275_v62 }
 0x378   : > { %v743_v12 = vpack.c.bf16 %v735_v8, %v735_v8 }
 0x37a   : > { %6745 = vmatmul.mubr.msk.bf16.vlgmr.msra.gmra.mrb[24].mxu1 %vm654_vm3, %v743_v12  ;;  %v711_v23 = vpop.xlane.xlu0 %710 }
 0x37b   : > { %6755 = vmatpush3.bf16.msra.mxu1 %v8066_v17  ;;  %7294 = vrcp.f32 %v711_v23  ;;  %6756 = vmatprep.mubr.msk.bf16.mxu1 %vm7808_vm1, %v7807_v43 }
 0x37c   : > { %6766 = vmatprep.subr.bf16.mxu1 %v7807_v43 }
 0x37d   : > { %v7293_v22 = vpop.eup %7292 }
 0x37e   : > { %v736_v44 = vmul.f32 %v7293_v22, %v7277_v15 }
 0x380   : > { %v744_v40 = vpack.c.bf16 %v736_v44, %v736_v44 }
 0x382   : > { %6751 = vmatmul.mubr.msk.bf16.vlgmr.msra.gmra.mrb[24].mxu0 %vm654_vm3, %v744_v40  ;;  %v714_v42 = vpop.xlane.xlu1 %713 }
 0x383   : > { %6761 = vmatpush3.bf16.msra.mxu0 %v8070_v19  ;;  %7296 = vrcp.f32 %v714_v42  ;;  %6762 = vmatprep.mubr.msk.bf16.mxu0 %vm7808_vm1, %v7807_v43 }
 0x384   : > { %6772 = vmatprep.subr.bf16.mxu0 %v7807_v43 }
 0x385   : > { %v7295_v17 = vpop.eup %7294 }
 0x386   : > { %v737_v62 = vmul.f32 %v7295_v17, %v7279_v35  ;;  %v720_v38 = vpop.xlane.xlu1 %719 }
 0x387   : > { %7298 = vrcp.f32 %v720_v38 }
 0x388   : > { %v745_v60 = vpack.c.bf16 %v737_v62, %v737_v62 }
 0x38a   : > { %6757 = vmatmul.mubr.msk.bf16.vlgmr.msra.gmra.mrb[28].mxu1 %vm654_vm3, %v745_v60  ;;  %v717_v15 = vpop.xlane.xlu0 %716 }
 0x38b   : > { %6767 = vmatpush3.bf16.msra.mxu1 %v8080_v54  ;;  %7300 = vrcp.f32 %v717_v15  ;;  %6768 = vmatprep.mubr.msk.bf16.mxu1 %vm7808_vm1, %v7807_v43  ;;  %v726_v19 = vpop.xlane.xlu1 %725 }
 0x38c   : > { %6778 = vmatprep.subr.bf16.mxu1 %v7807_v43  ;;  %7302 = vrcp.f32 %v726_v19 }
 0x38d   : > { %v7297_v50 = vpop.eup %7296 }
 0x38e   : > { %v738_v27 = vmul.f32 %v7297_v50, %v7281_v63 }
 0x390   : > { %v746_v47 = vpack.c.bf16 %v738_v27, %v738_v27 }
 0x391   : > { %v7299_v35 = vpop.eup %7298 }
 0x392   : > { %v723_v48 = vpop.xlane.xlu0 %722  ;;  %6763 = vmatmul.mubr.msk.bf16.vlgmr.msra.gmra.mrb[28].mxu0 %vm654_vm3, %v746_v47  ;;  %v740_v54 = vmul.f32 %v7299_v35, %v7283_v56 }
 0x393   : > { %7304 = vrcp.f32 %v723_v48  ;;  %6773 = vmatpush3.bf16.msra.mxu0 %v8084_v57  ;;  %6774 = vmatprep.mubr.msk.bf16.mxu0 %vm7808_vm1, %v7807_v43 }
 0x394   : > { %6784 = vmatprep.subr.bf16.mxu0 %v7807_v43  ;;  %v748_v63 = vpack.c.bf16 %v740_v54, %v740_v54 }
 0x395   : > { %v7301_v51 = vpop.eup %7300 }
 0x396   : > { %v739_v53 = vmul.f32 %v7301_v51, %v7285_v61  ;;  %v7303_v59 = vpop.eup %7302 }
 0x397   : > { %v742_v57 = vmul.f32 %v7303_v59, %v8173_v18  ;;  %v7264_v18 = vld [vmem:[%s7969_s25 + $0x10] sm:$0xff]  }
 0x398   : > { %v747_v46 = vpack.c.bf16 %v739_v53, %v739_v53 }
 0x399   : > { %v750_v11 = vpack.c.bf16 %v742_v57, %v742_v57 }
 0x39a   : > { %6769 = vmatmul.mubr.msk.bf16.vlgmr.msra.gmra.mrb[32].mxu1 %vm654_vm3, %v747_v46  ;;  %6775 = vmatmul.mubr.msk.bf16.vlgmr.msra.gmra.mrb[32].mxu0 %vm654_vm3, %v748_v63 }
 0x39b   : > { %6779 = vmatpush3.bf16.msra.mxu1 %v8094_v39  ;;  %6785 = vmatpush3.bf16.msra.mxu0 %v8098_v41  ;;  %v7262_v39 = vld [vmem:[%s7969_s25] sm:$0xff]   ;;  %v7263_v41 = vld [vmem:[%s7969_s25 + $0x8] sm:$0xff]  }
 0x39c   : > { %6780 = vmatprep.mubr.msk.bf16.mxu1 %vm7808_vm1, %v7807_v43  ;;  %6786 = vmatprep.mubr.msk.bf16.mxu0 %vm7808_vm1, %v7807_v43 }
 0x39d   : > { %v7305_v56 = vpop.eup %7304  ;;  %6790 = vmatprep.subr.bf16.mxu1 %v7262_v39 }
 0x39e   : > { %v741_v52 = vmul.f32 %v7305_v56, %v7289_v45 }
 0x3a0   : > { %v749_v61 = vpack.c.bf16 %v741_v52, %v741_v52 }
 0x3a2   : > { %6781 = vmatmul.mubr.msk.bf16.vlgmr.msra.gmra.mrb[36].mxu1 %vm654_vm3, %v749_v61  ;;  %6787 = vmatmul.mubr.msk.bf16.vlgmr.msra.gmra.mrb[36].mxu0 %vm654_vm3, %v750_v11 }
 0x3a3   : > { %6791 = vmatpush3.bf16.msra.mxu1 %v7262_v39 }
 0x3a4   : > { %6792 = vmatprep.subr.bf16.mxu1 %v7263_v41 }
 0x3a7   : > { %6793 = vmatpush3.bf16.msra.mxu1 %v7263_v41 }
 0x3a8   : > { %6794 = vmatprep.subr.bf16.mxu1 %v7264_v18 }
 0x3ab   : > { %6795 = vmatpush3.bf16.msra.mxu1 %v7264_v18 }
 0x3ac   : > { %6796 = vmatprep.subr.bf16.mxu1 %v7265_v58 }
 0x3af   : > { %6797 = vmatpush3.bf16.msra.mxu1 %v7265_v58 }
 0x44d   : > { %v800_v43 = vpop.f32.mrb[24].mxu1 }
 0x44e   : > { %v6746_v45 = vpop.f32.mrb[25].mxu1 }
 0x44f   : > { %v803_v49 = vpop.f32.mrb[26].mxu1 }
 0x450   : > { %v6747_v9 = vpop.f32.mrb[27].mxu1 }
 0x455   : > { %v846_v14 = vpop.f32.mrb[24].mxu0 }
 0x456   : > { %v1139_v55 = vpack.c.bf16 %v846_v14, %v800_v43  ;;  %v6752_v8 = vpop.f32.mrb[25].mxu0 }
 0x457   : > { %v849_v12 = vpop.f32.mrb[26].mxu0 }
 0x458   : > { %v6753_v23 = vpop.f32.mrb[27].mxu0  ;;  %6798 = vmatprep.mubr.msk.bf16.mxu1 %vm120_vm0, %v1139_v55 }
 0x45d   : > { %v892_v22 = vpop.f32.mrb[28].mxu1 }
 0x45e   : > { %v6758_v44 = vpop.f32.mrb[29].mxu1 }
 0x45f   : > { %v895_v40 = vpop.f32.mrb[30].mxu1 }
 0x460   : > { %v6759_v42 = vpop.f32.mrb[31].mxu1 }
 0x465   : > { %v938_v17 = vpop.f32.mrb[28].mxu0 }
 0x466   : > { %v1140_v62 = vpack.c.bf16 %v938_v17, %v892_v22  ;;  %v6764_v38 = vpop.f32.mrb[29].mxu0 }
 0x467   : > { %v941_v60 = vpop.f32.mrb[30].mxu0 }
 0x468   : > { %v6765_v15 = vpop.f32.mrb[31].mxu0  ;;  %6799 = vmatmul.mubr.msk.bf16.vlgmr.msra.gmra.mrb[40].mxu1 %vm120_vm0, %v1140_v62 }
 0x46d   : > { %v984_v19 = vpop.f32.mrb[32].mxu1  ;;  %v1030_v50 = vpop.f32.mrb[32].mxu0 }
 0x46e   : > { %v1141_v27 = vpack.c.bf16 %v1030_v50, %v984_v19  ;;  %v6770_v47 = vpop.f32.mrb[33].mxu1  ;;  %v6776_v35 = vpop.f32.mrb[33].mxu0 }
 0x46f   : > { %v987_v48 = vpop.f32.mrb[34].mxu1  ;;  %v1033_v54 = vpop.f32.mrb[34].mxu0 }
 0x470   : > { %v6771_v51 = vpop.f32.mrb[35].mxu1  ;;  %v6777_v53 = vpop.f32.mrb[35].mxu0  ;;  %6802 = vmatprep.mubr.msk.bf16.mxu1 %vm120_vm0, %v1141_v27 }
 0x475   : > { %v1076_v46 = vpop.f32.mrb[36].mxu1  ;;  %v1122_v63 = vpop.f32.mrb[36].mxu0 }
 0x476   : > { %v1142_v59 = vpack.c.bf16 %v1122_v63, %v1076_v46  ;;  %v6782_v57 = vpop.f32.mrb[37].mxu1  ;;  %v6788_v56 = vpop.f32.mrb[37].mxu0 }
 0x477   : > { %v1079_v52 = vpop.f32.mrb[38].mxu1  ;;  %v1125_v61 = vpop.f32.mrb[38].mxu0 }
 0x478   : > { %v6783_v11 = vpop.f32.mrb[39].mxu1  ;;  %v6789_v39 = vpop.f32.mrb[39].mxu0  ;;  %6803 = vmatmul.mubr.msk.bf16.gmra.mrb[44].mxu1 %vm120_vm0, %v1142_v59 }
 0x53b   : > { %v6800_v41 = vpop.f32.mrb[40].mxu1 }
 0x53c   : > { %v1226_v18 = vadd.f32 %v6800_v41, %v8002_v31  ;;  %v1217_v58 = vpop.f32.mrb[41].mxu1 }
 0x53d   : > { %v1218_v43 = vadd.f32 %v1217_v58, %v8002_v31  ;;  %v6801_v45 = vpop.f32.mrb[42].mxu1 }
 0x53e   : > { %v1229_v49 = vadd.f32 %v6801_v45, %v8002_v31  ;;  %v1220_v9 = vpop.f32.mrb[43].mxu1  ;;  %v1250_v23 = vadd.f32 %v7791_v2, %v1226_v18 }
 0x53f   : > { %v1221_v14 = vadd.f32 %v1220_v9, %v8002_v31  ;;  %v1248_v55 = vadd.f32 %v7799_v0, %v1218_v43 }
 0x540   : > { %v1251_v44 = vadd.f32 %v7787_v3, %v1229_v49  ;;  %v1262_v40 = vsel %vm120_vm0, %v1250_v23, 0.0 }
 0x541   : > { %v1256_v8 = vsel %vm120_vm0, %v1248_v55, 0.0  ;;  %v1249_v12 = vadd.f32 %v7795_v1, %v1221_v14 }
 0x542   : > { %1257 = vadd.xlane.f32.xlu0 %v1256_v8  ;;  %v1265_v42 = vsel %vm120_vm0, %v1251_v44, 0.0 }
 0x543   : > { %v1259_v22 = vsel %vm120_vm0, %v1249_v12, 0.0 }
 0x544   : > { %1260 = vadd.xlane.f32.xlu1 %v1259_v22 }
 0x546   : > { %1263 = vadd.xlane.f32.xlu0 %v1262_v40 }
 0x548   : > { %1266 = vadd.xlane.f32.xlu1 %v1265_v42 }
 0x54b   : > { %v6804_v17 = vpop.f32.mrb[44].mxu1 }
 0x54c   : > { %v1242_v0 = vadd.f32 %v6804_v17, %v8002_v31  ;;  %v1233_v62 = vpop.f32.mrb[45].mxu1 }
 0x54d   : > { %v1234_v1 = vadd.f32 %v1233_v62, %v8002_v31  ;;  %v6805_v38 = vpop.f32.mrb[46].mxu1 }
 0x54e   : > { %v1245_v2 = vadd.f32 %v6805_v38, %v8002_v31  ;;  %v1236_v60 = vpop.f32.mrb[47].mxu1  ;;  %v1254_v27 = vadd.f32 %v7775_v6, %v1242_v0 }
 0x54f   : > { %v1237_v15 = vadd.f32 %v1236_v60, %v8002_v31  ;;  %v1252_v3 = vadd.f32 %v7783_v4, %v1234_v1 }
 0x550   : > { %v1255_v35 = vadd.f32 %v7771_v7, %v1245_v2  ;;  %v1274_v48 = vsel %vm120_vm0, %v1254_v27, 0.0 }
 0x551   : > { %v1268_v19 = vsel %vm120_vm0, %v1252_v3, 0.0  ;;  %v1253_v50 = vadd.f32 %v7779_v5, %v1237_v15 }
 0x552   : > { %1269 = vadd.xlane.f32.xlu0 %v1268_v19  ;;  %v1277_v54 = vsel %vm120_vm0, %v1255_v35, 0.0  ;;  %v7267_v19 = vld [vmem:[%s7969_s25 + $0x28] sm:$0xff]  }
 0x553   : > { %v1271_v47 = vsel %vm120_vm0, %v1253_v50, 0.0 }
 0x554   : > { %1272 = vadd.xlane.f32.xlu1 %v1271_v47  ;;  %v7270_v47 = vld [vmem:[%s7969_s25 + $0x40] sm:$0xff]  }
 0x555   : > { %6822 = vmatprep.subr.bf16.mxu1 %v7270_v47 }
 0x556   : > { %1275 = vadd.xlane.f32.xlu0 %v1274_v48  ;;  %6823 = vmatpush3.bf16.msra.mxu1 %v7270_v47 }
 0x558   : > { %1278 = vadd.xlane.f32.xlu1 %v1277_v54 }
 0x5cf   : > { %v1258_v31 = vpop.xlane.xlu0 %1257 }
 0x5d0   : > { %v1281_v4 = vmul.f32 0.015625, %v1258_v31 }
 0x5d1   : > { %v1261_v51 = vpop.xlane.xlu1 %1260 }
 0x5d2   : > { %v8242_v53 = vsub.f32 %v1248_v55, %v1281_v4  ;;  %v1282_v5 = vmul.f32 0.015625, %v1261_v51 }
 0x5d3   : > { %v1264_v46 = vpop.xlane.xlu0 %1263 }
 0x5d4   : > { %v8244_v6 = vsub.f32 %v1249_v12, %v1282_v5  ;;  %v1283_v63 = vmul.f32 0.015625, %v1264_v46  ;;  %v1297_v7 = vmul.f32 %v8242_v53, %v8242_v53 }
 0x5d5   : > { %v1267_v59 = vpop.xlane.xlu1 %1266 }
 0x5d6   : > { %v8248_v57 = vsub.f32 %v1250_v23, %v1283_v63  ;;  %v1284_v56 = vmul.f32 0.015625, %v1267_v59  ;;  %v1305_v52 = vsel %vm120_vm0, %v1297_v7, 0.0  ;;  %v1298_v61 = vmul.f32 %v8244_v6, %v8244_v6 }
 0x5d7   : > { %1306 = vadd.xlane.f32.xlu0 %v1305_v52 }
 0x5d8   : > { %v8253_v11 = vsub.f32 %v1251_v44, %v1284_v56  ;;  %v1308_v39 = vsel %vm120_vm0, %v1298_v61, 0.0  ;;  %v1299_v41 = vmul.f32 %v8248_v57, %v8248_v57 }
 0x5d9   : > { %1309 = vadd.xlane.f32.xlu1 %v1308_v39 }
 0x5da   : > { %v1311_v18 = vsel %vm120_vm0, %v1299_v41, 0.0  ;;  %v1300_v58 = vmul.f32 %v8253_v11, %v8253_v11 }
 0x5db   : > { %1312 = vadd.xlane.f32.xlu0 %v1311_v18 }
 0x5dc   : > { %v1314_v43 = vsel %vm120_vm0, %v1300_v58, 0.0 }
 0x5dd   : > { %1315 = vadd.xlane.f32.xlu1 %v1314_v43 }
 0x5df   : > { %v1270_v45 = vpop.xlane.xlu0 %1269 }
 0x5e0   : > { %v1285_v49 = vmul.f32 0.015625, %v1270_v45 }
 0x5e1   : > { %v1273_v9 = vpop.xlane.xlu1 %1272 }
 0x5e2   : > { %v8262_v14 = vsub.f32 %v1252_v3, %v1285_v49  ;;  %v1286_v55 = vmul.f32 0.015625, %v1273_v9  ;;  %v7266_v3 = vld [vmem:[%s7969_s25 + $0x20] sm:$0xff]  }
 0x5e3   : > { %v1276_v8 = vpop.xlane.xlu0 %1275  ;;  %6806 = vmatprep.subr.bf16.mxu0 %v7266_v3 }
 0x5e4   : > { %v8264_v12 = vsub.f32 %v1253_v50, %v1286_v55  ;;  %v1287_v23 = vmul.f32 0.015625, %v1276_v8  ;;  %v1301_v22 = vmul.f32 %v8262_v14, %v8262_v14  ;;  %6807 = vmatpush3.bf16.msra.mxu0 %v7266_v3  ;;  %v7268_v50 = vld [vmem:[%s7969_s25 + $0x30] sm:$0xff]  }
 0x5e5   : > { %v1279_v44 = vpop.xlane.xlu1 %1278  ;;  %6808 = vmatprep.subr.bf16.mxu0 %v7267_v19 }
 0x5e6   : > { %v8268_v40 = vsub.f32 %v1254_v27, %v1287_v23  ;;  %v1288_v42 = vmul.f32 0.015625, %v1279_v44  ;;  %v1317_v17 = vsel %vm120_vm0, %v1301_v22, 0.0  ;;  %v1302_v0 = vmul.f32 %v8264_v12, %v8264_v12  ;;  %v7269_v27 = vld [vmem:[%s7969_s25 + $0x38] sm:$0xff]  }
 0x5e7   : > { %1318 = vadd.xlane.f32.xlu0 %v1317_v17 }
 0x5e8   : > { %v8273_v62 = vsub.f32 %v1255_v35, %v1288_v42  ;;  %v1320_v1 = vsel %vm120_vm0, %v1302_v0, 0.0  ;;  %v1303_v38 = vmul.f32 %v8268_v40, %v8268_v40  ;;  %6809 = vmatpush3.bf16.msra.mxu0 %v7267_v19  ;;  %v7271_v35 = vld [vmem:[%s7969_s25 + $0x48] sm:$0xff]  }
 0x5e9   : > { %1321 = vadd.xlane.f32.xlu1 %v1320_v1  ;;  %6810 = vmatprep.subr.bf16.mxu0 %v7268_v50 }
 0x5ea   : > { %v1323_v2 = vsel %vm120_vm0, %v1303_v38, 0.0  ;;  %v1304_v60 = vmul.f32 %v8273_v62, %v8273_v62  ;;  %6824 = vmatprep.subr.bf16.mxu1 %v7271_v35 }
 0x5eb   : > { %1324 = vadd.xlane.f32.xlu0 %v1323_v2  ;;  %6825 = vmatpush3.bf16.msra.mxu1 %v7271_v35 }
 0x5ec   : > { %v1326_v15 = vsel %vm120_vm0, %v1304_v60, 0.0  ;;  %6811 = vmatpush3.bf16.msra.mxu0 %v7268_v50 }
 0x5ed   : > { %1327 = vadd.xlane.f32.xlu1 %v1326_v15  ;;  %6812 = vmatprep.subr.bf16.mxu0 %v7269_v27 }
 0x5f0   : > { %6813 = vmatpush3.bf16.msra.mxu0 %v7269_v27 }
 0x664   : > { %v1307_v48 = vpop.xlane.xlu0 %1306 }
 0x665   : > { %v1329_v54 = vmul.f32 0.015625, %v1307_v48 }
 0x666   : > { %v1310_v31 = vpop.xlane.xlu1 %1309 }
 0x667   : > { %v1337_v4 = vadd.f32 1e-05, %v1329_v54  ;;  %v1330_v51 = vmul.f32 0.015625, %v1310_v31 }
 0x668   : > { %v1313_v5 = vpop.xlane.xlu0 %1312 }
 0x669   : > { %7306 = vrsqrt.f32 %v1337_v4  ;;  %v1338_v46 = vadd.f32 1e-05, %v1330_v51  ;;  %v1331_v63 = vmul.f32 0.015625, %v1313_v5 }
 0x66a   : > { %v1316_v7 = vpop.xlane.xlu1 %1315 }
 0x66b   : > { %7308 = vrsqrt.f32 %v1338_v46  ;;  %v1339_v59 = vadd.f32 1e-05, %v1331_v63  ;;  %v1332_v56 = vmul.f32 0.015625, %v1316_v7 }
 0x66d   : > { %7310 = vrsqrt.f32 %v1339_v59  ;;  %v1340_v52 = vadd.f32 1e-05, %v1332_v56 }
 0x66f   : > { %7312 = vrsqrt.f32 %v1340_v52 }
 0x673   : > { %v7307_v61 = vpop.eup %7306 }
 0x674   : > { %v1353_v39 = vmul.f32 %v7307_v61, %v8242_v53  ;;  %v1319_v41 = vpop.xlane.xlu0 %1318  ;;  %v7272_v61 = vld [vmem:[%s7969_s25 + $0x50] sm:$0xff]  }
 0x675   : > { %v7309_v18 = vpop.eup %7308  ;;  %v1333_v58 = vmul.f32 0.015625, %v1319_v41  ;;  %6826 = vmatprep.subr.bf16.mxu1 %v7272_v61 }
 0x676   : > { %v1354_v43 = vmul.f32 %v7309_v18, %v8244_v6  ;;  %v1322_v45 = vpop.xlane.xlu1 %1321  ;;  %v1365_v49 = vmul.f32 %v8005_v32, %v1353_v39  ;;  %6827 = vmatpush3.bf16.msra.mxu1 %v7272_v61  ;;  %v7273_v39 = vld [vmem:[%s7969_s25 + $0x58] sm:$0xff]  }
 0x677   : > { %v7311_v9 = vpop.eup %7310  ;;  %v1341_v55 = vadd.f32 1e-05, %v1333_v58  ;;  %v1334_v8 = vmul.f32 0.015625, %v1322_v45  ;;  %6828 = vmatprep.subr.bf16.mxu1 %v7273_v39 }
 0x678   : > { %v1355_v23 = vmul.f32 %v7311_v9, %v8248_v57  ;;  %v1325_v22 = vpop.xlane.xlu0 %1324  ;;  %v1366_v44 = vmul.f32 %v8005_v32, %v1354_v43  ;;  %v8294_v42 = vadd.f32 %v8008_v33, %v1365_v49 }
 0x679   : > { %v7313_v53 = vpop.eup %7312  ;;  %7314 = vrsqrt.f32 %v1341_v55  ;;  %v1342_v17 = vadd.f32 1e-05, %v1334_v8  ;;  %v1335_v0 = vmul.f32 0.015625, %v1325_v22 }
 0x67a   : > { %v1367_v6 = vmul.f32 %v8005_v32, %v1355_v23  ;;  %v1356_v1 = vmul.f32 %v7313_v53, %v8253_v11  ;;  %v1328_v38 = vpop.xlane.xlu1 %1327  ;;  %v8299_v2 = vadd.f32 %v8008_v33, %v1366_v44  ;;  %6829 = vmatpush3.bf16.msra.mxu1 %v7273_v39 }
 0x67b   : > { %7316 = vrsqrt.f32 %v1342_v17  ;;  %v1343_v57 = vadd.f32 1e-05, %v1335_v0  ;;  %v1336_v60 = vmul.f32 0.015625, %v1328_v38 }
 0x67c   : > { %v1368_v15 = vmul.f32 %v8005_v32, %v1356_v1  ;;  %v1393_v3 = vpack.c.bf16 %v8299_v2, %v8294_v42  ;;  %v8305_v19 = vadd.f32 %v8008_v33, %v1367_v6 }
 0x67d   : > { %7318 = vrsqrt.f32 %v1343_v57  ;;  %v1344_v50 = vadd.f32 1e-05, %v1336_v60 }
 0x67e   : > { %6814 = vmatprep.mubr.msk.bf16.mxu0 %vm120_vm0, %v1393_v3  ;;  %v8309_v11 = vadd.f32 %v8008_v33, %v1368_v15 }
 0x67f   : > { %7320 = vrsqrt.f32 %v1344_v50 }
 0x680   : > { %v1394_v27 = vpack.c.bf16 %v8309_v11, %v8305_v19 }
 0x682   : > { %6815 = vmatmul.mubr.msk.bf16.vlgmr.msra.gmra.mrb[40].mxu0 %vm120_vm0, %v1394_v27 }
 0x683   : > { %v7315_v47 = vpop.eup %7314 }
 0x684   : > { %v1357_v35 = vmul.f32 %v7315_v47, %v8262_v14 }
 0x685   : > { %v7317_v48 = vpop.eup %7316 }
 0x686   : > { %v1358_v54 = vmul.f32 %v7317_v48, %v8264_v12  ;;  %v1369_v31 = vmul.f32 %v8005_v32, %v1357_v35 }
 0x687   : > { %v7319_v4 = vpop.eup %7318 }
 0x688   : > { %v1359_v51 = vmul.f32 %v7319_v4, %v8268_v40  ;;  %v1370_v5 = vmul.f32 %v8005_v32, %v1358_v54  ;;  %v8320_v46 = vadd.f32 %v8008_v33, %v1369_v31 }
 0x689   : > { %v7321_v63 = vpop.eup %7320 }
 0x68a   : > { %v1360_v7 = vmul.f32 %v7321_v63, %v8273_v62  ;;  %v8324_v14 = vadd.f32 %v8008_v33, %v1370_v5  ;;  %v1371_v12 = vmul.f32 %v8005_v32, %v1359_v51 }
 0x68c   : > { %v1395_v59 = vpack.c.bf16 %v8324_v14, %v8320_v46  ;;  %v1372_v56 = vmul.f32 %v8005_v32, %v1360_v7  ;;  %v8331_v40 = vadd.f32 %v8008_v33, %v1371_v12 }
 0x68e   : > { %6818 = vmatprep.mubr.msk.bf16.mxu0 %vm120_vm0, %v1395_v59  ;;  %v8335_v52 = vadd.f32 %v8008_v33, %v1372_v56 }
 0x690   : > { %v1396_v62 = vpack.c.bf16 %v8335_v52, %v8331_v40 }
 0x692   : > { %6819 = vmatmul.mubr.msk.bf16.gmra.mrb[44].mxu0 %vm120_vm0, %v1396_v62 }
 0x755   : > { %v6816_v32 = vpop.f32.mrb[40].mxu0 }
 0x756   : > { %v1480_v41 = vadd.f32 %v6816_v32, %v8015_v36  ;;  %v1471_v18 = vpop.f32.mrb[41].mxu0 }
 0x757   : > { %v1472_v58 = vadd.f32 %v1471_v18, %v8015_v36  ;;  %v6817_v43 = vpop.f32.mrb[42].mxu0 }
 0x758   : > { %v1483_v33 = vadd.f32 %v6817_v43, %v8015_v36  ;;  %v1474_v45 = vpop.f32.mrb[43].mxu0  ;;  %v1504_v9 = vmax.f32 %v1480_v41, 0.0 }
 0x759   : > { %v1475_v49 = vadd.f32 %v1474_v45, %v8015_v36  ;;  %v1502_v8 = vmax.f32 %v1472_v58, 0.0 }
 0x75a   : > { %v1505_v55 = vmax.f32 %v1483_v33, 0.0 }
 0x75b   : > { %v1503_v23 = vmax.f32 %v1475_v49, 0.0 }
 0x75c   : > { %v1519_v22 = vpack.c.bf16 %v1505_v55, %v1504_v9 }
 0x75d   : > { %v1518_v44 = vpack.c.bf16 %v1503_v23, %v1502_v8 }
 0x75f   : > { %6830 = vmatprep.mubr.msk.bf16.mxu1 %vm120_vm0, %v1518_v44 }
 0x760   : > { %6831 = vmatmul.mubr.msk.bf16.vlgmr.msra.gmra.mrb[48].mxu1 %vm120_vm0, %v1519_v22 }
 0x765   : > { %v6820_v53 = vpop.f32.mrb[44].mxu0 }
 0x766   : > { %v1496_v17 = vadd.f32 %v6820_v53, %v8015_v36  ;;  %v1487_v0 = vpop.f32.mrb[45].mxu0 }
 0x767   : > { %v1488_v6 = vadd.f32 %v1487_v0, %v8015_v36  ;;  %v6821_v1 = vpop.f32.mrb[46].mxu0 }
 0x768   : > { %v1499_v38 = vadd.f32 %v6821_v1, %v8015_v36  ;;  %v1490_v57 = vpop.f32.mrb[47].mxu0  ;;  %v1508_v15 = vmax.f32 %v1496_v17, 0.0 }
 0x769   : > { %v1491_v60 = vadd.f32 %v1490_v57, %v8015_v36  ;;  %v1506_v50 = vmax.f32 %v1488_v6, 0.0 }
 0x76a   : > { %v1509_v3 = vmax.f32 %v1499_v38, 0.0 }
 0x76b   : > { %v1507_v27 = vmax.f32 %v1491_v60, 0.0 }
 0x76c   : > { %v1521_v47 = vpack.c.bf16 %v1509_v3, %v1508_v15 }
 0x76d   : > { %v1520_v35 = vpack.c.bf16 %v1507_v27, %v1506_v50 }
 0x76f   : > { %6834 = vmatprep.mubr.msk.bf16.mxu1 %vm120_vm0, %v1520_v35 }
 0x770   : > { %6835 = vmatmul.mubr.msk.bf16.gmra.mrb[52].mxu1 %vm120_vm0, %v1521_v47 }
 0x833   : > { %v6832_v48 = vpop.f32.mrb[48].mxu1 }
 0x834   : > { %v1605_v54 = vadd.f32 %v6832_v48, %v8018_v37  ;;  %v1596_v31 = vpop.f32.mrb[49].mxu1 }
 0x835   : > { %v1597_v4 = vadd.f32 %v1596_v31, %v8018_v37  ;;  %v6833_v51 = vpop.f32.mrb[50].mxu1 }
 0x836   : > { %v1608_v5 = vadd.f32 %v6833_v51, %v8018_v37  ;;  %v1599_v36 = vpop.f32.mrb[51].mxu1  ;;  %v1629_v63 = vadd.f32 %v1605_v54, %v8305_v19 }
 0x837   : > { %v1600_v7 = vadd.f32 %v1599_v36, %v8018_v37  ;;  %v1627_v56 = vadd.f32 %v1597_v4, %v8294_v42 }
 0x838   : > { %v1641_v12 = vsel %vm120_vm0, %v1629_v63, 0.0  ;;  %v1630_v59 = vadd.f32 %v1608_v5, %v8309_v11 }
 0x839   : > { %1642 = vadd.xlane.f32.xlu0 %v1641_v12  ;;  %v1628_v61 = vadd.f32 %v1600_v7, %v8299_v2  ;;  %v1635_v39 = vsel %vm120_vm0, %v1627_v56, 0.0 }
 0x83a   : > { %v1644_v62 = vsel %vm120_vm0, %v1630_v59, 0.0 }
 0x83b   : > { %1645 = vadd.xlane.f32.xlu1 %v1644_v62  ;;  %v1638_v32 = vsel %vm120_vm0, %v1628_v61, 0.0 }
 0x83d   : > { %1636 = vadd.xlane.f32.xlu0 %v1635_v39 }
 0x83f   : > { %1639 = vadd.xlane.f32.xlu1 %v1638_v32 }
 0x843   : > { %v6836_v19 = vpop.f32.mrb[52].mxu1 }
 0x844   : > { %v1621_v41 = vadd.f32 %v6836_v19, %v8018_v37  ;;  %v1612_v18 = vpop.f32.mrb[53].mxu1 }
 0x845   : > { %v1613_v11 = vadd.f32 %v1612_v18, %v8018_v37  ;;  %v6837_v58 = vpop.f32.mrb[54].mxu1 }
 0x846   : > { %v1624_v42 = vadd.f32 %v6837_v58, %v8018_v37  ;;  %v1615_v43 = vpop.f32.mrb[55].mxu1  ;;  %v1633_v9 = vadd.f32 %v1621_v41, %v8331_v40 }
 0x847   : > { %v1616_v33 = vadd.f32 %v1615_v43, %v8018_v37  ;;  %v1631_v2 = vadd.f32 %v1613_v11, %v8320_v46 }
 0x848   : > { %v1634_v8 = vadd.f32 %v1624_v42, %v8335_v52  ;;  %v1653_v23 = vsel %vm120_vm0, %v1633_v9, 0.0 }
 0x849   : > { %v1647_v45 = vsel %vm120_vm0, %v1631_v2, 0.0  ;;  %v1632_v49 = vadd.f32 %v1616_v33, %v8324_v14 }
 0x84a   : > { %1648 = vadd.xlane.f32.xlu0 %v1647_v45  ;;  %v1656_v22 = vsel %vm120_vm0, %v1634_v8, 0.0 }
 0x84b   : > { %v1650_v55 = vsel %vm120_vm0, %v1632_v49, 0.0 }
 0x84c   : > { %1651 = vadd.xlane.f32.xlu1 %v1650_v55 }
 0x84e   : > { %1654 = vadd.xlane.f32.xlu0 %v1653_v23 }
 0x850   : > { %1657 = vadd.xlane.f32.xlu1 %v1656_v22 }
 0x8c6   : > { %v1643_v37 = vpop.xlane.xlu0 %1642 }
 0x8c7   : > { %v1661_v46 = vmul.f32 0.015625, %v1643_v37 }
 0x8c8   : > { %v1646_v44 = vpop.xlane.xlu1 %1645 }
 0x8c9   : > { %v1669_v53 = vsub.f32 %v1629_v63, %v1661_v46  ;;  %v1662_v17 = vmul.f32 0.015625, %v1646_v44 }
 0x8ca   : > { %v1637_v14 = vpop.xlane.xlu0 %1636 }
 0x8cb   : > { %v8378_v0 = vsub.f32 %v1630_v59, %v1662_v17  ;;  %v1659_v40 = vmul.f32 0.015625, %v1637_v14  ;;  %v1677_v6 = vmul.f32 %v1669_v53, %v1669_v53 }
 0x8cc   : > { %v1640_v1 = vpop.xlane.xlu1 %1639 }
 0x8cd   : > { %v8380_v38 = vsub.f32 %v1627_v56, %v1659_v40  ;;  %v1660_v52 = vmul.f32 0.015625, %v1640_v1  ;;  %v1689_v57 = vsel %vm120_vm0, %v1677_v6, 0.0  ;;  %v1678_v60 = vmul.f32 %v8378_v0, %v8378_v0 }
 0x8ce   : > { %1690 = vadd.xlane.f32.xlu0 %v1689_v57 }
 0x8cf   : > { %v8385_v15 = vsub.f32 %v1628_v61, %v1660_v52  ;;  %v1692_v3 = vsel %vm120_vm0, %v1678_v60, 0.0  ;;  %v1675_v50 = vmul.f32 %v8380_v38, %v8380_v38 }
 0x8d0   : > { %1693 = vadd.xlane.f32.xlu1 %v1692_v3 }
 0x8d1   : > { %v1683_v27 = vsel %vm120_vm0, %v1675_v50, 0.0  ;;  %v1676_v47 = vmul.f32 %v8385_v15, %v8385_v15 }
 0x8d2   : > { %1684 = vadd.xlane.f32.xlu0 %v1683_v27 }
 0x8d3   : > { %v1686_v35 = vsel %vm120_vm0, %v1676_v47, 0.0 }
 0x8d4   : > { %1687 = vadd.xlane.f32.xlu1 %v1686_v35 }
 0x8d7   : > { %v1649_v48 = vpop.xlane.xlu0 %1648 }
 0x8d8   : > { %v1663_v54 = vmul.f32 0.015625, %v1649_v48 }
 0x8d9   : > { %v1652_v31 = vpop.xlane.xlu1 %1651 }
 0x8da   : > { %v8394_v4 = vsub.f32 %v1631_v2, %v1663_v54  ;;  %v1664_v51 = vmul.f32 0.015625, %v1652_v31 }
 0x8db   : > { %v1655_v5 = vpop.xlane.xlu0 %1654 }
 0x8dc   : > { %v8396_v36 = vsub.f32 %v1632_v49, %v1664_v51  ;;  %v1665_v63 = vmul.f32 0.015625, %v1655_v5  ;;  %v1679_v7 = vmul.f32 %v8394_v4, %v8394_v4 }
 0x8dd   : > { %v1658_v12 = vpop.xlane.xlu1 %1657 }
 0x8de   : > { %v8400_v59 = vsub.f32 %v1633_v9, %v1665_v63  ;;  %v1666_v56 = vmul.f32 0.015625, %v1658_v12  ;;  %v1695_v62 = vsel %vm120_vm0, %v1679_v7, 0.0  ;;  %v1680_v61 = vmul.f32 %v8396_v36, %v8396_v36 }
 0x8df   : > { %1696 = vadd.xlane.f32.xlu0 %v1695_v62 }
 0x8e0   : > { %v8405_v39 = vsub.f32 %v1634_v8, %v1666_v56  ;;  %v1698_v32 = vsel %vm120_vm0, %v1680_v61, 0.0  ;;  %v1681_v19 = vmul.f32 %v8400_v59, %v8400_v59 }
 0x8e1   : > { %1699 = vadd.xlane.f32.xlu1 %v1698_v32 }
 0x8e2   : > { %v1701_v41 = vsel %vm120_vm0, %v1681_v19, 0.0  ;;  %v1682_v18 = vmul.f32 %v8405_v39, %v8405_v39 }
 0x8e3   : > { %1702 = vadd.xlane.f32.xlu0 %v1701_v41 }
 0x8e4   : > { %v1704_v11 = vsel %vm120_vm0, %v1682_v18, 0.0 }
 0x8e5   : > { %1705 = vadd.xlane.f32.xlu1 %v1704_v11 }
 0x95b   : > { %v1691_v58 = vpop.xlane.xlu0 %1690 }
 0x95c   : > { %v1709_v42 = vmul.f32 0.015625, %v1691_v58 }
 0x95d   : > { %v1694_v43 = vpop.xlane.xlu1 %1693 }
 0x95e   : > { %v1717_v33 = vadd.f32 1e-05, %v1709_v42  ;;  %v1710_v2 = vmul.f32 0.015625, %v1694_v43 }
 0x95f   : > { %v1685_v45 = vpop.xlane.xlu0 %1684 }
 0x960   : > { %7322 = vrsqrt.f32 %v1717_v33  ;;  %v1718_v49 = vadd.f32 1e-05, %v1710_v2  ;;  %v1707_v9 = vmul.f32 0.015625, %v1685_v45 }
 0x961   : > { %v1688_v55 = vpop.xlane.xlu1 %1687 }
 0x962   : > { %7324 = vrsqrt.f32 %v1718_v49  ;;  %v1715_v8 = vadd.f32 1e-05, %v1707_v9  ;;  %v1708_v23 = vmul.f32 0.015625, %v1688_v55  ;;  %v7344_v55 = vld [vmem:[%s10515_s5 + $0x24] ss:$8 sps:$4 sm:$0xff] (%p50_p0)  }
 0x964   : > { %7326 = vrsqrt.f32 %v1715_v8  ;;  %v1716_v22 = vadd.f32 1e-05, %v1708_v23  ;;  %v1955_v8 = vld [vmem:[%s10511_s1] sm:$0xff] (%p50_p0)  ;;  %v1956_v23 = vld [vmem:[%s10511_s1 + $0x8] sm:$0xff] (%p50_p0) }
 0x965   :  { %1963 = vst.msk [vmem:[#allocation2 + $0x8] sm:$0xff] (%p50_p0), %vm120_vm0, %v1955_v8  ;;  %1964 = vst.msk [vmem:[#allocation2 + $0x18] sm:$0xff] (%p50_p0), %vm120_vm0, %v1956_v23 }
 0x966   : > { %7328 = vrsqrt.f32 %v1716_v22  ;;  %v1957_v22 = vld [vmem:[%s10511_s1 + $0x10] sm:$0xff] (%p50_p0) }
 0x967   :  { %1965 = vst.msk [vmem:[#allocation2 + $0x28] sm:$0xff] (%p50_p0), %vm120_vm0, %v1957_v22 }
 0x96a   : > { %v7323_v37 = vpop.eup %7322 }
 0x96b   : > { %v1733_v46 = vmul.f32 %v7323_v37, %v1669_v53  ;;  %v1958_v37 = vld [vmem:[%s10511_s1 + $0x18] sm:$0xff] (%p50_p0) }
 0x96c   : > { %v7325_v44 = vpop.eup %7324  ;;  %v1697_v17 = vpop.xlane.xlu0 %1696  ;;  %1966 = vst.msk [vmem:[#allocation2 + $0x38] sm:$0xff] (%p50_p0), %vm120_vm0, %v1958_v37 }
 0x96d   : > { %v1745_v14 = vmul.f32 %v7999_v30, %v1733_v46  ;;  %v1734_v40 = vmul.f32 %v7325_v44, %v8378_v0  ;;  %v1711_v6 = vmul.f32 0.015625, %v1697_v17  ;;  %v1959_v46 = vld [vmem:[%s10511_s1 + $0x20] sm:$0xff] (%p50_p0)  ;;  %v7347_v17 = vld [vmem:[%s10515_s5 + $0x34] ss:$8 sps:$4 sm:$0xff] (%p50_p0)  }
 0x96e   : > { %v7327_v1 = vpop.eup %7326  ;;  %v1700_v52 = vpop.xlane.xlu1 %1699  ;;  %v7346_v44 = vld [vmem:[%s10515_s5 + $0x20] ss:$8 sps:$4 sm:$0xff] (%p50_p0)   ;;  %1967 = vst.msk [vmem:[#allocation2 + $0x48] sm:$0xff] (%p50_p0), %vm120_vm0, %v1959_v46 }
 0x96f   : > { %v8417_v2 = vadd.f32 %v8011_v34, %v1745_v14   ;;  %v1746_v60 = vmul.f32 %v7999_v30, %v1734_v40  ;;  %v1731_v3 = vmul.f32 %v7327_v1, %v8380_v38  ;;  %v1719_v50 = vadd.f32 1e-05, %v1711_v6  ;;  %v1960_v14 = vld [vmem:[%s10511_s1 + $0x28] sm:$0xff] (%p50_p0)  ;;  %v7349_v40 = vld [vmem:[%s10515_s5 + $0x30] ss:$8 sps:$4 sm:$0xff] (%p50_p0)  }
 0x970   : > { %v7329_v27 = vpop.eup %7328  ;;  %v1712_v47 = vmul.f32 0.015625, %v1700_v52  ;;  %v1703_v53 = vpop.xlane.xlu0 %1702  ;;  %1968 = vst.msk [vmem:[#allocation2 + $0x58] sm:$0xff] (%p50_p0), %vm120_vm0, %v1960_v14  ;;  %v1962_v52 = vld [vmem:[%s10511_s1 + $0x38] sm:$0xff] (%p50_p0) }
 0x971   : > { %v10542_v57 = vmov %v8417_v2  ;;  %v8422_v35 = vadd.f32 %v8011_v34, %v1746_v60   ;;  %v1743_v48 = vmul.f32 %v7999_v30, %v1731_v3  ;;  %v1732_v0 = vmul.f32 %v7329_v27, %v8385_v15  ;;  %v1987_v60 = vld [vmem:[%s10518_s8] sm:$0xff] (%p50_p0)  ;;  %1970 = vst.msk [vmem:[#allocation2 + $0x78] sm:$0xff] (%p50_p0), %vm120_vm0, %v1962_v52 }
 0x972   : > { %7330 = vrsqrt.f32 %v1719_v50  ;;  %v1720_v54 = vadd.f32 1e-05, %v1712_v47  ;;  %v1713_v31 = vmul.f32 0.015625, %v1703_v53  ;;  %v1706_v51 = vpop.xlane.xlu1 %1705  ;;  %1949 = vst.msk [vmem:[#allocation2 + $0x20] sm:$0xff] (%p50_p0), %vm120_vm0, %v10542_v57  ;;  %v1972_v50 = vld [vmem:[#allocation2 + $0x8] sm:$0xff] (%p50_p0)  ;;  %v1974_v53 = vld [vmem:[#allocation2 + $0x18] sm:$0xff] (%p50_p0) }
 0x973   : > { %v8427_v5 = vadd.f32 %v8011_v34, %v1743_v48   ;;  %v1744_v38 = vmul.f32 %v7999_v30, %v1732_v0  ;;  %v1714_v7 = vmul.f32 0.015625, %v1706_v51  ;;  %v10558_v3 = vmov %v8422_v35  ;;  %1950 = vst.msk [vmem:[#allocation2 + $0x30] sm:$0xff] (%p50_p0), %vm120_vm0, %v8422_v35 }
 0x974   : > { %7332 = vrsqrt.f32 %v1720_v54  ;;  %v1721_v12 = vadd.f32 1e-05, %v1713_v31  ;;  %v2205_v3 = vrot.slane (%p50_p0), %v1987_v60, %v7964_v16  ;;  %v1976_v54 = vld [vmem:[#allocation2 + $0x28] sm:$0xff] (%p50_p0) }
 0x975   : > { %10543 = vst [vmem:[#allocation12_spill] sm:$0xff] %v8427_v5  ;;  %v10544_v63 = vmov %v8427_v5  ;;  %v8431_v1 = vadd.f32 %v8011_v34, %v1744_v38   ;;  %v1722_v62 = vadd.f32 1e-05, %v1714_v7 }
 0x976   : > { %7334 = vrsqrt.f32 %v1721_v12  ;;  %v10561_v0 = vmov %v10544_v63  ;;  %1947 = vst.msk [vmem:[#allocation2] sm:$0xff] (%p50_p0), %vm120_vm0, %v10544_v63  ;;  %v1980_v12 = vld [vmem:[#allocation2 + $0x48] sm:$0xff] (%p50_p0) }
 0x977   : > { %v10545_v56 = vmov %v8431_v1  ;;  %7336 = vrsqrt.f32 %v1722_v62 }
 0x978   : > { %v10560_v1 = vmov %v10545_v56  ;;  %1948 = vst.msk [vmem:[#allocation2 + $0x10] sm:$0xff] (%p50_p0), %vm120_vm0, %v10545_v56 }
 0x979   :  { %v1975_v0 = vld [vmem:[#allocation2 + $0x20] sm:$0xff] (%p50_p0) }
 0x97a   :  { %v1991_v31 = vpack.c.bf16 (%p50_p0), %v1976_v54, %v1975_v0  ;;  %v1977_v51 = vld [vmem:[#allocation2 + $0x30] sm:$0xff] (%p50_p0) }
 0x97c   : > { %v7331_v61 = vpop.eup %7330 }
 0x97d   : > { %v1735_v15 = vmul.f32 %v7331_v61, %v8394_v4  ;;  %v1971_v1 = vld [vmem:[#allocation2] sm:$0xff] (%p50_p0) }
 0x97e   : > { %v7333_v32 = vpop.eup %7332  ;;  %v1989_v27 = vpack.c.bf16 (%p50_p0), %v1972_v50, %v1971_v1 }
 0x97f   : > { %v1747_v19 = vmul.f32 %v7999_v30, %v1735_v15  ;;  %v1736_v41 = vmul.f32 %v7333_v32, %v8396_v36  ;;  %v1973_v47 = vld [vmem:[#allocation2 + $0x10] sm:$0xff] (%p50_p0)  ;;  %v1982_v15 = vld [vmem:[#allocation2 + $0x58] sm:$0xff] (%p50_p0) }
 0x980   : > { %v7335_v18 = vpop.eup %7334  ;;  %v1990_v48 = vpack.c.bf16 (%p50_p0), %v1974_v53, %v1973_v47 }
 0x981   : > { %v8437_v4 = vadd.f32 %v8011_v34, %v1747_v19   ;;  %v7337_v58 = vpop.eup %7336  ;;  %v1748_v42 = vmul.f32 %v7999_v30, %v1736_v41  ;;  %v1737_v43 = vmul.f32 %v7335_v18, %v8400_v59  ;;  %v7341_v59 = vld [vmem:[%s10515_s5 + $0x14] ss:$8 sps:$4 sm:$0xff] (%p50_p0)  }
 0x982   : > { %v1738_v33 = vmul.f32 %v7337_v58, %v8405_v39  ;;  %v7343_v39 = vld [vmem:[%s10515_s5 + $0x10] ss:$8 sps:$4 sm:$0xff] (%p50_p0)  }
 0x983   : > { %10546 = vst [vmem:[#allocation13_spill] sm:$0xff] %v8437_v4  ;;  %v10547_v11 = vmov %v8437_v4  ;;  %v8443_v5 = vadd.f32 %v8011_v34, %v1748_v42   ;;  %v1749_v2 = vmul.f32 %v7999_v30, %v1737_v43  ;;  %52 = sbr.rel (!%p50_p0) target bundleno = 4 (0x4), region = 78  ;;  %v1986_v42 = vld [vmem:[#allocation2 + $0x78] sm:$0xff] (%p50_p0) }
 0x984   : > { %v1750_v49 = vmul.f32 %v7999_v30, %v1738_v33  ;;  %v10557_v4 = vmov %v10547_v11  ;;  %v7338_v30 = vld [vmem:[%s10515_s5 + $0x4] ss:$8 sps:$4 sm:$0xff] (%p50_p0)   ;;  %1951 = vst.msk [vmem:[#allocation2 + $0x40] sm:$0xff] (%p50_p0), %vm120_vm0, %v10547_v11  ;;  %v8574_v33 = vrot.slane (%p50_p0), %v1987_v60, %v7973_v20 }
 0x985   : > { %10548 = vst [vmem:[#allocation14_spill] sm:$0xff] %v8443_v5  ;;  %v10549_v45 = vmov %v8443_v5  ;;  %v8448_v6 = vadd.f32 %v8011_v34, %v1749_v2   ;;  %v10559_v2 = vmov %v10542_v57  ;;  %v7809_v4 = vmov (%p50_p0), 0   ;;  %2069 = vmatprep.subr.bf16.mxu0 (%p50_p0), %v7338_v30 }
 0x986   : > { %v8451_v7 = vadd.f32 %v8011_v34, %v1750_v49   ;;  %v10556_v5 = vmov %v10549_v45  ;;  %1952 = vst.msk [vmem:[#allocation2 + $0x50] sm:$0xff] (%p50_p0), %vm120_vm0, %v10549_v45  ;;  %v7340_v34 = vld [vmem:[%s10515_s5] ss:$8 sps:$4 sm:$0xff] (%p50_p0)   ;;  %2101 = vmatprep.mubr.bf16.mxu0 (%p50_p0), %v7809_v4  ;;  %s7810_s5 = smov (%p50_p0), 64   ;;  %v8579_v30 = vrot.slane (%p50_p0), %v1987_v60, %v7976_v21 }
 0x987   : > { %10550 = vst [vmem:[#allocation15_spill] sm:$0xff] %v8448_v6  ;;  %v10551_v36 = vmov %v8448_v6  ;;  %2070 = vmatpush1.bf16.msra.mxu0 (%p50_p0), %v7340_v34  ;;  %2207 = vrot.lane.b32.xlu0 (%p50_p0), %v2205_v3, %s7810_s5  ;;  %v1978_v5 = vld [vmem:[#allocation2 + $0x38] sm:$0xff] (%p50_p0) }
 0x988   : > { %10552 = vst [vmem:[#allocation16_spill] sm:$0xff] %v8451_v7  ;;  %v10553_v9 = vmov %v8451_v7  ;;  %v10555_v6 = vmov %v10551_v36  ;;  %1953 = vst.msk [vmem:[#allocation2 + $0x60] sm:$0xff] (%p50_p0), %vm120_vm0, %v10551_v36  ;;  %2071 = vmatprep.subr.bf16.mxu0 (%p50_p0), %v7341_v59  ;;  %v1992_v38 = vpack.c.bf16 (%p50_p0), %v1978_v5, %v1977_v51 }
 0x989   : > { %v10554_v7 = vmov %v10553_v9  ;;  %1954 = vst.msk [vmem:[#allocation2 + $0x70] sm:$0xff] (%p50_p0), %vm120_vm0, %v10553_v9  ;;  %v1961_v6 = vld [vmem:[%s10511_s1 + $0x30] sm:$0xff] (%p50_p0) }
 0x98a   :  { %1969 = vst.msk [vmem:[#allocation2 + $0x68] sm:$0xff] %vm120_vm0, %v1961_v6 }
 0x98b   :  { %2072 = vmatpush1.bf16.msra.mxu0 %v7343_v39  ;;  %v1979_v7 = vld [vmem:[#allocation2 + $0x40] sm:$0xff] }
 0x98c   :  { %2073 = vmatprep.subr.bf16.mxu0 %v7344_v55  ;;  %v1993_v62 = vpack.c.bf16 %v1980_v12, %v1979_v7 }
 0x98d   :  { %v1981_v61 = vld [vmem:[#allocation2 + $0x50] sm:$0xff] }
 0x98e   :  { %v1994_v32 = vpack.c.bf16 %v1982_v15, %v1981_v61 }
 0x98f   :  { %2074 = vmatpush1.bf16.msra.mxu0 %v7346_v44  ;;  %v1983_v19 = vld [vmem:[#allocation2 + $0x60] sm:$0xff] }
 0x990   :  { %2075 = vmatprep.subr.bf16.mxu0 %v7347_v17  ;;  %v1985_v58 = vld [vmem:[#allocation2 + $0x70] sm:$0xff] }
 0x991   :  { %v1984_v41 = vld [vmem:[#allocation2 + $0x68] sm:$0xff]  ;;  %v1996_v43 = vpack.c.bf16 %v1986_v42, %v1985_v58 }
 0x992   :  { %v1995_v18 = vpack.c.bf16 %v1984_v41, %v1983_v19 }
 0x993   :  { %2076 = vmatpush1.bf16.msra.mxu0 %v7349_v40 }
 0x996   :  { %6380 = vmatmul.mubr.msk.bf16.vlgmr.msra.gmra.mrb[0].mxu0 %vm120_vm0, %v1989_v27 }
 0x997   :  { %2111 = vmatprep.mubr.bf16.mxu0 %v7809_v4 }
 0x99e   :  { %6381 = vmatmul.mubr.msk.bf16.gmra.mrb[4].mxu0 %vm120_vm0, %v1990_v48 }
 0x99f   :  { %2121 = vmatprep.mubr.bf16.mxu0 %v7809_v4 }
 0x9a6   :  { %6382 = vmatmul.mubr.msk.bf16.gmra.mrb[8].mxu0 %vm120_vm0, %v1991_v31 }
 0x9a7   :  { %2131 = vmatprep.mubr.bf16.mxu0 %v7809_v4 }
 0x9ae   :  { %6383 = vmatmul.mubr.msk.bf16.gmra.mrb[12].mxu0 %vm120_vm0, %v1992_v38 }
 0x9af   :  { %2141 = vmatprep.mubr.bf16.mxu0 %v7809_v4 }
 0x9b6   :  { %6384 = vmatmul.mubr.msk.bf16.gmra.mrb[16].mxu0 %vm120_vm0, %v1993_v62 }
 0x9b7   :  { %2151 = vmatprep.mubr.bf16.mxu0 %v7809_v4 }
 0x9be   :  { %6385 = vmatmul.mubr.msk.bf16.gmra.mrb[20].mxu0 %vm120_vm0, %v1994_v32 }
 0x9bf   :  { %2161 = vmatprep.mubr.bf16.mxu0 %v7809_v4 }
 0x9c6   :  { %6386 = vmatmul.mubr.msk.bf16.gmra.mrb[24].mxu0 %vm120_vm0, %v1995_v18 }
 0x9c7   :  { %2171 = vmatprep.mubr.bf16.mxu0 %v7809_v4  ;;  %v10523_v4 = vmov 0.0  }
 0x9c8   :  { %6844 = vmatprep.subr.bf16.mxu1 %v10523_v4  ;;  %6838 = vmatprep.subr.bf16.mxu0 %v10523_v4 }
 0x9c9   :  { %6846 = vmatprep.mubr.msk.bf16.mxu1 %vm7812_vm4, %v10523_v4 }
 0x9ce   :  { %6387 = vmatmul.mubr.msk.bf16.gmra.mrb[28].mxu0 %vm120_vm0, %v1996_v43 }
 0x9cf   :  { %6840 = vmatprep.mubr.msk.bf16.mxu0 %vm7812_vm4, %v10523_v4 }
 0x9f9   :  { %v8576_v2 = vpop.permute.xlu0 %2207 }
 0xa69   :  { %v2103_v49 = vpop.f32.mrb[0].mxu0 }
 0xa6a   :  { %v2105_v34 = vpop.f32.mrb[1].mxu0  ;;  %v8582_v59 = vadd.f32 %v8574_v33, %v2103_v49  ;;  %v2210_v55 = vadd.f32 %v8576_v2, %v2103_v49 }
 0xa6b   :  { %v2107_v39 = vpop.f32.mrb[2].mxu0  ;;  %v8592_v37 = vadd.f32 %v8579_v30, %v2105_v34 }
 0xa6c   :  { %v8588_v8 = vadd.f32 %v8574_v33, %v2107_v39  ;;  %v2211_v23 = vadd.f32 %v8576_v2, %v2107_v39  ;;  %v2109_v22 = vpop.f32.mrb[3].mxu0 }
 0xa6d   :  { %v8595_v46 = vadd.f32 %v8579_v30, %v2109_v22 }
 0xa6e   :  { %v2254_v17 = vpack.c.bf16 %v2211_v23, %v2210_v55 }
 0xa71   :  { %v2113_v40 = vpop.f32.mrb[4].mxu0 }
 0xa72   :  { %v2115_v6 = vpop.f32.mrb[5].mxu0  ;;  %v8606_v52 = vadd.f32 %v8574_v33, %v2113_v40  ;;  %v2212_v60 = vadd.f32 %v8576_v2, %v2113_v40 }
 0xa73   :  { %v2117_v1 = vpop.f32.mrb[6].mxu0  ;;  %v8614_v47 = vadd.f32 %v8579_v30, %v2115_v6 }
 0xa74   :  { %v8610_v3 = vadd.f32 %v8574_v33, %v2117_v1  ;;  %v2213_v50 = vadd.f32 %v8576_v2, %v2117_v1  ;;  %v2119_v27 = vpop.f32.mrb[7].mxu0 }
 0xa75   :  { %v8617_v53 = vadd.f32 %v8579_v30, %v2119_v27 }
 0xa76   :  { %v2247_v48 = vpack.c.bf16 %v8610_v3, %v8606_v52  ;;  %v2255_v0 = vpack.c.bf16 %v2213_v50, %v2212_v60  ;;  %v10562_v52 = vpack.c.bf16 %v8588_v8, %v8582_v59 }
 0xa77   :  { %v10563_v3 = vpack.c.bf16 %v8617_v53, %v8614_v47 }
 0xa78   :  { %2313 = vrot.lane.b32.xlu0 %v2255_v0, %s7810_s5 }
 0xa79   :  { %v2123_v31 = vpop.f32.mrb[8].mxu0 }
 0xa7a   :  { %v2125_v51 = vpop.f32.mrb[9].mxu0  ;;  %v8628_v7 = vadd.f32 %v8574_v33, %v2123_v31  ;;  %v2214_v12 = vadd.f32 %v8576_v2, %v2123_v31 }
 0xa7b   :  { %v8625_v5 = vadd.f32 %v8579_v30, %v2125_v51  ;;  %v2127_v38 = vpop.f32.mrb[10].mxu0 }
 0xa7c   :  { %v8632_v62 = vadd.f32 %v8574_v33, %v2127_v38  ;;  %v2215_v61 = vadd.f32 %v8576_v2, %v2127_v38  ;;  %v2129_v15 = vpop.f32.mrb[11].mxu0 }
 0xa7d   :  { %v8636_v32 = vadd.f32 %v8579_v30, %v2129_v15 }
 0xa7e   :  { %v2248_v19 = vpack.c.bf16 %v8632_v62, %v8628_v7  ;;  %v2256_v41 = vpack.c.bf16 %v2215_v61, %v2214_v12 }
 0xa80   :  { %2363 = vrot.lane.b32.xlu1 %v2256_v41, %s7810_s5 }
 0xa81   :  { %v2133_v58 = vpop.f32.mrb[12].mxu0 }
 0xa82   :  { %v8644_v42 = vadd.f32 %v8574_v33, %v2133_v58  ;;  %v2135_v43 = vpop.f32.mrb[13].mxu0  ;;  %v2216_v39 = vadd.f32 %v8576_v2, %v2133_v58 }
 0xa83   :  { %v8647_v49 = vadd.f32 %v8579_v30, %v2135_v43  ;;  %v2137_v34 = vpop.f32.mrb[14].mxu0 }
 0xa84   :  { %v8651_v55 = vadd.f32 %v8574_v33, %v2137_v34  ;;  %v2217_v23 = vadd.f32 %v8576_v2, %v2137_v34  ;;  %2263 = vrot.lane.b32.xlu1 %v2254_v17, %s7810_s5  ;;  %v2139_v22 = vpop.f32.mrb[15].mxu0 }
 0xa85   :  { %v8656_v40 = vadd.f32 %v8579_v30, %v2139_v22 }
 0xa86   :  { %v2257_v1 = vpack.c.bf16 %v2217_v23, %v2216_v39  ;;  %v10564_v62 = vpack.c.bf16 %v8651_v55, %v8644_v42 }
 0xa88   :  { %2413 = vrot.lane.b32.xlu0 %v2257_v1, %s7810_s5 }
 0xa89   :  { %v2143_v50 = vpop.f32.mrb[16].mxu0 }
 0xa8a   :  { %v8664_v27 = vadd.f32 %v8574_v33, %v2143_v50  ;;  %v2145_v0 = vpop.f32.mrb[17].mxu0  ;;  %v2218_v51 = vadd.f32 %v8576_v2, %v2143_v50 }
 0xa8b   :  { %v8667_v17 = vadd.f32 %v8579_v30, %v2145_v0  ;;  %v2147_v31 = vpop.f32.mrb[18].mxu0 }
 0xa8c   :  { %v8671_v38 = vadd.f32 %v8574_v33, %v2147_v31  ;;  %v2219_v12 = vadd.f32 %v8576_v2, %v2147_v31  ;;  %v2149_v61 = vpop.f32.mrb[19].mxu0 }
 0xa8d   :  { %v8675_v15 = vadd.f32 %v8579_v30, %v2149_v61 }
 0xa8e   :  { %v2258_v58 = vpack.c.bf16 %v2219_v12, %v2218_v51  ;;  %v10565_v47 = vpack.c.bf16 %v8671_v38, %v8664_v27  ;;  %v10567_v38 = vpack.c.bf16 %v8595_v46, %v8592_v37 }
 0xa90   :  { %2463 = vrot.lane.b32.xlu1 %v2258_v58, %s7810_s5 }
 0xa91   :  { %v2153_v34 = vpop.f32.mrb[20].mxu0 }
 0xa92   :  { %v8683_v39 = vadd.f32 %v8574_v33, %v2153_v34  ;;  %v2155_v23 = vpop.f32.mrb[21].mxu0  ;;  %v2220_v50 = vadd.f32 %v8576_v2, %v2153_v34 }
 0xa93   :  { %v8686_v22 = vadd.f32 %v8579_v30, %v2155_v23  ;;  %v2157_v1 = vpop.f32.mrb[22].mxu0 }
 0xa94   :  { %v8690_v0 = vadd.f32 %v8574_v33, %v2157_v1  ;;  %v2221_v31 = vadd.f32 %v8576_v2, %v2157_v1  ;;  %v2159_v51 = vpop.f32.mrb[23].mxu0 }
 0xa95   :  { %v8694_v12 = vadd.f32 %v8579_v30, %v2159_v51 }
 0xa96   :  { %v2259_v58 = vpack.c.bf16 %v2221_v31, %v2220_v50  ;;  %v10566_v42 = vpack.c.bf16 %v8690_v0, %v8683_v39 }
 0xa98   :  { %2513 = vrot.lane.b32.xlu0 %v2259_v58, %s7810_s5 }
 0xa99   :  { %v2163_v10 = vpop.f32.mrb[24].mxu0 }
 0xa9a   :  { %v8702_v34 = vadd.f32 %v8574_v33, %v2163_v10  ;;  %v2165_v43 = vpop.f32.mrb[25].mxu0  ;;  %v2222_v51 = vadd.f32 %v8576_v2, %v2163_v10 }
 0xa9b   :  { %v8705_v1 = vadd.f32 %v8579_v30, %v2165_v43  ;;  %v2167_v60 = vpop.f32.mrb[26].mxu0 }
 0xa9c   :  { %v8709_v18 = vadd.f32 %v8574_v33, %v2167_v60  ;;  %v2223_v50 = vadd.f32 %v8576_v2, %v2167_v60  ;;  %v2169_v31 = vpop.f32.mrb[27].mxu0 }
 0xa9d   :  { %v8713_v23 = vadd.f32 %v8579_v30, %v2169_v31 }
 0xa9e   :  { %v2252_v58 = vpack.c.bf16 %v8709_v18, %v8702_v34  ;;  %v2260_v14 = vpack.c.bf16 %v2223_v50, %v2222_v51 }
 0xaa0   :  { %2563 = vrot.lane.b32.xlu1 %v2260_v14, %s7810_s5 }
 0xaa1   :  { %v2173_v61 = vpop.f32.mrb[28].mxu0 }
 0xaa2   :  { %v2200_v10 = vadd.f32 %v8574_v33, %v2173_v61  ;;  %v2175_v41 = vpop.f32.mrb[29].mxu0  ;;  %v2224_v31 = vadd.f32 %v8576_v2, %v2173_v61 }
 0xaa3   :  { %v8722_v6 = vadd.f32 %v8579_v30, %v2175_v41  ;;  %v2177_v60 = vpop.f32.mrb[30].mxu0 }
 0xaa4   :  { %v2201_v54 = vadd.f32 %v8574_v33, %v2177_v60  ;;  %v2225_v18 = vadd.f32 %v8576_v2, %v2177_v60  ;;  %v2179_v34 = vpop.f32.mrb[31].mxu0 }
 0xaa5   :  { %v8728_v51 = vadd.f32 %v8579_v30, %v2179_v34 }
 0xaa6   :  { %v2253_v50 = vpack.c.bf16 %v2201_v54, %v2200_v10  ;;  %v2261_v14 = vpack.c.bf16 %v2225_v18, %v2224_v31 }
 0xaa7   :  { %v2854_v43 = vpack.c.bf16 %v8728_v51, %v8722_v6 }
 0xaa8   :  { %2613 = vrot.lane.b32.xlu0 %v2261_v14, %s7810_s5 }
 0xaea   :  { %v2314_v41 = vpop.permute.xlu0 %2313 }
 0xaeb   :  { %v2319_v44 = vsel %vm120_vm0, %v2314_v41, 0 }
 0xaec   :  { %6845 = vmatpush3.bf16.xpose.msra.mxu1 %v2319_v44 }
 0xaed   :  { %6850 = vmatprep.subr.bf16.mxu1 %v10523_v4 }
 0xaf2   :  { %v2364_v33 = vpop.permute.xlu1 %2363 }
 0xaf3   :  { %v2369_v2 = vsel %vm120_vm0, %v2364_v33, 0  ;;  %6847 = vmatmul.mubr.msk.bf16.vlgmr.msra.gmra.mrb[0].mxu1 %vm120_vm0, %v2247_v48 }
 0xaf4   :  { %6851 = vmatpush3.bf16.xpose.msra.mxu1 %v2369_v2  ;;  %6852 = vmatprep.mubr.msk.bf16.mxu1 %vm7812_vm4, %v10523_v4 }
 0xaf5   :  { %6856 = vmatprep.subr.bf16.mxu1 %v10523_v4 }
 0xaf6   :  { %v2264_v30 = vpop.permute.xlu1 %2263 }
 0xaf7   :  { %v2269_v54 = vsel %vm120_vm0, %v2264_v30, 0 }
 0xaf8   :  { %6839 = vmatpush3.bf16.xpose.msra.mxu0 %v2269_v54 }
 0xaf9   :  { %6892 = vmatprep.subr.bf16.mxu0 %v10523_v4 }
 0xafa   :  { %v2414_v44 = vpop.permute.xlu0 %2413 }
 0xafb   :  { %v2419_v61 = vsel %vm120_vm0, %v2414_v44, 0  ;;  %6853 = vmatmul.mubr.msk.bf16.vlgmr.msra.gmra.mrb[4].mxu1 %vm120_vm0, %v2248_v19 }
 0xafc   :  { %6857 = vmatpush3.bf16.xpose.msra.mxu1 %v2419_v61  ;;  %6858 = vmatprep.mubr.msk.bf16.mxu1 %vm7812_vm4, %v10523_v4 }
 0xafd   :  { %6862 = vmatprep.subr.bf16.mxu1 %v10523_v4 }
 0xaff   :  { %6841 = vmatmul.mubr.msk.bf16.vlgmr.msra.gmra.mrb[32].mxu0 %vm120_vm0, %v10562_v52 }
 0xb00   :  { %6893 = vmatpush3.bf16.msra.mxu0 %v10563_v3  ;;  %6894 = vmatprep.mubr.msk.bf16.mxu0 %vm7812_vm4, %v10523_v4 }
 0xb01   :  { %6904 = vmatprep.subr.bf16.mxu0 %v10523_v4 }
 0xb02   :  { %v2464_v48 = vpop.permute.xlu1 %2463 }
 0xb03   :  { %v2469_v7 = vsel %vm120_vm0, %v2464_v48, 0  ;;  %6859 = vmatmul.mubr.msk.bf16.vlgmr.msra.gmra.mrb[8].mxu1 %vm120_vm0, %v10564_v62 }
 0xb04   :  { %6863 = vmatpush3.bf16.xpose.msra.mxu1 %v2469_v7  ;;  %6864 = vmatprep.mubr.msk.bf16.mxu1 %vm7812_vm4, %v10523_v4 }
 0xb05   :  { %6868 = vmatprep.subr.bf16.mxu1 %v10523_v4 }
 0xb0a   :  { %v2514_v59 = vpop.permute.xlu0 %2513 }
 0xb0b   :  { %v2519_v8 = vsel %vm120_vm0, %v2514_v59, 0  ;;  %6865 = vmatmul.mubr.msk.bf16.vlgmr.msra.gmra.mrb[12].mxu1 %vm120_vm0, %v10565_v47 }
 0xb0c   :  { %6869 = vmatpush3.bf16.xpose.msra.mxu1 %v2519_v8  ;;  %6870 = vmatprep.mubr.msk.bf16.mxu1 %vm7812_vm4, %v10523_v4 }
 0xb0d   :  { %6874 = vmatprep.subr.bf16.mxu1 %v10523_v4 }
 0xb12   :  { %v2564_v53 = vpop.permute.xlu1 %2563 }
 0xb13   :  { %v2569_v19 = vsel %vm120_vm0, %v2564_v53, 0  ;;  %6871 = vmatmul.mubr.msk.bf16.vlgmr.msra.gmra.mrb[16].mxu1 %vm120_vm0, %v10566_v42 }
 0xb14   :  { %6875 = vmatpush3.bf16.xpose.msra.mxu1 %v2569_v19  ;;  %6876 = vmatprep.mubr.msk.bf16.mxu1 %vm7812_vm4, %v10523_v4 }
 0xb15   :  { %6880 = vmatprep.subr.bf16.mxu1 %v10523_v4 }
 0xb1a   :  { %v2614_v55 = vpop.permute.xlu0 %2613 }
 0xb1b   :  { %v2619_v27 = vsel %vm120_vm0, %v2614_v55, 0  ;;  %6877 = vmatmul.mubr.msk.bf16.vlgmr.msra.gmra.mrb[20].mxu1 %vm120_vm0, %v2252_v58 }
 0xb1c   :  { %6881 = vmatpush3.bf16.xpose.msra.mxu1 %v2619_v27  ;;  %6882 = vmatprep.mubr.msk.bf16.mxu1 %vm7812_vm4, %v10523_v4 }
 0xb1d   :  { %6886 = vmatprep.subr.bf16.mxu1 %v10523_v4 }
 0xb23   :  { %6883 = vmatmul.mubr.msk.bf16.vlgmr.msra.gmra.mrb[24].mxu1 %vm120_vm0, %v2253_v50 }
 0xb24   :  { %6887 = vmatpush3.bf16.msra.mxu1 %v10567_v38  ;;  %6888 = vmatprep.mubr.msk.bf16.mxu1 %vm7812_vm4, %v10523_v4 }
 0xb25   :  { %6898 = vmatprep.subr.bf16.mxu1 %v10523_v4 }
 0xbc6   :  { %v8799_v39 = vpop.f32.mrb[0].mxu1 }
 0xbc7   :  { %v6848_v0 = vpop.f32.mrb[1].mxu1  ;;  %v2669_v52 = vsel %vm2662_vm5, %v8799_v39, -inf }
 0xbc8   :  { %v8801_v58 = vpop.f32.mrb[2].mxu1 }
 0xbc9   :  { %v6849_v10 = vpop.f32.mrb[3].mxu1  ;;  %v2672_v54 = vsel %vm2662_vm5, %v8801_v58, -inf }
 0xbce   :  { %v8803_v60 = vpop.f32.mrb[4].mxu1 }
 0xbcf   :  { %v6854_v31 = vpop.f32.mrb[5].mxu1  ;;  %v2675_v48 = vsel %vm2662_vm5, %v8803_v60, -inf }
 0xbd0   :  { %v8805_v18 = vpop.f32.mrb[6].mxu1 }
 0xbd1   :  { %v6855_v34 = vpop.f32.mrb[7].mxu1  ;;  %v2678_v3 = vsel %vm2662_vm5, %v8805_v18, -inf }
 0xbd2   :  { %v2305_v50 = vpop.f32.mrb[32].mxu0 }
 0xbd3   :  { %v6842_v37 = vpop.f32.mrb[33].mxu0  ;;  %v2663_v46 = vsel %vm2662_vm5, %v2305_v50, -inf }
 0xbd4   :  { %2664 = vmax.xlane.f32.xlu1 %v2663_v46  ;;  %v2308_v14 = vpop.f32.mrb[34].mxu0 }
 0xbd5   :  { %v6843_v41 = vpop.f32.mrb[35].mxu0  ;;  %v2666_v33 = vsel %vm2662_vm5, %v2308_v14, -inf }
 0xbd6   :  { %v8809_v2 = vpop.f32.mrb[8].mxu1  ;;  %2667 = vmax.xlane.f32.xlu0 %v2666_v33 }
 0xbd7   :  { %v6860_v30 = vpop.f32.mrb[9].mxu1  ;;  %v2681_v53 = vsel %vm2662_vm5, %v8809_v2, -inf }
 0xbd8   :  { %v8813_v44 = vpop.f32.mrb[10].mxu1  ;;  %2673 = vmax.xlane.f32.xlu1 %v2672_v54 }
 0xbd9   :  { %v6861_v61 = vpop.f32.mrb[11].mxu1  ;;  %v2684_v59 = vsel %vm2662_vm5, %v8813_v44, -inf }
 0xbda   :  { %2670 = vmax.xlane.f32.xlu0 %v2669_v52 }
 0xbdc   :  { %2679 = vmax.xlane.f32.xlu1 %v2678_v3 }
 0xbde   :  { %v8821_v7 = vpop.f32.mrb[12].mxu1  ;;  %2676 = vmax.xlane.f32.xlu0 %v2675_v48 }
 0xbdf   :  { %v6866_v62 = vpop.f32.mrb[13].mxu1  ;;  %v2687_v42 = vsel %vm2662_vm5, %v8821_v7, -inf }
 0xbe0   :  { %v8825_v8 = vpop.f32.mrb[14].mxu1  ;;  %2685 = vmax.xlane.f32.xlu1 %v2684_v59 }
 0xbe1   :  { %v6867_v47 = vpop.f32.mrb[15].mxu1  ;;  %v2690_v19 = vsel %vm2662_vm5, %v8825_v8, -inf }
 0xbe2   :  { %2682 = vmax.xlane.f32.xlu0 %v2681_v53 }
 0xbe4   :  { %2691 = vmax.xlane.f32.xlu1 %v2690_v19 }
 0xbe6   :  { %v8833_v55 = vpop.f32.mrb[16].mxu1  ;;  %2688 = vmax.xlane.f32.xlu0 %v2687_v42 }
 0xbe7   :  { %v6872_v27 = vpop.f32.mrb[17].mxu1  ;;  %v2693_v31 = vsel %vm2662_vm5, %v8833_v55, -inf }
 0xbe8   :  { %v8835_v38 = vpop.f32.mrb[18].mxu1 }
 0xbe9   :  { %v6873_v0 = vpop.f32.mrb[19].mxu1  ;;  %v2696_v10 = vsel %vm2662_vm5, %v8835_v38, -inf }
 0xbea   :  { %2697 = vmax.xlane.f32.xlu1 %v2696_v10  ;;  %2694 = vmax.xlane.f32.xlu0 %v2693_v31 }
 0xbee   :  { %v8841_v34 = vpop.f32.mrb[20].mxu1 }
 0xbef   :  { %v6878_v37 = vpop.f32.mrb[21].mxu1  ;;  %v2699_v46 = vsel %vm2662_vm5, %v8841_v34, -inf }
 0xbf0   :  { %v8845_v41 = vpop.f32.mrb[22].mxu1  ;;  %2700 = vmax.xlane.f32.xlu0 %v2699_v46 }
 0xbf1   :  { %v6879_v33 = vpop.f32.mrb[23].mxu1  ;;  %v2702_v30 = vsel %vm2662_vm5, %v8845_v41, -inf }
 0xbf2   :  { %2703 = vmax.xlane.f32.xlu1 %v2702_v30 }
 0xbf6   :  { %v8849_v54 = vpop.f32.mrb[24].mxu1 }
 0xbf7   :  { %v6884_v61 = vpop.f32.mrb[25].mxu1  ;;  %v2705_v52 = vsel %vm2662_vm5, %v8849_v54, -inf }
 0xbf8   :  { %v8853_v3 = vpop.f32.mrb[26].mxu1  ;;  %2706 = vmax.xlane.f32.xlu0 %v2705_v52 }
 0xbf9   :  { %v6885_v48 = vpop.f32.mrb[27].mxu1  ;;  %v2708_v62 = vsel %vm2662_vm5, %v8853_v3, -inf }
 0xbfa   :  { %2709 = vmax.xlane.f32.xlu1 %v2708_v62 }
 0xc61   :  { %v2665_v59 = vpop.xlane.xlu1 %2664 }
 0xc62   :  { %v2711_v47 = vsub.f32 %v2305_v50, %v2665_v59 }
 0xc63   :  { %v2668_v53 = vpop.xlane.xlu0 %2667 }
 0xc64   :  { %v2727_v19 = vmul.f32 1.442695, %v2711_v47  ;;  %v2712_v42 = vsub.f32 %v2308_v14, %v2668_v53 }
 0xc65   :  { %v2674_v27 = vpop.xlane.xlu1 %2673 }
 0xc66   :  { %7374 = vpow2.f32 %v2727_v19  ;;  %v2729_v0 = vmul.f32 1.442695, %v2712_v42  ;;  %v2714_v10 = vsub.f32 %v8801_v58, %v2674_v27 }
 0xc67   :  { %v2671_v31 = vpop.xlane.xlu0 %2670 }
 0xc68   :  { %7376 = vpow2.f32 %v2729_v0  ;;  %v2733_v37 = vmul.f32 1.442695, %v2714_v10  ;;  %v2713_v46 = vsub.f32 %v8799_v39, %v2671_v31 }
 0xc69   :  { %v2680_v33 = vpop.xlane.xlu1 %2679 }
 0xc6a   :  { %7378 = vpow2.f32 %v2733_v37  ;;  %v2731_v30 = vmul.f32 1.442695, %v2713_v46  ;;  %v2716_v61 = vsub.f32 %v8805_v18, %v2680_v33 }
 0xc6b   :  { %v2677_v52 = vpop.xlane.xlu0 %2676 }
 0xc6c   :  { %7380 = vpow2.f32 %v2731_v30  ;;  %v2737_v50 = vmul.f32 1.442695, %v2716_v61  ;;  %v2715_v14 = vsub.f32 %v8803_v60, %v2677_v52 }
 0xc6d   :  { %v2686_v48 = vpop.xlane.xlu1 %2685 }
 0xc6e   :  { %7382 = vpow2.f32 %v2737_v50  ;;  %v2735_v62 = vmul.f32 1.442695, %v2715_v14  ;;  %v2718_v58 = vsub.f32 %v8813_v44, %v2686_v48 }
 0xc6f   :  { %v2683_v59 = vpop.xlane.xlu0 %2682 }
 0xc70   :  { %v8862_v47 = vpop.eup %7374  ;;  %7384 = vpow2.f32 %v2735_v62  ;;  %v2741_v39 = vmul.f32 1.442695, %v2718_v58  ;;  %v2717_v53 = vsub.f32 %v8809_v2, %v2683_v59 }
 0xc71   :  { %v2692_v19 = vpop.xlane.xlu1 %2691  ;;  %v2759_v18 = vsel %vm2662_vm5, %v8862_v47, 0.0 }
 0xc72   :  { %v8867_v42 = vpop.eup %7376  ;;  %7386 = vpow2.f32 %v2741_v39  ;;  %v2739_v60 = vmul.f32 1.442695, %v2717_v53  ;;  %v2720_v27 = vsub.f32 %v8825_v8, %v2692_v19  ;;  %2760 = vadd.xlane.f32.xlu0 %v2759_v18 }
 0xc73   :  { %v2689_v0 = vpop.xlane.xlu0 %2688  ;;  %v2762_v44 = vsel %vm2662_vm5, %v8867_v42, 0.0 }
 0xc74   :  { %v8872_v10 = vpop.eup %7378  ;;  %7388 = vpow2.f32 %v2739_v60  ;;  %v2745_v31 = vmul.f32 1.442695, %v2720_v27  ;;  %v2719_v2 = vsub.f32 %v8821_v7, %v2689_v0  ;;  %2763 = vadd.xlane.f32.xlu1 %v2762_v44 }
 0xc75   :  { %v2768_v8 = vsel %vm2662_vm5, %v8872_v10, 0.0 }
 0xc76   :  { %v8875_v37 = vpop.eup %7380  ;;  %7390 = vpow2.f32 %v2745_v31  ;;  %v2743_v46 = vmul.f32 1.442695, %v2719_v2 }
 0xc77   :  { %v2698_v33 = vpop.xlane.xlu1 %2697  ;;  %v2695_v30 = vpop.xlane.xlu0 %2694  ;;  %v2765_v61 = vsel %vm2662_vm5, %v8875_v37, 0.0 }
 0xc78   :  { %v8881_v52 = vpop.eup %7382  ;;  %7392 = vpow2.f32 %v2743_v46  ;;  %v2722_v50 = vsub.f32 %v8835_v38, %v2698_v33  ;;  %v2721_v7 = vsub.f32 %v8833_v55, %v2695_v30  ;;  %2769 = vadd.xlane.f32.xlu1 %v2768_v8  ;;  %2766 = vadd.xlane.f32.xlu0 %v2765_v61 }
 0xc79   :  { %v2774_v58 = vsel %vm2662_vm5, %v8881_v52, 0.0 }
 0xc7a   :  { %v8885_v14 = vpop.eup %7384  ;;  %v2749_v48 = vmul.f32 1.442695, %v2722_v50  ;;  %v2747_v62 = vmul.f32 1.442695, %v2721_v7 }
 0xc7b   :  { %v2771_v59 = vsel %vm2662_vm5, %v8885_v14, 0.0 }
 0xc7c   :  { %v8891_v39 = vpop.eup %7386  ;;  %7394 = vpow2.f32 %v2749_v48  ;;  %2775 = vadd.xlane.f32.xlu1 %v2774_v58  ;;  %2772 = vadd.xlane.f32.xlu0 %v2771_v59 }
 0xc7d   :  { %7396 = vpow2.f32 %v2747_v62  ;;  %v2701_v38 = vpop.xlane.xlu0 %2700  ;;  %v2780_v18 = vsel %vm2662_vm5, %v8891_v39, 0.0 }
 0xc7e   :  { %v8893_v55 = vpop.eup %7388  ;;  %v2723_v53 = vsub.f32 %v8841_v34, %v2701_v38 }
 0xc7f   :  { %v2704_v19 = vpop.xlane.xlu1 %2703  ;;  %v2777_v60 = vsel %vm2662_vm5, %v8893_v55, 0.0 }
 0xc80   :  { %v8900_v27 = vpop.eup %7390  ;;  %v2751_v0 = vmul.f32 1.442695, %v2723_v53  ;;  %v2724_v44 = vsub.f32 %v8845_v41, %v2704_v19  ;;  %2781 = vadd.xlane.f32.xlu1 %v2780_v18  ;;  %2778 = vadd.xlane.f32.xlu0 %v2777_v60 }
 0xc81   :  { %v2786_v34 = vsel %vm2662_vm5, %v8900_v27, 0.0 }
 0xc82   :  { %v8903_v31 = vpop.eup %7392  ;;  %7398 = vpow2.f32 %v2751_v0  ;;  %v2753_v2 = vmul.f32 1.442695, %v2724_v44 }
 0xc83   :  { %v2783_v46 = vsel %vm2662_vm5, %v8903_v31, 0.0 }
 0xc84   :  { %7400 = vpow2.f32 %v2753_v2  ;;  %2787 = vadd.xlane.f32.xlu1 %v2786_v34  ;;  %2784 = vadd.xlane.f32.xlu0 %v2783_v46 }
 0xc85   :  { %v2707_v33 = vpop.xlane.xlu0 %2706 }
 0xc86   :  { %v8909_v30 = vpop.eup %7394  ;;  %v2725_v41 = vsub.f32 %v8849_v54, %v2707_v33 }
 0xc87   :  { %v8912_v8 = vpop.eup %7396  ;;  %v2710_v61 = vpop.xlane.xlu1 %2709  ;;  %v2792_v50 = vsel %vm2662_vm5, %v8909_v30, 0.0 }
 0xc88   :  { %v2755_v7 = vmul.f32 1.442695, %v2725_v41  ;;  %v2726_v48 = vsub.f32 %v8853_v3, %v2710_v61  ;;  %2793 = vadd.xlane.f32.xlu1 %v2792_v50  ;;  %v2789_v62 = vsel %vm2662_vm5, %v8912_v8, 0.0 }
 0xc89   :  { %2790 = vadd.xlane.f32.xlu0 %v2789_v62 }
 0xc8a   :  { %7402 = vpow2.f32 %v2755_v7  ;;  %v2757_v58 = vmul.f32 1.442695, %v2726_v48 }
 0xc8c   :  { %v8919_v59 = vpop.eup %7398  ;;  %7404 = vpow2.f32 %v2757_v58 }
 0xc8d   :  { %v2795_v54 = vsel %vm2662_vm5, %v8919_v59, 0.0 }
 0xc8e   :  { %v8923_v38 = vpop.eup %7400  ;;  %2796 = vadd.xlane.f32.xlu0 %v2795_v54 }
 0xc8f   :  { %v2798_v53 = vsel %vm2662_vm5, %v8923_v38, 0.0 }
 0xc90   :  { %2799 = vadd.xlane.f32.xlu1 %v2798_v53 }
 0xc94   :  { %v8927_v3 = vpop.eup %7402 }
 0xc95   :  { %v2801_v19 = vsel %vm2662_vm5, %v8927_v3, 0.0 }
 0xc96   :  { %v8931_v18 = vpop.eup %7404  ;;  %2802 = vadd.xlane.f32.xlu0 %v2801_v19 }
 0xc97   :  { %v2804_v60 = vsel %vm2662_vm5, %v8931_v18, 0.0 }
 0xc98   :  { %2805 = vadd.xlane.f32.xlu1 %v2804_v60 }
 0xcff   :  { %v2761_v0 = vpop.xlane.xlu0 %2760 }
 0xd00   :  { %7406 = vrcp.f32 %v2761_v0 }
 0xd01   :  { %v2764_v44 = vpop.xlane.xlu1 %2763 }
 0xd02   :  { %7408 = vrcp.f32 %v2764_v44 }
 0xd05   :  { %v2770_v2 = vpop.xlane.xlu1 %2769  ;;  %v2767_v34 = vpop.xlane.xlu0 %2766 }
 0xd06   :  { %7410 = vrcp.f32 %v2770_v2 }
 0xd07   :  { %7412 = vrcp.f32 %v2767_v34 }
 0xd09   :  { %v2776_v46 = vpop.xlane.xlu1 %2775  ;;  %v2773_v33 = vpop.xlane.xlu0 %2772 }
 0xd0a   :  { %v7407_v41 = vpop.eup %7406  ;;  %7414 = vrcp.f32 %v2776_v46 }
 0xd0b   :  { %7416 = vrcp.f32 %v2773_v33  ;;  %v2823_v50 = vmul.f32 %v7407_v41, %v8862_v47  ;;  %v10568_v47 = vpack.c.bf16 %v8636_v32, %v8625_v5  ;;  %v10569_v5 = vpack.c.bf16 %v8656_v40, %v8647_v49 }
 0xd0c   :  { %v7409_v61 = vpop.eup %7408 }
 0xd0d   :  { %v2824_v7 = vmul.f32 %v7409_v61, %v8867_v42  ;;  %v2782_v48 = vpop.xlane.xlu1 %2781  ;;  %v2779_v62 = vpop.xlane.xlu0 %2778 }
 0xd0e   :  { %7418 = vrcp.f32 %v2782_v48 }
 0xd0f   :  { %7420 = vrcp.f32 %v2779_v62  ;;  %v2839_v58 = vpack.c.bf16 %v2824_v7, %v2823_v50  ;;  %v10570_v50 = vpack.c.bf16 %v8675_v15, %v8667_v17  ;;  %v10571_v17 = vpack.c.bf16 %v8694_v12, %v8686_v22 }
 0xd10   :  { %v7411_v54 = vpop.eup %7410  ;;  %v10572_v22 = vpack.c.bf16 %v8713_v23, %v8705_v1 }
 0xd11   :  { %v7413_v53 = vpop.eup %7412  ;;  %v2826_v19 = vmul.f32 %v7411_v54, %v8872_v10  ;;  %v2788_v60 = vpop.xlane.xlu1 %2787  ;;  %6889 = vmatmul.mubr.msk.bf16.vlgmr.msra.gmra.mrb[28].mxu1 %vm2662_vm5, %v2839_v58 }
 0xd12   :  { %v2785_v0 = vpop.xlane.xlu0 %2784  ;;  %v2825_v44 = vmul.f32 %v7413_v53, %v8875_v37  ;;  %7422 = vrcp.f32 %v2788_v60  ;;  %6899 = vmatpush3.bf16.msra.mxu1 %v10568_v47  ;;  %6900 = vmatprep.mubr.msk.bf16.mxu1 %vm7812_vm4, %v10523_v4 }
 0xd13   :  { %7424 = vrcp.f32 %v2785_v0  ;;  %6910 = vmatprep.subr.bf16.mxu1 %v10523_v4 }
 0xd14   :  { %v7415_v42 = vpop.eup %7414  ;;  %v2840_v2 = vpack.c.bf16 %v2826_v19, %v2825_v44  ;;  %v7351_v44 = vld [vmem:[%s10517_s7 + $0x8] sm:$0xff]  }
 0xd15   :  { %v7417_v10 = vpop.eup %7416  ;;  %v2828_v34 = vmul.f32 %v7415_v42, %v8881_v52  ;;  %v2794_v46 = vpop.xlane.xlu1 %2793 }
 0xd16   :  { %v2827_v33 = vmul.f32 %v7417_v10, %v8885_v14  ;;  %7426 = vrcp.f32 %v2794_v46  ;;  %6895 = vmatmul.mubr.msk.bf16.vlgmr.msra.gmra.mrb[36].mxu0 %vm2662_vm5, %v2840_v2  ;;  %v2791_v37 = vpop.xlane.xlu0 %2790 }
 0xd17   :  { %6905 = vmatpush3.bf16.msra.mxu0 %v10569_v5  ;;  %7428 = vrcp.f32 %v2791_v37  ;;  %6906 = vmatprep.mubr.msk.bf16.mxu0 %vm7812_vm4, %v10523_v4 }
 0xd18   :  { %v7419_v32 = vpop.eup %7418  ;;  %v2841_v41 = vpack.c.bf16 %v2828_v34, %v2827_v33  ;;  %6916 = vmatprep.subr.bf16.mxu0 %v10523_v4 }
 0xd19   :  { %v7421_v52 = vpop.eup %7420  ;;  %v2830_v61 = vmul.f32 %v7419_v32, %v8891_v39 }
 0xd1a   :  { %v2829_v14 = vmul.f32 %v7421_v52, %v8893_v55  ;;  %6901 = vmatmul.mubr.msk.bf16.vlgmr.msra.gmra.mrb[32].mxu1 %vm2662_vm5, %v2841_v41 }
 0xd1b   :  { %6911 = vmatpush3.bf16.msra.mxu1 %v10570_v50  ;;  %v2797_v49 = vpop.xlane.xlu0 %2796  ;;  %6912 = vmatprep.mubr.msk.bf16.mxu1 %vm7812_vm4, %v10523_v4 }
 0xd1c   :  { %v7423_v40 = vpop.eup %7422  ;;  %7430 = vrcp.f32 %v2797_v49  ;;  %v2842_v7 = vpack.c.bf16 %v2830_v61, %v2829_v14  ;;  %6922 = vmatprep.subr.bf16.mxu1 %v10523_v4 }
 0xd1d   :  { %v7425_v48 = vpop.eup %7424  ;;  %v2832_v39 = vmul.f32 %v7423_v40, %v8900_v27  ;;  %v2800_v62 = vpop.xlane.xlu1 %2799  ;;  %v7350_v27 = vld [vmem:[%s10517_s7] sm:$0xff]  }
 0xd1e   :  { %v2831_v55 = vmul.f32 %v7425_v48, %v8903_v31  ;;  %7432 = vrcp.f32 %v2800_v62  ;;  %6907 = vmatmul.mubr.msk.bf16.vlgmr.msra.gmra.mrb[40].mxu0 %vm2662_vm5, %v2842_v7 }
 0xd1f   :  { %6917 = vmatpush3.bf16.msra.mxu0 %v10571_v17  ;;  %6918 = vmatprep.mubr.msk.bf16.mxu0 %vm7812_vm4, %v10523_v4 }
 0xd20   :  { %v7427_v15 = vpop.eup %7426  ;;  %v2843_v58 = vpack.c.bf16 %v2832_v39, %v2831_v55  ;;  %6928 = vmatprep.subr.bf16.mxu0 %v10523_v4 }
 0xd21   :  { %v7429_v54 = vpop.eup %7428  ;;  %v2834_v31 = vmul.f32 %v7427_v15, %v8909_v30 }
 0xd22   :  { %v2833_v53 = vmul.f32 %v7429_v54, %v8912_v8  ;;  %6913 = vmatmul.mubr.msk.bf16.vlgmr.msra.gmra.mrb[36].mxu1 %vm2662_vm5, %v2843_v58 }
 0xd23   :  { %6923 = vmatpush3.bf16.msra.mxu1 %v10572_v22  ;;  %v2803_v12 = vpop.xlane.xlu0 %2802  ;;  %6924 = vmatprep.mubr.msk.bf16.mxu1 %vm7812_vm4, %v10523_v4 }
 0xd24   :  { %7434 = vrcp.f32 %v2803_v12  ;;  %v2844_v19 = vpack.c.bf16 %v2834_v31, %v2833_v53  ;;  %6934 = vmatprep.subr.bf16.mxu1 %v7350_v27 }
 0xd25   :  { %v2806_v60 = vpop.xlane.xlu1 %2805 }
 0xd26   :  { %v7431_v0 = vpop.eup %7430  ;;  %7436 = vrcp.f32 %v2806_v60  ;;  %6919 = vmatmul.mubr.msk.bf16.vlgmr.msra.gmra.mrb[44].mxu0 %vm2662_vm5, %v2844_v19 }
 0xd27   :  { %6929 = vmatpush3.bf16.msra.mxu0 %v2854_v43  ;;  %6930 = vmatprep.mubr.msk.bf16.mxu0 %vm7812_vm4, %v10523_v4  ;;  %v2835_v1 = vmul.f32 %v7431_v0, %v8919_v59  ;;  %v7352_v59 = vld [vmem:[%s10517_s7 + $0x10] sm:$0xff]  }
 0xd28   :  { %v7433_v23 = vpop.eup %7432 }
 0xd29   :  { %v2836_v30 = vmul.f32 %v7433_v23, %v8923_v38  ;;  %v7353_v38 = vld [vmem:[%s10517_s7 + $0x18] sm:$0xff]  }
 0xd2b   :  { %v2845_v8 = vpack.c.bf16 %v2836_v30, %v2835_v1 }
 0xd2d   :  { %6925 = vmatmul.mubr.msk.bf16.vlgmr.msra.gmra.mrb[40].mxu1 %vm2662_vm5, %v2845_v8 }
 0xd2e   :  { %v7435_v47 = vpop.eup %7434  ;;  %6935 = vmatpush3.bf16.msra.mxu1 %v7350_v27 }
 0xd2f   :  { %6936 = vmatprep.subr.bf16.mxu1 %v7351_v44  ;;  %v2837_v43 = vmul.f32 %v7435_v47, %v8927_v3 }
 0xd30   :  { %v7437_v6 = vpop.eup %7436 }
 0xd31   :  { %v2838_v51 = vmul.f32 %v7437_v6, %v8931_v18  ;;  %v9016_v6 = vld [vmem:[%s10518_s8] sm:$0xff] }
 0xd32   :  { %6937 = vmatpush3.bf16.msra.mxu1 %v7351_v44 }
 0xd33   :  { %v2846_v42 = vpack.c.bf16 %v2838_v51, %v2837_v43  ;;  %6938 = vmatprep.subr.bf16.mxu1 %v7352_v59  ;;  %v9020_v43 = vrot.slane %v9016_v6, %v7981_v24 }
 0xd35   :  { %6931 = vmatmul.mubr.msk.bf16.vlgmr.msra.gmra.mrb[48].mxu0 %vm2662_vm5, %v2846_v42 }
 0xd36   :  { %6939 = vmatpush3.bf16.msra.mxu1 %v7352_v59 }
 0xd37   :  { %6940 = vmatprep.subr.bf16.mxu1 %v7353_v38 }
 0xd3a   :  { %6941 = vmatpush3.bf16.msra.mxu1 %v7353_v38 }
 0xde4   :  { %v2892_v2 = vpop.f32.mrb[28].mxu1 }
 0xde5   :  { %v6890_v3 = vpop.f32.mrb[29].mxu1 }
 0xde6   :  { %v2895_v10 = vpop.f32.mrb[30].mxu1 }
 0xde7   :  { %v3215_v18 = vpack.c.bf16 %v2895_v10, %v2892_v2  ;;  %v6891_v34 = vpop.f32.mrb[31].mxu1 }
 0xde8   :  { %v7667_v34 = vld [vmem:[#allocation2] sm:$0xff] }
 0xde9   :  { %v2936_v46 = vpop.f32.mrb[36].mxu0  ;;  %6942 = vmatprep.mubr.msk.bf16.mxu1 %vm120_vm0, %v3215_v18 }
 0xdea   :  { %v6896_v33 = vpop.f32.mrb[37].mxu0 }
 0xdeb   :  { %v2939_v37 = vpop.f32.mrb[38].mxu0 }
 0xdec   :  { %v3216_v5 = vpack.c.bf16 %v2939_v37, %v2936_v46  ;;  %v6897_v32 = vpop.f32.mrb[39].mxu0  ;;  %v7668_v37 = vld [vmem:[#allocation2 + $0x8] sm:$0xff] }
 0xded   :  { %v2980_v41 = vpop.f32.mrb[32].mxu1  ;;  %v7669_v32 = vld [vmem:[#allocation2 + $0x10] sm:$0xff] }
 0xdee   :  { %v6902_v52 = vpop.f32.mrb[33].mxu1  ;;  %6943 = vmatmul.mubr.msk.bf16.vlgmr.msra.gmra.mrb[44].mxu1 %vm120_vm0, %v3216_v5 }
 0xdef   :  { %v2983_v61 = vpop.f32.mrb[34].mxu1 }
 0xdf0   :  { %v3217_v14 = vpack.c.bf16 %v2983_v61, %v2980_v41  ;;  %v6903_v50 = vpop.f32.mrb[35].mxu1 }
 0xdf1   :  { %v3024_v49 = vpop.f32.mrb[40].mxu0 }
 0xdf2   :  { %v6908_v40 = vpop.f32.mrb[41].mxu0  ;;  %6946 = vmatprep.mubr.msk.bf16.mxu1 %vm120_vm0, %v3217_v14  ;;  %v7670_v14 = vld [vmem:[#allocation2 + $0x18] sm:$0xff] }
 0xdf3   :  { %v3027_v7 = vpop.f32.mrb[42].mxu0 }
 0xdf4   :  { %v3218_v48 = vpack.c.bf16 %v3027_v7, %v3024_v49  ;;  %v6909_v39 = vpop.f32.mrb[43].mxu0 }
 0xdf5   :  { %v3068_v62 = vpop.f32.mrb[36].mxu1 }
 0xdf6   :  { %v6914_v55 = vpop.f32.mrb[37].mxu1  ;;  %6947 = vmatmul.mubr.msk.bf16.gmra.mrb[48].mxu1 %vm120_vm0, %v3218_v48 }
 0xdf7   :  { %v3071_v17 = vpop.f32.mrb[38].mxu1 }
 0xdf8   :  { %v3219_v15 = vpack.c.bf16 %v3071_v17, %v3068_v62  ;;  %v6915_v58 = vpop.f32.mrb[39].mxu1 }
 0xdf9   :  { %v3112_v27 = vpop.f32.mrb[44].mxu0  ;;  %v7671_v58 = vld [vmem:[#allocation2 + $0x20] sm:$0xff] }
 0xdfa   :  { %v6920_v54 = vpop.f32.mrb[45].mxu0  ;;  %6950 = vmatprep.mubr.msk.bf16.mxu1 %vm120_vm0, %v3219_v15 }
 0xdfb   :  { %v3115_v31 = vpop.f32.mrb[46].mxu0 }
 0xdfc   :  { %v3220_v53 = vpack.c.bf16 %v3115_v31, %v3112_v27  ;;  %v6921_v22 = vpop.f32.mrb[47].mxu0  ;;  %v7672_v31 = vld [vmem:[#allocation2 + $0x28] sm:$0xff] }
 0xdfd   :  { %v7673_v22 = vld [vmem:[#allocation2 + $0x30] sm:$0xff] }
 0xdfe   :  { %6951 = vmatmul.mubr.msk.bf16.gmra.mrb[52].mxu1 %vm120_vm0, %v3220_v53 }
 0xe00   :  { %v3156_v12 = vpop.f32.mrb[40].mxu1 }
 0xe01   :  { %v6926_v19 = vpop.f32.mrb[41].mxu1 }
 0xe02   :  { %v3159_v60 = vpop.f32.mrb[42].mxu1 }
 0xe03   :  { %v3221_v0 = vpack.c.bf16 %v3159_v60, %v3156_v12  ;;  %v6927_v23 = vpop.f32.mrb[43].mxu1 }
 0xe05   :  { %6954 = vmatprep.mubr.msk.bf16.mxu1 %vm120_vm0, %v3221_v0  ;;  %v7674_v0 = vld [vmem:[#allocation2 + $0x38] sm:$0xff] }
 0xe08   :  { %v3200_v1 = vpop.f32.mrb[48].mxu0 }
 0xe09   :  { %v6932_v30 = vpop.f32.mrb[49].mxu0 }
 0xe0a   :  { %v3203_v8 = vpop.f32.mrb[50].mxu0 }
 0xe0b   :  { %v3222_v44 = vpack.c.bf16 %v3203_v8, %v3200_v1  ;;  %v6933_v47 = vpop.f32.mrb[51].mxu0 }
 0xe0d   :  { %6955 = vmatmul.mubr.msk.bf16.gmra.mrb[56].mxu1 %vm120_vm0, %v3222_v44 }
 0xec1   :  { %v6944_v51 = vpop.f32.mrb[44].mxu1 }
 0xec2   :  { %v3309_v42 = vpop.f32.mrb[45].mxu1  ;;  %v3318_v59 = vadd.f32 %v6944_v51, %v9020_v43 }
 0xec3   :  { %v3310_v38 = vadd.f32 %v3309_v42, %v9020_v43  ;;  %v6945_v2 = vpop.f32.mrb[46].mxu1 }
 0xec4   :  { %v3312_v3 = vpop.f32.mrb[47].mxu1  ;;  %v3321_v10 = vadd.f32 %v6945_v2, %v9020_v43  ;;  %v9032_v41 = vadd.f32 %v7669_v32, %v3318_v59  ;;  %v7675_v2 = vld [vmem:[#allocation2 + $0x40] sm:$0xff] }
 0xec5   :  { %v3313_v18 = vadd.f32 %v3312_v3, %v9020_v43  ;;  %v9026_v46 = vadd.f32 %v7667_v34, %v3310_v38 }
 0xec6   :  { %v9036_v50 = vadd.f32 %v7670_v14, %v3321_v10  ;;  %v3394_v39 = vsel %vm120_vm0, %v9032_v41, 0.0 }
 0xec7   :  { %v3388_v33 = vsel %vm120_vm0, %v9026_v46, 0.0  ;;  %v9030_v5 = vadd.f32 %v7668_v37, %v3313_v18  ;;  %v7676_v18 = vld [vmem:[#allocation2 + $0x48] sm:$0xff] }
 0xec8   :  { %3389 = vadd.xlane.f32.xlu0 %v3388_v33  ;;  %v3397_v15 = vsel %vm120_vm0, %v9036_v50, 0.0  ;;  %v7677_v33 = vld [vmem:[#allocation2 + $0x50] sm:$0xff] }
 0xec9   :  { %v6948_v52 = vpop.f32.mrb[48].mxu1  ;;  %v3391_v61 = vsel %vm120_vm0, %v9030_v5, 0.0 }
 0xeca   :  { %3392 = vadd.xlane.f32.xlu1 %v3391_v61  ;;  %v3325_v49 = vpop.f32.mrb[49].mxu1  ;;  %v3334_v40 = vadd.f32 %v6948_v52, %v9020_v43  ;;  %v7678_v52 = vld [vmem:[#allocation2 + $0x58] sm:$0xff] }
 0xecb   :  { %v3326_v7 = vadd.f32 %v3325_v49, %v9020_v43  ;;  %v6949_v48 = vpop.f32.mrb[50].mxu1 }
 0xecc   :  { %3395 = vadd.xlane.f32.xlu0 %v3394_v39  ;;  %v3328_v62 = vpop.f32.mrb[51].mxu1  ;;  %v3337_v55 = vadd.f32 %v6949_v48, %v9020_v43  ;;  %v9052_v12 = vadd.f32 %v7673_v22, %v3334_v40  ;;  %v7680_v22 = vld [vmem:[#allocation2 + $0x68] sm:$0xff] }
 0xecd   :  { %v3329_v17 = vadd.f32 %v3328_v62, %v9020_v43  ;;  %v9046_v27 = vadd.f32 %v7671_v58, %v3326_v7  ;;  %v7679_v58 = vld [vmem:[#allocation2 + $0x60] sm:$0xff] }
 0xece   :  { %3398 = vadd.xlane.f32.xlu1 %v3397_v15  ;;  %v9056_v23 = vadd.f32 %v7674_v0, %v3337_v55  ;;  %v3406_v47 = vsel %vm120_vm0, %v9052_v12, 0.0 }
 0xecf   :  { %v3400_v54 = vsel %vm120_vm0, %v9046_v27, 0.0  ;;  %v9050_v53 = vadd.f32 %v7672_v31, %v3329_v17 }
 0xed0   :  { %3401 = vadd.xlane.f32.xlu0 %v3400_v54  ;;  %v3409_v38 = vsel %vm120_vm0, %v9056_v23, 0.0 }
 0xed1   :  { %v6952_v19 = vpop.f32.mrb[52].mxu1  ;;  %v3403_v60 = vsel %vm120_vm0, %v9050_v53, 0.0 }
 0xed2   :  { %3404 = vadd.xlane.f32.xlu1 %v3403_v60  ;;  %v3341_v1 = vpop.f32.mrb[53].mxu1  ;;  %v3350_v30 = vadd.f32 %v6952_v19, %v9020_v43  ;;  %v7681_v60 = vld [vmem:[#allocation2 + $0x70] sm:$0xff] }
 0xed3   :  { %v3342_v8 = vadd.f32 %v3341_v1, %v9020_v43  ;;  %v6953_v44 = vpop.f32.mrb[54].mxu1 }
 0xed4   :  { %3407 = vadd.xlane.f32.xlu0 %v3406_v47  ;;  %v3344_v51 = vpop.f32.mrb[55].mxu1  ;;  %v3353_v42 = vadd.f32 %v6953_v44, %v9020_v43  ;;  %v9072_v37 = vadd.f32 %v7677_v33, %v3350_v30  ;;  %v7682_v30 = vld [vmem:[#allocation2 + $0x78] sm:$0xff] }
 0xed5   :  { %v3345_v59 = vadd.f32 %v3344_v51, %v9020_v43  ;;  %v9066_v3 = vadd.f32 %v7675_v2, %v3342_v8 }
 0xed6   :  { %3410 = vadd.xlane.f32.xlu1 %v3409_v38  ;;  %v9076_v61 = vadd.f32 %v7678_v52, %v3353_v42  ;;  %v3418_v14 = vsel %vm120_vm0, %v9072_v37, 0.0 }
 0xed7   :  { %v3412_v10 = vsel %vm120_vm0, %v9066_v3, 0.0  ;;  %v9070_v34 = vadd.f32 %v7676_v18, %v3345_v59 }
 0xed8   :  { %3413 = vadd.xlane.f32.xlu0 %v3412_v10  ;;  %v3421_v49 = vsel %vm120_vm0, %v9076_v61, 0.0 }
 0xed9   :  { %v3415_v32 = vsel %vm120_vm0, %v9070_v34, 0.0 }
 0xeda   :  { %3416 = vadd.xlane.f32.xlu1 %v3415_v32 }
 0xedc   :  { %3419 = vadd.xlane.f32.xlu0 %v3418_v14 }
 0xede   :  { %3422 = vadd.xlane.f32.xlu1 %v3421_v49 }
 0xee0   :  { %v6956_v40 = vpop.f32.mrb[56].mxu1 }
 0xee1   :  { %v3357_v7 = vpop.f32.mrb[57].mxu1  ;;  %v3366_v48 = vadd.f32 %v6956_v40, %v9020_v43 }
 0xee2   :  { %v3358_v39 = vadd.f32 %v3357_v7, %v9020_v43  ;;  %v6957_v62 = vpop.f32.mrb[58].mxu1 }
 0xee3   :  { %v3360_v55 = vpop.f32.mrb[59].mxu1  ;;  %v3369_v17 = vadd.f32 %v6957_v62, %v9020_v43  ;;  %v9092_v0 = vadd.f32 %v7681_v60, %v3366_v48 }
 0xee4   :  { %v3361_v15 = vadd.f32 %v3360_v55, %v9020_v43  ;;  %v9086_v54 = vadd.f32 %v7679_v58, %v3358_v39 }
 0xee5   :  { %v9096_v8 = vadd.f32 %v7682_v30, %v3369_v17  ;;  %v3430_v43 = vsel %vm120_vm0, %v9092_v0, 0.0 }
 0xee6   :  { %v3424_v31 = vsel %vm120_vm0, %v9086_v54, 0.0  ;;  %v9090_v19 = vadd.f32 %v7680_v22, %v3361_v15 }
 0xee7   :  { %3425 = vadd.xlane.f32.xlu0 %v3424_v31  ;;  %v3433_v44 = vsel %vm120_vm0, %v9096_v8, 0.0 }
 0xee8   :  { %v3427_v1 = vsel %vm120_vm0, %v9090_v19, 0.0 }
 0xee9   :  { %3428 = vadd.xlane.f32.xlu1 %v3427_v1 }
 0xeeb   :  { %3431 = vadd.xlane.f32.xlu0 %v3430_v43 }
 0xeed   :  { %3434 = vadd.xlane.f32.xlu1 %v3433_v44 }
 0xf55   :  { %v3390_v47 = vpop.xlane.xlu0 %3389 }
 0xf56   :  { %v3436_v51 = vmul.f32 0.015625, %v3390_v47 }
 0xf57   :  { %v3393_v42 = vpop.xlane.xlu1 %3392 }
 0xf58   :  { %v3437_v59 = vmul.f32 0.015625, %v3393_v42  ;;  %v9103_v38 = vsub.f32 %v9026_v46, %v3436_v51 }
 0xf59   :  { %v3396_v2 = vpop.xlane.xlu0 %3395 }
 0xf5a   :  { %v3438_v10 = vmul.f32 0.015625, %v3396_v2  ;;  %v3468_v18 = vmul.f32 %v9103_v38, %v9103_v38  ;;  %v9108_v33 = vsub.f32 %v9030_v5, %v3437_v59 }
 0xf5b   :  { %v3399_v32 = vpop.xlane.xlu1 %3398 }
 0xf5c   :  { %v3439_v52 = vmul.f32 0.015625, %v3399_v32  ;;  %v3484_v14 = vsel %vm120_vm0, %v3468_v18, 0.0  ;;  %v3469_v49 = vmul.f32 %v9108_v33, %v9108_v33  ;;  %v9114_v40 = vsub.f32 %v9032_v41, %v3438_v10 }
 0xf5d   :  { %v3402_v46 = vpop.xlane.xlu0 %3401  ;;  %3485 = vadd.xlane.f32.xlu0 %v3484_v14 }
 0xf5e   :  { %v3440_v7 = vmul.f32 0.015625, %v3402_v46  ;;  %v3487_v48 = vsel %vm120_vm0, %v3469_v49, 0.0  ;;  %v3470_v39 = vmul.f32 %v9114_v40, %v9114_v40  ;;  %v9120_v5 = vsub.f32 %v9036_v50, %v3439_v52 }
 0xf5f   :  { %v3405_v62 = vpop.xlane.xlu1 %3404  ;;  %3488 = vadd.xlane.f32.xlu1 %v3487_v48 }
 0xf60   :  { %v3441_v55 = vmul.f32 0.015625, %v3405_v62  ;;  %v3490_v17 = vsel %vm120_vm0, %v3470_v39, 0.0  ;;  %v3471_v41 = vmul.f32 %v9120_v5, %v9120_v5  ;;  %v9126_v15 = vsub.f32 %v9046_v27, %v3440_v7 }
 0xf61   :  { %v3408_v58 = vpop.xlane.xlu0 %3407  ;;  %3491 = vadd.xlane.f32.xlu0 %v3490_v17 }
 0xf62   :  { %v3442_v31 = vmul.f32 0.015625, %v3408_v58  ;;  %v3493_v22 = vsel %vm120_vm0, %v3471_v41, 0.0  ;;  %v3472_v50 = vmul.f32 %v9126_v15, %v9126_v15  ;;  %v9132_v60 = vsub.f32 %v9050_v53, %v3441_v55  ;;  %v7354_v41 = vld [vmem:[%s10516_s6] sm:$0xff]  }
 0xf63   :  { %v3411_v1 = vpop.xlane.xlu1 %3410  ;;  %3494 = vadd.xlane.f32.xlu1 %v3493_v22  ;;  %6982 = vmatprep.subr.bf16.mxu1 %v7354_v41 }
 0xf64   :  { %v3443_v30 = vmul.f32 0.015625, %v3411_v1  ;;  %v3496_v43 = vsel %vm120_vm0, %v3472_v50, 0.0  ;;  %v3473_v27 = vmul.f32 %v9132_v60, %v9132_v60  ;;  %v9138_v44 = vsub.f32 %v9052_v12, %v3442_v31  ;;  %6983 = vmatpush3.bf16.msra.mxu1 %v7354_v41 }
 0xf65   :  { %v3414_v47 = vpop.xlane.xlu0 %3413  ;;  %3497 = vadd.xlane.f32.xlu0 %v3496_v43  ;;  %v3803_v41 = vpack.c.bf16 %v10549_v45, %v10547_v11 }
 0xf66   :  { %v3444_v51 = vmul.f32 0.015625, %v3414_v47  ;;  %v3499_v42 = vsel %vm120_vm0, %v3473_v27, 0.0  ;;  %v3474_v53 = vmul.f32 %v9138_v44, %v9138_v44  ;;  %v9144_v59 = vsub.f32 %v9056_v23, %v3443_v30  ;;  %v7357_v30 = vld [vmem:[%s10516_s6 + $0x10] sm:$0xff]   ;;  %v7356_v47 = vld [vmem:[%s10517_s7 + $0x20] sm:$0xff]  }
 0xf67   :  { %v3417_v2 = vpop.xlane.xlu1 %3416  ;;  %3500 = vadd.xlane.f32.xlu1 %v3499_v42  ;;  %6958 = vmatprep.subr.bf16.mxu0 %v7356_v47 }
 0xf68   :  { %v3445_v10 = vmul.f32 0.015625, %v3417_v2  ;;  %v3502_v18 = vsel %vm120_vm0, %v3474_v53, 0.0  ;;  %v3475_v12 = vmul.f32 %v9144_v59, %v9144_v59  ;;  %v9150_v32 = vsub.f32 %v9066_v3, %v3444_v51  ;;  %6959 = vmatpush3.bf16.msra.mxu0 %v7356_v47 }
 0xf69   :  { %v3420_v52 = vpop.xlane.xlu0 %3419  ;;  %3503 = vadd.xlane.f32.xlu0 %v3502_v18 }
 0xf6a   :  { %v3446_v14 = vmul.f32 0.015625, %v3420_v52  ;;  %v3505_v49 = vsel %vm120_vm0, %v3475_v12, 0.0  ;;  %v3476_v23 = vmul.f32 %v9150_v32, %v9150_v32  ;;  %v9156_v46 = vsub.f32 %v9070_v34, %v3445_v10 }
 0xf6b   :  { %v3423_v7 = vpop.xlane.xlu1 %3422  ;;  %3506 = vadd.xlane.f32.xlu1 %v3505_v49 }
 0xf6c   :  { %v3447_v48 = vmul.f32 0.015625, %v3423_v7  ;;  %v3508_v39 = vsel %vm120_vm0, %v3476_v23, 0.0  ;;  %v3477_v3 = vmul.f32 %v9156_v46, %v9156_v46  ;;  %v9162_v62 = vsub.f32 %v9072_v37, %v3446_v14 }
 0xf6d   :  { %3509 = vadd.xlane.f32.xlu0 %v3508_v39 }
 0xf6e   :  { %v3511_v55 = vsel %vm120_vm0, %v3477_v3, 0.0  ;;  %v3478_v17 = vmul.f32 %v9162_v62, %v9162_v62  ;;  %v9168_v34 = vsub.f32 %v9076_v61, %v3447_v48  ;;  %v7355_v61 = vld [vmem:[%s10516_s6 + $0x8] sm:$0xff]   ;;  %v3802_v48 = vpack.c.bf16 %v8422_v35, %v10542_v57 }
 0xf6f   :  { %3512 = vadd.xlane.f32.xlu1 %v3511_v55  ;;  %6984 = vmatprep.subr.bf16.mxu1 %v7355_v61 }
 0xf70   :  { %v3514_v58 = vsel %vm120_vm0, %v3478_v17, 0.0  ;;  %v3479_v37 = vmul.f32 %v9168_v34, %v9168_v34  ;;  %6985 = vmatpush3.bf16.msra.mxu1 %v7355_v61  ;;  %v7361_v17 = vld [vmem:[%s10517_s7 + $0x38] sm:$0xff]  }
 0xf71   :  { %3515 = vadd.xlane.f32.xlu0 %v3514_v58  ;;  %6986 = vmatprep.subr.bf16.mxu1 %v7357_v30  ;;  %v3804_v58 = vpack.c.bf16 %v10553_v9, %v10551_v36 }
 0xf72   :  { %v3517_v31 = vsel %vm120_vm0, %v3479_v37, 0.0  ;;  %v3929_v37 = vrot.slane %v9016_v6, %v7984_v25 }
 0xf73   :  { %3518 = vadd.xlane.f32.xlu1 %v3517_v31 }
 0xf74   :  { %v3426_v22 = vpop.xlane.xlu0 %3425  ;;  %6987 = vmatpush3.bf16.msra.mxu1 %v7357_v30 }
 0xf75   :  { %v3448_v50 = vmul.f32 0.015625, %v3426_v22 }
 0xf76   :  { %v3429_v1 = vpop.xlane.xlu1 %3428 }
 0xf77   :  { %v3449_v43 = vmul.f32 0.015625, %v3429_v1  ;;  %v9184_v27 = vsub.f32 %v9086_v54, %v3448_v50  ;;  %v7359_v54 = vld [vmem:[%s10516_s6 + $0x18] sm:$0xff]  }
 0xf78   :  { %v3432_v51 = vpop.xlane.xlu0 %3431  ;;  %6988 = vmatprep.subr.bf16.mxu1 %v7359_v54 }
 0xf79   :  { %v3450_v42 = vmul.f32 0.015625, %v3432_v51  ;;  %v3480_v53 = vmul.f32 %v9184_v27, %v9184_v27  ;;  %v9192_v2 = vsub.f32 %v9090_v19, %v3449_v43  ;;  %v7358_v19 = vld [vmem:[%s10517_s7 + $0x28] sm:$0xff]   ;;  %6989 = vmatpush3.bf16.msra.mxu1 %v7359_v54 }
 0xf7a   :  { %v3435_v10 = vpop.xlane.xlu1 %3434  ;;  %6960 = vmatprep.subr.bf16.mxu0 %v7358_v19  ;;  %7010 = vmatprep.subr.bf16.mxu1 %v10523_v4 }
 0xf7b   :  { %v3451_v18 = vmul.f32 0.015625, %v3435_v10  ;;  %v3520_v12 = vsel %vm120_vm0, %v3480_v53, 0.0  ;;  %v3481_v52 = vmul.f32 %v9192_v2, %v9192_v2  ;;  %v9201_v14 = vsub.f32 %v9092_v0, %v3450_v42  ;;  %6961 = vmatpush3.bf16.msra.mxu0 %v7358_v19 }
 0xf7c   :  { %3521 = vadd.xlane.f32.xlu0 %v3520_v12  ;;  %v3801_v0 = vpack.c.bf16 %v10545_v56, %v10544_v63 }
 0xf7d   :  { %v3523_v49 = vsel %vm120_vm0, %v3481_v52, 0.0  ;;  %v3482_v23 = vmul.f32 %v9201_v14, %v9201_v14  ;;  %v9210_v7 = vsub.f32 %v9096_v8, %v3451_v18  ;;  %v7360_v8 = vld [vmem:[%s10517_s7 + $0x30] sm:$0xff]  }
 0xf7e   :  { %3524 = vadd.xlane.f32.xlu1 %v3523_v49  ;;  %6990 = vmatprep.mubr.msk.bf16.mxu1 %vm120_vm0, %v3801_v0  ;;  %v1988_v49 = vld [vmem:[%s10518_s8 + $0x8] sm:$0xff] }
 0xf7f   :  { %v3526_v39 = vsel %vm120_vm0, %v3482_v23, 0.0  ;;  %v3483_v3 = vmul.f32 %v9210_v7, %v9210_v7  ;;  %6991 = vmatmul.mubr.msk.bf16.vlgmr.msra.gmra.mrb[60].mxu1 %vm120_vm0, %v3802_v48  ;;  %6962 = vmatprep.subr.bf16.mxu0 %v7360_v8 }
 0xf80   :  { %3527 = vadd.xlane.f32.xlu0 %v3526_v39  ;;  %6963 = vmatpush3.bf16.msra.mxu0 %v7360_v8 }
 0xf81   :  { %v3529_v55 = vsel %vm120_vm0, %v3483_v3, 0.0  ;;  %6964 = vmatprep.subr.bf16.mxu0 %v7361_v17  ;;  %6994 = vmatprep.mubr.msk.bf16.mxu1 %vm120_vm0, %v3803_v41  ;;  %v9245_v3 = vrot.slane %v1988_v49, %v7976_v21 }
 0xf82   :  { %3530 = vadd.xlane.f32.xlu1 %v3529_v55 }
 0xf84   :  { %6965 = vmatpush3.bf16.msra.mxu0 %v7361_v17 }
 0xf85   :  { %6998 = vmatprep.subr.bf16.mxu0 %v10523_v4 }
 0xf87   :  { %6995 = vmatmul.mubr.msk.bf16.gmra.mrb[64].mxu1 %vm120_vm0, %v3804_v58 }
 0xf88   :  { %7012 = vmatprep.mubr.msk.bf16.mxu1 %vm7812_vm4, %v10523_v4 }
 0xf96   :  { %3931 = vrot.lane.b32.xlu0 %v3929_v37, %s7810_s5 }
 0xfea   :  { %v3486_v31 = vpop.xlane.xlu0 %3485 }
 0xfeb   :  { %v3532_v61 = vmul.f32 0.015625, %v3486_v31 }
 0xfec   :  { %v3489_v22 = vpop.xlane.xlu1 %3488 }
 0xfed   :  { %v3548_v50 = vadd.f32 1e-05, %v3532_v61  ;;  %v3533_v1 = vmul.f32 0.015625, %v3489_v22 }
 0xfee   :  { %v3492_v30 = vpop.xlane.xlu0 %3491 }
 0xfef   :  { %7438 = vrsqrt.f32 %v3548_v50  ;;  %v3549_v43 = vadd.f32 1e-05, %v3533_v1  ;;  %v3534_v47 = vmul.f32 0.015625, %v3492_v30  ;;  %v9251_v30 = vrot.slane %v1988_v49, %v7981_v24 }
 0xff0   :  { %v3495_v51 = vpop.xlane.xlu1 %3494 }
 0xff1   :  { %7440 = vrsqrt.f32 %v3549_v43  ;;  %v3550_v42 = vadd.f32 1e-05, %v3534_v47  ;;  %v3535_v53 = vmul.f32 0.015625, %v3495_v51 }
 0xff2   :  { %v3498_v10 = vpop.xlane.xlu0 %3497 }
 0xff3   :  { %7442 = vrsqrt.f32 %v3550_v42  ;;  %v3551_v54 = vadd.f32 1e-05, %v3535_v53  ;;  %v3536_v18 = vmul.f32 0.015625, %v3498_v10 }
 0xff4   :  { %v3501_v12 = vpop.xlane.xlu1 %3500 }
 0xff5   :  { %7444 = vrsqrt.f32 %v3551_v54  ;;  %v3552_v52 = vadd.f32 1e-05, %v3536_v18  ;;  %v3537_v19 = vmul.f32 0.015625, %v3501_v12 }
 0xff6   :  { %v3504_v23 = vpop.xlane.xlu0 %3503 }
 0xff7   :  { %7446 = vrsqrt.f32 %v3552_v52  ;;  %v3553_v0 = vadd.f32 1e-05, %v3537_v19  ;;  %v3538_v48 = vmul.f32 0.015625, %v3504_v23 }
 0xff8   :  { %v3507_v39 = vpop.xlane.xlu1 %3506 }
 0xff9   :  { %v7439_v8 = vpop.eup %7438  ;;  %7448 = vrsqrt.f32 %v3553_v0  ;;  %v3554_v55 = vadd.f32 1e-05, %v3538_v48  ;;  %v3539_v17 = vmul.f32 0.015625, %v3507_v39 }
 0xffa   :  { %v3510_v41 = vpop.xlane.xlu0 %3509  ;;  %v3580_v58 = vmul.f32 %v7439_v8, %v9103_v38 }
 0xffb   :  { %v7441_v37 = vpop.eup %7440  ;;  %7450 = vrsqrt.f32 %v3554_v55  ;;  %v3555_v31 = vadd.f32 1e-05, %v3539_v17  ;;  %v3540_v61 = vmul.f32 0.015625, %v3510_v41 }
 0xffc   :  { %v3513_v22 = vpop.xlane.xlu1 %3512  ;;  %v3581_v50 = vmul.f32 %v7441_v37, %v9108_v33  ;;  %v3600_v1 = vmul.f32 %v9245_v3, %v3580_v58 }
 0xffd   :  { %v7443_v43 = vpop.eup %7442  ;;  %7452 = vrsqrt.f32 %v3555_v31  ;;  %v3556_v47 = vadd.f32 1e-05, %v3540_v61  ;;  %v3541_v51 = vmul.f32 0.015625, %v3513_v22 }
 0xffe   :  { %v3516_v42 = vpop.xlane.xlu0 %3515  ;;  %v3601_v53 = vmul.f32 %v9245_v3, %v3581_v50  ;;  %v3582_v38 = vmul.f32 %v7443_v43, %v9114_v40  ;;  %v9256_v33 = vadd.f32 %v9251_v30, %v3600_v1 }
 0xfff   :  { %v7445_v10 = vpop.eup %7444  ;;  %7454 = vrsqrt.f32 %v3556_v47  ;;  %v3557_v54 = vadd.f32 1e-05, %v3541_v51  ;;  %v3542_v18 = vmul.f32 0.015625, %v3516_v42 }
0x1000   :  { %v3519_v12 = vpop.xlane.xlu1 %3518  ;;  %v9259_v24 = vadd.f32 %v9251_v30, %v3601_v53  ;;  %v3583_v52 = vmul.f32 %v7445_v10, %v9120_v5  ;;  %v3602_v19 = vmul.f32 %v9245_v3, %v3582_v38 }
0x1001   :  { %v7447_v49 = vpop.eup %7446  ;;  %7456 = vrsqrt.f32 %v3557_v54  ;;  %v3558_v23 = vadd.f32 1e-05, %v3542_v18  ;;  %v3543_v0 = vmul.f32 0.015625, %v3519_v12 }
0x1002   :  { %v3636_v40 = vpack.c.bf16 %v9259_v24, %v9256_v33  ;;  %v3603_v48 = vmul.f32 %v9245_v3, %v3583_v52  ;;  %v3584_v39 = vmul.f32 %v7447_v49, %v9126_v15  ;;  %v9269_v5 = vadd.f32 %v9251_v30, %v3602_v19 }
0x1003   :  { %v7449_v8 = vpop.eup %7448  ;;  %7458 = vrsqrt.f32 %v3558_v23  ;;  %v3559_v55 = vadd.f32 1e-05, %v3543_v0 }
0x1004   :  { %6966 = vmatprep.mubr.msk.bf16.mxu0 %vm120_vm0, %v3636_v40  ;;  %v9272_v17 = vadd.f32 %v9251_v30, %v3603_v48  ;;  %v3585_v41 = vmul.f32 %v7449_v8, %v9132_v60  ;;  %v3604_v58 = vmul.f32 %v9245_v3, %v3584_v39 }
0x1005   :  { %v7451_v37 = vpop.eup %7450  ;;  %7460 = vrsqrt.f32 %v3559_v55 }
0x1006   :  { %v3637_v15 = vpack.c.bf16 %v9272_v17, %v9269_v5  ;;  %v3605_v31 = vmul.f32 %v9245_v3, %v3585_v41  ;;  %v3586_v61 = vmul.f32 %v7451_v37, %v9138_v44  ;;  %v9282_v50 = vadd.f32 %v9251_v30, %v3604_v58 }
0x1007   :  { %v7453_v22 = vpop.eup %7452 }
0x1008   :  { %6967 = vmatmul.mubr.msk.bf16.vlgmr.msra.gmra.mrb[52].mxu0 %vm120_vm0, %v3637_v15  ;;  %v9285_v1 = vadd.f32 %v9251_v30, %v3605_v31  ;;  %v3587_v60 = vmul.f32 %v7453_v22, %v9144_v59  ;;  %v3606_v43 = vmul.f32 %v9245_v3, %v3586_v61 }
0x1009   :  { %v7455_v47 = vpop.eup %7454  ;;  %v3522_v51 = vpop.xlane.xlu0 %3521 }
0x100a   :  { %v3544_v42 = vmul.f32 0.015625, %v3522_v51  ;;  %v3638_v53 = vpack.c.bf16 %v9285_v1, %v9282_v50  ;;  %v3607_v44 = vmul.f32 %v9245_v3, %v3587_v60  ;;  %v9293_v54 = vadd.f32 %v9251_v30, %v3606_v43 }
0x100b   :  { %v7457_v38 = vpop.eup %7456  ;;  %v3525_v10 = vpop.xlane.xlu1 %3524  ;;  %v3588_v18 = vmul.f32 %v7455_v47, %v9150_v32 }
0x100c   :  { %v3560_v12 = vadd.f32 1e-05, %v3544_v42  ;;  %v3545_v52 = vmul.f32 0.015625, %v3525_v10  ;;  %6970 = vmatprep.mubr.msk.bf16.mxu0 %vm120_vm0, %v3638_v53  ;;  %v9298_v59 = vadd.f32 %v9251_v30, %v3607_v44  ;;  %v3589_v19 = vmul.f32 %v7457_v38, %v9156_v46 }
0x100d   :  { %v7459_v49 = vpop.eup %7458  ;;  %v3528_v23 = vpop.xlane.xlu0 %3527  ;;  %v3608_v0 = vmul.f32 %v9245_v3, %v3588_v18 }
0x100e   :  { %7462 = vrsqrt.f32 %v3560_v12  ;;  %v3561_v40 = vadd.f32 1e-05, %v3545_v52  ;;  %v3546_v48 = vmul.f32 0.015625, %v3528_v23  ;;  %v3639_v39 = vpack.c.bf16 %v9298_v59, %v9293_v54 }
0x100f   :  { %v7461_v32 = vpop.eup %7460  ;;  %v3531_v8 = vpop.xlane.xlu1 %3530  ;;  %v3609_v55 = vmul.f32 %v9245_v3, %v3589_v19  ;;  %v3590_v41 = vmul.f32 %v7459_v49, %v9162_v62  ;;  %v9309_v15 = vadd.f32 %v9251_v30, %v3608_v0 }
0x1010   :  { %7464 = vrsqrt.f32 %v3561_v40  ;;  %v3562_v58 = vadd.f32 1e-05, %v3546_v48  ;;  %v3547_v37 = vmul.f32 0.015625, %v3531_v8  ;;  %6971 = vmatmul.mubr.msk.bf16.gmra.mrb[56].mxu0 %vm120_vm0, %v3639_v39  ;;  %v3591_v46 = vmul.f32 %v7461_v32, %v9168_v34 }
0x1011   :  { %v9312_v31 = vadd.f32 %v9251_v30, %v3609_v55  ;;  %v3610_v61 = vmul.f32 %v9245_v3, %v3590_v41 }
0x1012   :  { %7466 = vrsqrt.f32 %v3562_v58  ;;  %v3563_v22 = vadd.f32 1e-05, %v3547_v37  ;;  %v3611_v60 = vmul.f32 %v9245_v3, %v3591_v46 }
0x1013   :  { %v3640_v62 = vpack.c.bf16 %v9312_v31, %v9309_v15  ;;  %v9319_v43 = vadd.f32 %v9251_v30, %v3610_v61 }
0x1014   :  { %7468 = vrsqrt.f32 %v3563_v22  ;;  %v9322_v34 = vadd.f32 %v9251_v30, %v3611_v60 }
0x1015   :  { %6974 = vmatprep.mubr.msk.bf16.mxu0 %vm120_vm0, %v3640_v62 }
0x1016   :  { %v3641_v47 = vpack.c.bf16 %v9322_v34, %v9319_v43 }
0x1018   :  { %v7463_v51 = vpop.eup %7462  ;;  %6975 = vmatmul.mubr.msk.bf16.gmra.mrb[60].mxu0 %vm120_vm0, %v3641_v47 }
0x1019   :  { %v3592_v42 = vmul.f32 %v7463_v51, %v9184_v27 }
0x101a   :  { %v7465_v53 = vpop.eup %7464 }
0x101b   :  { %v3593_v44 = vmul.f32 %v7465_v53, %v9192_v2  ;;  %v3612_v38 = vmul.f32 %v9245_v3, %v3592_v42 }
0x101c   :  { %v7467_v10 = vpop.eup %7466 }
0x101d   :  { %v3613_v18 = vmul.f32 %v9245_v3, %v3593_v44  ;;  %v3594_v12 = vmul.f32 %v7467_v10, %v9201_v14  ;;  %v9334_v19 = vadd.f32 %v9251_v30, %v3612_v38  ;;  %v9390_v10 = vrot.slane %v9016_v6, %v7993_v28 }
0x101e   :  { %v7469_v52 = vpop.eup %7468 }
0x101f   :  { %v9337_v49 = vadd.f32 %v9251_v30, %v3613_v18  ;;  %v3595_v23 = vmul.f32 %v7469_v52, %v9210_v7  ;;  %v3614_v27 = vmul.f32 %v9245_v3, %v3594_v12  ;;  %v3917_v7 = vrot.slane %v9016_v6, %v7996_v29 }
0x1021   :  { %v3642_v2 = vpack.c.bf16 %v9337_v49, %v9334_v19  ;;  %v3615_v0 = vmul.f32 %v9245_v3, %v3595_v23  ;;  %v9346_v14 = vadd.f32 %v9251_v30, %v3614_v27 }
0x1023   :  { %6978 = vmatprep.mubr.msk.bf16.mxu0 %vm120_vm0, %v3642_v2  ;;  %v9349_v40 = vadd.f32 %v9251_v30, %v3615_v0 }
0x1025   :  { %v3643_v48 = vpack.c.bf16 %v9349_v40, %v9346_v14 }
0x1027   :  { %6979 = vmatmul.mubr.msk.bf16.gmra.mrb[64].mxu0 %vm120_vm0, %v3643_v48 }
0x1028   :  { %7000 = vmatprep.mubr.msk.bf16.mxu0 %vm7812_vm4, %v10523_v4 }
0x1052   :  { %v9358_v3 = vpop.f32.mrb[60].mxu1 }
0x1053   :  { %v3920_v39 = vadd.f32 %v9358_v3, %v3917_v7  ;;  %v9361_v32 = vpop.f32.mrb[61].mxu1 }
0x1054   :  { %v3918_v30 = vadd.f32 %v3917_v7, %v9361_v32  ;;  %v9364_v8 = vpop.f32.mrb[62].mxu1 }
0x1055   :  { %v3952_v55 = vpack.c.bf16 %v3920_v39, %v3920_v39  ;;  %v9366_v41 = vpop.f32.mrb[63].mxu1  ;;  %v3921_v37 = vadd.f32 %v9364_v8, %v3917_v7 }
0x1056   :  { %v3950_v58 = vpack.c.bf16 %v3918_v30, %v3918_v30  ;;  %v3919_v46 = vadd.f32 %v3917_v7, %v9366_v41 }
0x1057   :  { %v4056_v61 = vsel %vm120_vm0, %v3952_v55, 0 }
0x1058   :  { %v3962_v22 = vsel %vm120_vm0, %v3950_v58, 0  ;;  %7011 = vmatpush3.bf16.xpose.msra.mxu1 %v4056_v61  ;;  %v3951_v39 = vpack.c.bf16 %v3919_v46, %v3919_v46 }
0x1059   :  { %6999 = vmatpush3.bf16.xpose.msra.mxu0 %v3962_v22  ;;  %7022 = vmatprep.subr.bf16.mxu1 %v10523_v4 }
0x105a   :  { %7004 = vmatprep.subr.bf16.mxu0 %v10523_v4  ;;  %v9374_v60 = vpop.f32.mrb[64].mxu1  ;;  %v4009_v55 = vsel %vm120_vm0, %v3951_v39, 0 }
0x105b   :  { %v9376_v62 = vpop.f32.mrb[65].mxu1  ;;  %v3924_v47 = vadd.f32 %v9374_v60, %v3917_v7 }
0x105c   :  { %v3922_v51 = vadd.f32 %v3917_v7, %v9376_v62  ;;  %v9380_v42 = vpop.f32.mrb[66].mxu1 }
0x105d   :  { %v9382_v53 = vpop.f32.mrb[67].mxu1  ;;  %v9386_v38 = vadd.f32 %v9380_v42, %v3917_v7 }
0x105e   :  { %v3923_v44 = vadd.f32 %v3917_v7, %v9382_v53  ;;  %v3954_v22 = vpack.c.bf16 %v3922_v51, %v3922_v51 }
0x10db   :  { %v6968_v18 = vpop.f32.mrb[52].mxu0 }
0x10dc   :  { %v3738_v12 = vpop.f32.mrb[53].mxu0  ;;  %v3747_v23 = vadd.f32 %v6968_v18, %v9390_v10 }
0x10dd   :  { %v6969_v52 = vpop.f32.mrb[54].mxu0  ;;  %v3739_v0 = vadd.f32 %v3738_v12, %v9390_v10 }
0x10de   :  { %v3750_v27 = vadd.f32 %v6969_v52, %v9390_v10  ;;  %v3741_v2 = vpop.f32.mrb[55].mxu0  ;;  %v3953_v52 = vpack.c.bf16 %v3921_v37, %v3921_v37  ;;  %v3955_v37 = vpack.c.bf16 %v3923_v44, %v3923_v44 }
0x10df   :  { %v3742_v48 = vadd.f32 %v3741_v2, %v9390_v10 }
0x10e0   :  { %v3943_v30 = vpack.c.bf16 %v3750_v27, %v3747_v23  ;;  %v4103_v39 = vsel %vm120_vm0, %v3953_v52, 0 }
0x10e1   :  { %v3942_v7 = vpack.c.bf16 %v3742_v48, %v3739_v0  ;;  %v4150_v48 = vsel %vm120_vm0, %v3954_v22, 0 }
0x10e3   :  { %v6972_v58 = vpop.f32.mrb[56].mxu0  ;;  %7001 = vmatmul.mubr.msk.bf16.vlgmr.msra.gmra.mrb[68].mxu0 %vm120_vm0, %v3942_v7 }
0x10e4   :  { %v3754_v6 = vpop.f32.mrb[57].mxu0  ;;  %7005 = vmatpush3.bf16.xpose.msra.mxu0 %v4009_v55  ;;  %7006 = vmatprep.mubr.msk.bf16.mxu0 %vm7812_vm4, %v10523_v4  ;;  %v3763_v18 = vadd.f32 %v6972_v58, %v9390_v10  ;;  %v3956_v58 = vpack.c.bf16 %v3924_v47, %v3924_v47  ;;  %v3957_v47 = vpack.c.bf16 %v9386_v38, %v9386_v38 }
0x10e5   :  { %v6973_v61 = vpop.f32.mrb[58].mxu0  ;;  %7016 = vmatprep.subr.bf16.mxu0 %v10523_v4  ;;  %v3755_v23 = vadd.f32 %v3754_v6, %v9390_v10 }
0x10e6   :  { %v3766_v46 = vadd.f32 %v6973_v61, %v9390_v10  ;;  %v3757_v12 = vpop.f32.mrb[59].mxu0  ;;  %v4244_v52 = vsel %vm120_vm0, %v3956_v58, 0 }
0x10e7   :  { %v3758_v27 = vadd.f32 %v3757_v12, %v9390_v10  ;;  %v4197_v12 = vsel %vm120_vm0, %v3955_v37, 0 }
0x10e8   :  { %v3945_v2 = vpack.c.bf16 %v3766_v46, %v3763_v18 }
0x10e9   :  { %v3944_v0 = vpack.c.bf16 %v3758_v27, %v3755_v23  ;;  %v4291_v27 = vsel %vm120_vm0, %v3957_v47, 0 }
0x10eb   :  { %v6976_v7 = vpop.f32.mrb[60].mxu0  ;;  %7007 = vmatmul.mubr.msk.bf16.vlgmr.msra.gmra.mrb[72].mxu0 %vm120_vm0, %v3943_v30  ;;  %7013 = vmatmul.mubr.msk.bf16.vlgmr.msra.gmra.mrb[68].mxu1 %vm120_vm0, %v3944_v0 }
0x10ec   :  { %v3770_v51 = vpop.f32.mrb[61].mxu0  ;;  %7017 = vmatpush3.bf16.xpose.msra.mxu0 %v4103_v39  ;;  %7023 = vmatpush3.bf16.xpose.msra.mxu1 %v4150_v48  ;;  %v3779_v6 = vadd.f32 %v6976_v7, %v9390_v10 }
0x10ed   :  { %v6977_v55 = vpop.f32.mrb[62].mxu0  ;;  %7018 = vmatprep.mubr.msk.bf16.mxu0 %vm7812_vm4, %v10523_v4  ;;  %7024 = vmatprep.mubr.msk.bf16.mxu1 %vm7812_vm4, %v10523_v4  ;;  %v3771_v30 = vadd.f32 %v3770_v51, %v9390_v10 }
0x10ee   :  { %v3782_v61 = vadd.f32 %v6977_v55, %v9390_v10  ;;  %v3773_v22 = vpop.f32.mrb[63].mxu0  ;;  %7028 = vmatprep.subr.bf16.mxu0 %v10523_v4  ;;  %7034 = vmatprep.subr.bf16.mxu1 %v10523_v4 }
0x10ef   :  { %v3774_v44 = vadd.f32 %v3773_v22, %v9390_v10 }
0x10f0   :  { %v3947_v18 = vpack.c.bf16 %v3782_v61, %v3779_v6 }
0x10f1   :  { %v3946_v46 = vpack.c.bf16 %v3774_v44, %v3771_v30 }
0x10f3   :  { %7019 = vmatmul.mubr.msk.bf16.vlgmr.msra.gmra.mrb[76].mxu0 %vm120_vm0, %v3945_v2  ;;  %7025 = vmatmul.mubr.msk.bf16.vlgmr.msra.gmra.mrb[72].mxu1 %vm120_vm0, %v3946_v46 }
0x10f4   :  { %7029 = vmatpush3.bf16.xpose.msra.mxu0 %v4197_v12  ;;  %7030 = vmatprep.mubr.msk.bf16.mxu0 %vm7812_vm4, %v10523_v4 }
0x10f5   :  { %7040 = vmatprep.subr.bf16.mxu0 %v10523_v4  ;;  %7035 = vmatpush3.bf16.xpose.msra.mxu1 %v4244_v52 }
0x10f6   :  { %7036 = vmatprep.mubr.msk.bf16.mxu1 %vm7812_vm4, %v10523_v4  ;;  %7046 = vmatprep.subr.bf16.mxu1 %v10523_v4 }
0x10fa   :  { %v6980_v23 = vpop.f32.mrb[64].mxu0 }
0x10fb   :  { %7031 = vmatmul.mubr.msk.bf16.vlgmr.msra.gmra.mrb[80].mxu0 %vm120_vm0, %v3947_v18  ;;  %v3786_v2 = vpop.f32.mrb[65].mxu0  ;;  %v3795_v48 = vadd.f32 %v6980_v23, %v9390_v10 }
0x10fc   :  { %7041 = vmatpush3.bf16.xpose.msra.mxu0 %v4291_v27  ;;  %v6981_v0 = vpop.f32.mrb[66].mxu0  ;;  %7042 = vmatprep.mubr.msk.bf16.mxu0 %vm7812_vm4, %v10523_v4  ;;  %v3787_v38 = vadd.f32 %v3786_v2, %v9390_v10 }
0x10fd   :  { %v3798_v39 = vadd.f32 %v6981_v0, %v9390_v10  ;;  %v3789_v7 = vpop.f32.mrb[67].mxu0  ;;  %7052 = vmatprep.subr.bf16.mxu0 %v10523_v4 }
0x10fe   :  { %v3790_v51 = vadd.f32 %v3789_v7, %v9390_v10 }
0x10ff   :  { %v3949_v55 = vpack.c.bf16 %v3798_v39, %v3795_v48 }
0x1100   :  { %v3948_v37 = vpack.c.bf16 %v3790_v51, %v3787_v38 }
0x1102   :  { %7037 = vmatmul.mubr.msk.bf16.vlgmr.msra.gmra.mrb[76].mxu1 %vm120_vm0, %v3948_v37 }
0x1103   :  { %7043 = vmatmul.mubr.msk.bf16.vlgmr.msra.gmra.mrb[84].mxu0 %vm120_vm0, %v3949_v55  ;;  %7048 = vmatprep.mubr.msk.bf16.mxu1 %vm7812_vm4, %v10523_v4 }
0x1104   :  { %7054 = vmatprep.mubr.msk.bf16.mxu0 %vm7812_vm4, %v10523_v4  ;;  %v9506_v4 = vpop.permute.xlu0 %3931 }
0x1105   :  { %v3939_v9 = vadd.f32 %v9506_v4, %v9382_v53 }
0x1107   :  { %v4524_v36 = vpack.c.bf16 %v3939_v9, %v3939_v9 }
0x11b6   :  { %v9446_v58 = vpop.f32.mrb[68].mxu0 }
0x11b7   :  { %v7002_v6 = vpop.f32.mrb[69].mxu0  ;;  %v4335_v61 = vsel %vm654_vm3, %v9446_v58, -inf }
0x11b8   :  { %4336 = vmax.xlane.f32.xlu0 %v4335_v61  ;;  %v9450_v10 = vpop.f32.mrb[70].mxu0 }
0x11b9   :  { %v7003_v22 = vpop.f32.mrb[71].mxu0  ;;  %v4338_v30 = vsel %vm654_vm3, %v9450_v10, -inf }
0x11ba   :  { %4339 = vmax.xlane.f32.xlu1 %v4338_v30 }
0x11be   :  { %v9454_v44 = vpop.f32.mrb[72].mxu0  ;;  %v9456_v18 = vpop.f32.mrb[68].mxu1 }
0x11bf   :  { %v7008_v46 = vpop.f32.mrb[73].mxu0  ;;  %v7014_v12 = vpop.f32.mrb[69].mxu1  ;;  %v4341_v52 = vsel %vm654_vm3, %v9454_v44, -inf  ;;  %v4347_v48 = vsel %vm654_vm3, %v9456_v18, -inf }
0x11c0   :  { %v9460_v47 = vpop.f32.mrb[70].mxu1  ;;  %4342 = vmax.xlane.f32.xlu0 %v4341_v52  ;;  %v9462_v23 = vpop.f32.mrb[74].mxu0 }
0x11c1   :  { %v7009_v27 = vpop.f32.mrb[75].mxu0  ;;  %v7015_v2 = vpop.f32.mrb[71].mxu1  ;;  %v4344_v0 = vsel %vm654_vm3, %v9462_v23, -inf  ;;  %v4350_v39 = vsel %vm654_vm3, %v9460_v47, -inf }
0x11c2   :  { %4345 = vmax.xlane.f32.xlu1 %v4344_v0 }
0x11c4   :  { %4348 = vmax.xlane.f32.xlu0 %v4347_v48 }
0x11c6   :  { %v9470_v7 = vpop.f32.mrb[72].mxu1  ;;  %4351 = vmax.xlane.f32.xlu1 %v4350_v39  ;;  %v9472_v38 = vpop.f32.mrb[76].mxu0 }
0x11c7   :  { %v7020_v51 = vpop.f32.mrb[77].mxu0  ;;  %v7026_v55 = vpop.f32.mrb[73].mxu1  ;;  %v4353_v37 = vsel %vm654_vm3, %v9472_v38, -inf  ;;  %v4359_v39 = vsel %vm654_vm3, %v9470_v7, -inf }
0x11c8   :  { %v9476_v6 = vpop.f32.mrb[74].mxu1  ;;  %4354 = vmax.xlane.f32.xlu0 %v4353_v37  ;;  %v9478_v61 = vpop.f32.mrb[78].mxu0 }
0x11c9   :  { %v7021_v22 = vpop.f32.mrb[79].mxu0  ;;  %v7027_v30 = vpop.f32.mrb[75].mxu1  ;;  %v4356_v46 = vsel %vm654_vm3, %v9478_v61, -inf  ;;  %v4362_v55 = vsel %vm654_vm3, %v9476_v6, -inf }
0x11ca   :  { %4357 = vmax.xlane.f32.xlu1 %v4356_v46 }
0x11ce   :  { %v9482_v12 = vpop.f32.mrb[80].mxu0 }
0x11cf   :  { %v7032_v52 = vpop.f32.mrb[81].mxu0  ;;  %v4365_v27 = vsel %vm654_vm3, %v9482_v12, -inf }
0x11d0   :  { %4366 = vmax.xlane.f32.xlu0 %v4365_v27  ;;  %v9486_v2 = vpop.f32.mrb[82].mxu0 }
0x11d1   :  { %v7033_v0 = vpop.f32.mrb[83].mxu0  ;;  %v4368_v48 = vsel %vm654_vm3, %v9486_v2, -inf }
0x11d2   :  { %4369 = vmax.xlane.f32.xlu1 %v4368_v48 }
0x11d4   :  { %4360 = vmax.xlane.f32.xlu0 %v4359_v39 }
0x11d5   :  { %v9492_v51 = vpop.f32.mrb[76].mxu1 }
0x11d6   :  { %4363 = vmax.xlane.f32.xlu1 %v4362_v55  ;;  %v9496_v37 = vpop.f32.mrb[84].mxu0  ;;  %v7038_v22 = vpop.f32.mrb[77].mxu1  ;;  %v4371_v39 = vsel %vm654_vm3, %v9492_v51, -inf  ;;  %v3935_v55 = vadd.f32 %v9506_v4, %v9366_v41 }
0x11d7   :  { %v7044_v30 = vpop.f32.mrb[85].mxu0  ;;  %v9498_v46 = vpop.f32.mrb[78].mxu1  ;;  %v4377_v52 = vsel %vm654_vm3, %v9496_v37, -inf }
0x11d8   :  { %4378 = vmax.xlane.f32.xlu0 %v4377_v52  ;;  %v9502_v27 = vpop.f32.mrb[86].mxu0  ;;  %v7039_v0 = vpop.f32.mrb[79].mxu1  ;;  %v4520_v22 = vpack.c.bf16 %v3935_v55, %v3935_v55  ;;  %v3936_v30 = vadd.f32 %v9358_v3, %v9506_v4  ;;  %v4374_v41 = vsel %vm654_vm3, %v9498_v46, -inf }
0x11d9   :  { %v7045_v48 = vpop.f32.mrb[87].mxu0  ;;  %v3937_v0 = vadd.f32 %v9364_v8, %v9506_v4  ;;  %v4380_v3 = vsel %vm654_vm3, %v9502_v27, -inf }
0x11da   :  { %v4521_v52 = vpack.c.bf16 %v3936_v30, %v3936_v30  ;;  %v3934_v48 = vadd.f32 %v9506_v4, %v9361_v32 }
0x11dc   :  { %4372 = vmax.xlane.f32.xlu0 %v4371_v39  ;;  %v4522_v39 = vpack.c.bf16 %v3937_v0, %v3937_v0  ;;  %v4519_v13 = vpack.c.bf16 %v3934_v48, %v3934_v48 }
0x11e7   :  { %4579 = vrot.lane.b32.xlu1 %v4520_v22, %s7810_s5 }
0x11eb   :  { %4629 = vrot.lane.b32.xlu1 %v4521_v52, %s7810_s5 }
0x11ef   :  { %4679 = vrot.lane.b32.xlu1 %v4522_v39, %s7810_s5 }
0x11f2   :  { %4528 = vrot.lane.b32.xlu0 %v4519_v13, %s7810_s5 }
0x1213   :  { %4381 = vmax.xlane.f32.xlu1 %v4380_v3 }
0x1217   :  { %4375 = vmax.xlane.f32.xlu1 %v4374_v41 }
0x1245   :  { %v4337_v8 = vpop.xlane.xlu0 %4336 }
0x1246   :  { %v4383_v55 = vsub.f32 %v9446_v58, %v4337_v8 }
0x1247   :  { %v4340_v22 = vpop.xlane.xlu1 %4339 }
0x1248   :  { %v4399_v30 = vmul.f32 1.442695, %v4383_v55  ;;  %v4384_v32 = vsub.f32 %v9450_v10, %v4340_v22 }
0x124a   :  { %7470 = vpow2.f32 %v4399_v30  ;;  %v4401_v52 = vmul.f32 1.442695, %v4384_v32 }
0x124c   :  { %7472 = vpow2.f32 %v4401_v52 }
0x124d   :  { %v4343_v0 = vpop.xlane.xlu0 %4342 }
0x124e   :  { %v4385_v13 = vsub.f32 %v9454_v44, %v4343_v0 }
0x124f   :  { %v4346_v48 = vpop.xlane.xlu1 %4345 }
0x1250   :  { %v4403_v39 = vmul.f32 1.442695, %v4385_v13  ;;  %v4386_v3 = vsub.f32 %v9462_v23, %v4346_v48 }
0x1251   :  { %v4349_v21 = vpop.xlane.xlu0 %4348 }
0x1252   :  { %7474 = vpow2.f32 %v4403_v39  ;;  %v4405_v41 = vmul.f32 1.442695, %v4386_v3  ;;  %v4387_v25 = vsub.f32 %v9456_v18, %v4349_v21 }
0x1253   :  { %v4352_v10 = vpop.xlane.xlu1 %4351 }
0x1254   :  { %v9529_v58 = vpop.eup %7470  ;;  %7476 = vpow2.f32 %v4405_v41  ;;  %v4407_v8 = vmul.f32 1.442695, %v4387_v25 }
0x1255   :  { %v4355_v55 = vpop.xlane.xlu0 %4354  ;;  %v4431_v22 = vsel %vm654_vm3, %v9529_v58, 0.0 }
0x1256   :  { %v9533_v30 = vpop.eup %7472  ;;  %v4389_v44 = vsub.f32 %v9472_v38, %v4355_v55  ;;  %4432 = vadd.xlane.f32.xlu1 %v4431_v22  ;;  %7478 = vpow2.f32 %v4407_v8 }
0x1257   :  { %v4434_v32 = vsel %vm654_vm3, %v9533_v30, 0.0  ;;  %v4358_v21 = vpop.xlane.xlu1 %4357 }
0x1258   :  { %v4411_v23 = vmul.f32 1.442695, %v4389_v44 }
0x125a   :  { %7480 = vpow2.f32 %v4411_v23  ;;  %4435 = vadd.xlane.f32.xlu1 %v4434_v32 }
0x125c   :  { %v9538_v18 = vpop.eup %7474 }
0x125d   :  { %v4367_v25 = vpop.xlane.xlu0 %4366  ;;  %v4437_v52 = vsel %vm654_vm3, %v9538_v18, 0.0 }
0x125e   :  { %v9542_v0 = vpop.eup %7476  ;;  %4438 = vadd.xlane.f32.xlu1 %v4437_v52  ;;  %v10573_v52 = vmov 0.0   ;;  %v4393_v9 = vsub.f32 %v9482_v12, %v4367_v25 }
0x125f   :  { %v4370_v13 = vpop.xlane.xlu1 %4369  ;;  %v4440_v48 = vsel %vm654_vm3, %v9542_v0, 0.0 }
0x1260   :  { %v9546_v39 = vpop.eup %7478  ;;  %v4394_v53 = vsub.f32 %v9486_v2, %v4370_v13 }
0x1261   :  { %v4361_v38 = vpop.xlane.xlu0 %4360  ;;  %v4443_v22 = vsel %vm654_vm3, %v9546_v39, 0.0 }
0x1262   :  { %4441 = vadd.xlane.f32.xlu1 %v4440_v48 }
0x1263   :  { %v4364_v3 = vpop.xlane.xlu1 %4363 }
0x1264   :  { %v9548_v41 = vpop.eup %7480 }
0x1265   :  { %v4379_v8 = vpop.xlane.xlu0 %4378  ;;  %v4449_v55 = vsel %vm654_vm3, %v9548_v41, 0.0 }
0x1266   :  { %4450 = vadd.xlane.f32.xlu0 %v4449_v55  ;;  %4444 = vadd.xlane.f32.xlu1 %v4443_v22  ;;  %v3938_v55 = vadd.f32 %v9506_v4, %v9376_v62  ;;  %v4419_v62 = vmul.f32 1.442695, %v4393_v9 }
0x1267   :  { %v4580_v44 = vpop.permute.xlu1 %4579 }
0x1268   :  { %v4585_v23 = vsel %vm762_vm2, %v4580_v44, 0  ;;  %v4523_v22 = vpack.c.bf16 %v3938_v55, %v3938_v55  ;;  %v4388_v44 = vsub.f32 %v9460_v47, %v4352_v10 }
0x1269   :  { %7053 = vmatpush3.bf16.msra.mxu0 %v4585_v23  ;;  %v4373_v32 = vpop.xlane.xlu0 %4372  ;;  %v4397_v23 = vsub.f32 %v9496_v37, %v4379_v8 }
0x126a   :  { %7064 = vmatprep.subr.bf16.mxu0 %v10573_v52  ;;  %v4395_v25 = vsub.f32 %v9492_v51, %v4373_v32 }
0x126b   :  { %v4427_v45 = vmul.f32 1.442695, %v4397_v23  ;;  %v9572_v37 = vpop.permute.xlu1 %4629 }
0x126d   :  { %v4529_v48 = vpop.permute.xlu0 %4528 }
0x126e   :  { %v4535_v63 = vsel %vm762_vm2, %v4529_v48, 0  ;;  %v4409_v48 = vmul.f32 1.442695, %v4388_v44 }
0x126f   :  { %7047 = vmatpush3.bf16.msra.mxu1 %v4535_v63  ;;  %v4390_v63 = vsub.f32 %v9478_v61, %v4358_v21  ;;  %v4421_v61 = vmul.f32 1.442695, %v4394_v53  ;;  %v4392_v21 = vsub.f32 %v9476_v6, %v4364_v3  ;;  %v9583_v12 = vpop.permute.xlu1 %4679  ;;  %v4423_v3 = vmul.f32 1.442695, %v4395_v25 }
0x1270   :  { %7058 = vmatprep.subr.bf16.mxu1 %v10573_v52  ;;  %7482 = vpow2.f32 %v4409_v48 }
0x1271   :  { %v4413_v11 = vmul.f32 1.442695, %v4390_v63  ;;  %7484 = vpow2.f32 %v4427_v45  ;;  %v4417_v2 = vmul.f32 1.442695, %v4392_v21 }
0x1273   :  { %7486 = vpow2.f32 %v4413_v11 }
0x1274   :  { %7488 = vpow2.f32 %v4419_v62 }
0x1277   :  { %4779 = vrot.lane.b32.xlu1 %v4524_v36, %s7810_s5  ;;  %v4391_v36 = vsub.f32 %v9470_v7, %v4361_v38 }
0x1279   :  { %v4415_v55 = vmul.f32 1.442695, %v4391_v36  ;;  %v3940_v36 = vadd.f32 %v9374_v60, %v9506_v4 }
0x127a   :  { %v9570_v47 = vpop.eup %7482 }
0x127b   :  { %v9574_v10 = vpop.eup %7484  ;;  %7490 = vpow2.f32 %v4415_v55  ;;  %v4446_v45 = vsel %vm654_vm3, %v9570_v47, 0.0  ;;  %v4525_v55 = vpack.c.bf16 %v3940_v36, %v3940_v36 }
0x127c   :  { %4729 = vrot.lane.b32.xlu0 %v4523_v22, %s7810_s5  ;;  %v4473_v11 = vsel %vm654_vm3, %v9574_v10, 0.0  ;;  %7492 = vpow2.f32 %v4421_v61 }
0x127d   :  { %v9581_v7 = vpop.eup %7486  ;;  %7494 = vpow2.f32 %v4417_v2  ;;  %v3941_v2 = vadd.f32 %v9380_v42, %v9506_v4  ;;  %v4635_v4 = vsel %vm762_vm2, %v9572_v37, 0 }
0x127e   :  { %v4452_v13 = vsel %vm654_vm3, %v9581_v7, 0.0  ;;  %v9588_v6 = vpop.eup %7488  ;;  %7496 = vpow2.f32 %v4423_v3 }
0x127f   :  { %v4461_v22 = vsel %vm654_vm3, %v9588_v6, 0.0  ;;  %v4526_v25 = vpack.c.bf16 %v3941_v2, %v3941_v2 }
0x1285   :  { %v9593_v44 = vpop.eup %7490 }
0x1286   :  { %v4455_v48 = vsel %vm654_vm3, %v9593_v44, 0.0  ;;  %v9598_v63 = vpop.eup %7492 }
0x1287   :  { %v9602_v62 = vpop.eup %7494 }
0x1288   :  { %v9608_v53 = vpop.eup %7496 }
0x1289   :  { %v4467_v61 = vsel %vm654_vm3, %v9608_v53, 0.0 }
0x129b   :  { %4474 = vadd.xlane.f32.xlu0 %v4473_v11  ;;  %4447 = vadd.xlane.f32.xlu1 %v4446_v45 }
0x129f   :  { %4453 = vadd.xlane.f32.xlu1 %v4452_v13 }
0x12a0   :  { %v4382_v38 = vpop.xlane.xlu1 %4381 }
0x12a1   :  { %v4398_v8 = vsub.f32 %v9502_v27, %v4382_v38  ;;  %v4464_v27 = vsel %vm654_vm3, %v9598_v63, 0.0 }
0x12a3   :  { %4462 = vadd.xlane.f32.xlu1 %v4461_v22  ;;  %v4429_v51 = vmul.f32 1.442695, %v4398_v8 }
0x12a4   :  { %v4376_v23 = vpop.xlane.xlu1 %4375 }
0x12a5   :  { %v4396_v32 = vsub.f32 %v9498_v46, %v4376_v23  ;;  %7498 = vpow2.f32 %v4429_v51  ;;  %v4458_v46 = vsel %vm654_vm3, %v9602_v62, 0.0 }
0x12a7   :  { %4456 = vadd.xlane.f32.xlu1 %v4455_v48  ;;  %v4425_v9 = vmul.f32 1.442695, %v4396_v32 }
0x12a9   :  { %7500 = vpow2.f32 %v4425_v9 }
0x12ab   :  { %4465 = vadd.xlane.f32.xlu1 %v4464_v27 }
0x12af   :  { %4459 = vadd.xlane.f32.xlu1 %v4458_v46  ;;  %v9613_v21 = vpop.eup %7498 }
0x12b0   :  { %v4476_v11 = vsel %vm654_vm3, %v9613_v21, 0.0 }
0x12b1   :  { %4829 = vrot.lane.b32.xlu0 %v4525_v55, %s7810_s5 }
0x12b3   :  { %4468 = vadd.xlane.f32.xlu1 %v4467_v61  ;;  %v9617_v60 = vpop.eup %7500 }
0x12b4   :  { %v4470_v45 = vsel %vm654_vm3, %v9617_v60, 0.0 }
0x12b7   :  { %4477 = vadd.xlane.f32.xlu1 %v4476_v11 }
0x12bb   :  { %4471 = vadd.xlane.f32.xlu1 %v4470_v45 }
0x12cc   :  { %4879 = vrot.lane.b32.xlu1 %v4526_v25, %s7810_s5 }
0x12e3   :  { %v4433_v13 = vpop.xlane.xlu1 %4432 }
0x12e4   :  { %7502 = vrcp.f32 %v4433_v13 }
0x12e7   :  { %v4436_v38 = vpop.xlane.xlu1 %4435 }
0x12e8   :  { %7504 = vrcp.f32 %v4436_v38 }
0x12eb   :  { %v4439_v3 = vpop.xlane.xlu1 %4438 }
0x12ec   :  { %7506 = vrcp.f32 %v4439_v3 }
0x12ee   :  { %v7503_v22 = vpop.eup %7502 }
0x12ef   :  { %v4442_v8 = vpop.xlane.xlu1 %4441  ;;  %v4495_v51 = vmul.f32 %v7503_v22, %v9529_v58 }
0x12f0   :  { %7508 = vrcp.f32 %v4442_v8 }
0x12f2   :  { %v7505_v23 = vpop.eup %7504 }
0x12f3   :  { %v4496_v32 = vmul.f32 %v7505_v23, %v9533_v30  ;;  %v4685_v30 = vsel %vm762_vm2, %v9583_v12, 0  ;;  %v4445_v37 = vpop.xlane.xlu1 %4444  ;;  %v4451_v55 = vpop.xlane.xlu0 %4450 }
0x12f4   :  { %7510 = vrcp.f32 %v4445_v37 }
0x12f5   :  { %v4511_v48 = vpack.c.bf16 %v4496_v32, %v4495_v51 }
0x12f6   :  { %v7507_v42 = vpop.eup %7506 }
0x12f7   :  { %7049 = vmatmul.mubr.msk.bf16.vlgmr.msra.gmra.mrb[80].mxu1 %vm654_vm3, %v4511_v48  ;;  %v4497_v27 = vmul.f32 %v7507_v42, %v9538_v18  ;;  %v4780_v46 = vpop.permute.xlu1 %4779  ;;  %v4730_v38 = vpop.permute.xlu0 %4729 }
0x12f8   :  { %7059 = vmatpush3.bf16.msra.mxu1 %v4635_v4  ;;  %7060 = vmatprep.mubr.msk.bf16.mxu1 %vm7812_vm4, %v10573_v52  ;;  %v4735_v32 = vsel %vm762_vm2, %v4730_v38, 0 }
0x12f9   :  { %7070 = vmatprep.subr.bf16.mxu1 %v10573_v52 }
0x12fa   :  { %v7509_v9 = vpop.eup %7508 }
0x12fb   :  { %v4498_v58 = vmul.f32 %v7509_v9, %v9542_v0 }
0x12fd   :  { %v4512_v36 = vpack.c.bf16 %v4498_v58, %v4497_v27 }
0x12fe   :  { %v7511_v11 = vpop.eup %7510 }
0x12ff   :  { %7055 = vmatmul.mubr.msk.bf16.vlgmr.msra.gmra.mrb[88].mxu0 %vm654_vm3, %v4512_v36  ;;  %v4499_v25 = vmul.f32 %v7511_v11, %v9546_v39  ;;  %v4785_v39 = vsel %vm762_vm2, %v4780_v46, 0 }
0x1300   :  { %7065 = vmatpush3.bf16.msra.mxu0 %v4685_v30  ;;  %7066 = vmatprep.mubr.msk.bf16.mxu0 %vm7812_vm4, %v10573_v52 }
0x1301   :  { %7076 = vmatprep.subr.bf16.mxu0 %v10573_v52 }
0x1328   :  { %v4448_v61 = vpop.xlane.xlu1 %4447 }
0x1329   :  { %7512 = vrcp.f32 %v4448_v61 }
0x132a   :  { %7514 = vrcp.f32 %v4451_v55 }
0x132c   :  { %v4454_v18 = vpop.xlane.xlu1 %4453 }
0x132d   :  { %7516 = vrcp.f32 %v4454_v18 }
0x1330   :  { %v4463_v0 = vpop.xlane.xlu1 %4462 }
0x1331   :  { %7518 = vrcp.f32 %v4463_v0 }
0x1333   :  { %v7513_v12 = vpop.eup %7512 }
0x1334   :  { %v4457_v45 = vpop.xlane.xlu1 %4456  ;;  %v7515_v2 = vpop.eup %7514  ;;  %v4500_v13 = vmul.f32 %v7513_v12, %v9570_v47 }
0x1335   :  { %v4501_v23 = vmul.f32 %v7515_v2, %v9548_v41  ;;  %v4475_v47 = vpop.xlane.xlu0 %4474 }
0x1336   :  { %v4513_v8 = vpack.c.bf16 %v4500_v13, %v4499_v25 }
0x1337   :  { %v7517_v3 = vpop.eup %7516 }
0x1338   :  { %v4466_v22 = vpop.xlane.xlu1 %4465  ;;  %v4502_v51 = vmul.f32 %v7517_v3, %v9581_v7  ;;  %7061 = vmatmul.mubr.msk.bf16.vlgmr.msra.gmra.mrb[84].mxu1 %vm654_vm3, %v4513_v8 }
0x1339   :  { %7520 = vrcp.f32 %v4466_v22  ;;  %7071 = vmatpush3.bf16.msra.mxu1 %v4735_v32  ;;  %7072 = vmatprep.mubr.msk.bf16.mxu1 %vm7812_vm4, %v10573_v52  ;;  %v4830_v18 = vpop.permute.xlu0 %4829 }
0x133a   :  { %v4514_v48 = vpack.c.bf16 %v4502_v51, %v4501_v23  ;;  %7522 = vrcp.f32 %v4457_v45  ;;  %7082 = vmatprep.subr.bf16.mxu1 %v10573_v52  ;;  %v4835_v0 = vsel %vm762_vm2, %v4830_v18, 0 }
0x133b   :  { %v7519_v4 = vpop.eup %7518 }
0x133c   :  { %7067 = vmatmul.mubr.msk.bf16.vlgmr.msra.gmra.mrb[92].mxu0 %vm654_vm3, %v4514_v48  ;;  %v4460_v41 = vpop.xlane.xlu1 %4459  ;;  %v4505_v27 = vmul.f32 %v7519_v4, %v9588_v6 }
0x133d   :  { %7077 = vmatpush3.bf16.msra.mxu0 %v4785_v39  ;;  %7524 = vrcp.f32 %v4460_v41  ;;  %7078 = vmatprep.mubr.msk.bf16.mxu0 %vm7812_vm4, %v10573_v52 }
0x133e   :  { %7088 = vmatprep.subr.bf16.mxu0 %v10573_v52  ;;  %7526 = vrcp.f32 %v4475_v47 }
0x1340   :  { %v4469_v7 = vpop.xlane.xlu1 %4468 }
0x1343   :  { %v7521_v42 = vpop.eup %7520 }
0x1344   :  { %v4478_v9 = vpop.xlane.xlu1 %4477  ;;  %v4506_v58 = vmul.f32 %v7521_v42, %v9598_v63  ;;  %v7523_v36 = vpop.eup %7522  ;;  %v7362_v63 = vld [vmem:[%s10517_s7 + $0x40] sm:$0xff]  }
0x1345   :  { %7528 = vrcp.f32 %v4478_v9  ;;  %v4503_v55 = vmul.f32 %v7523_v36, %v9593_v44 }
0x1346   :  { %v4516_v30 = vpack.c.bf16 %v4506_v58, %v4505_v27  ;;  %7530 = vrcp.f32 %v4469_v7 }
0x1347   :  { %v7525_v37 = vpop.eup %7524 }
0x1348   :  { %7079 = vmatmul.mubr.msk.bf16.vlgmr.msra.gmra.mrb[96].mxu0 %vm654_vm3, %v4516_v30  ;;  %v4472_v46 = vpop.xlane.xlu1 %4471  ;;  %v4504_v61 = vmul.f32 %v7525_v37, %v9602_v62  ;;  %v7527_v12 = vpop.eup %7526 }
0x1349   :  { %7532 = vrcp.f32 %v4472_v46  ;;  %7090 = vmatprep.mubr.msk.bf16.mxu0 %vm7812_vm4, %v10573_v52  ;;  %v4509_v45 = vmul.f32 %v7527_v12, %v9574_v10  ;;  %v7364_v10 = vld [vmem:[%s10517_s7 + $0x50] sm:$0xff]  }
0x134a   :  { %v4515_v6 = vpack.c.bf16 %v4504_v61, %v4503_v55 }
0x134c   :  { %7073 = vmatmul.mubr.msk.bf16.vlgmr.msra.gmra.mrb[88].mxu1 %vm654_vm3, %v4515_v6  ;;  %v4880_v11 = vpop.permute.xlu1 %4879 }
0x134d   :  { %7083 = vmatpush3.bf16.msra.mxu1 %v4835_v0  ;;  %v4885_v44 = vsel %vm762_vm2, %v4880_v11, 0  ;;  %7084 = vmatprep.mubr.msk.bf16.mxu1 %vm7812_vm4, %v10573_v52  ;;  %v7363_v52 = vld [vmem:[%s10517_s7 + $0x48] sm:$0xff]  }
0x134e   :  { %7089 = vmatpush3.bf16.msra.mxu0 %v4885_v44  ;;  %7094 = vmatprep.subr.bf16.mxu1 %v7362_v63 }
0x134f   :  { %v7529_v62 = vpop.eup %7528 }
0x1350   :  { %v4510_v2 = vmul.f32 %v7529_v62, %v9613_v21  ;;  %v7531_v25 = vpop.eup %7530 }
0x1351   :  { %v4507_v3 = vmul.f32 %v7531_v25, %v9608_v53  ;;  %v7365_v53 = vld [vmem:[%s10517_s7 + $0x58] sm:$0xff]  }
0x1352   :  { %v4518_v13 = vpack.c.bf16 %v4510_v2, %v4509_v45 }
0x1353   :  { %v7533_v38 = vpop.eup %7532 }
0x1354   :  { %7091 = vmatmul.mubr.msk.bf16.vlgmr.msra.gmra.mrb[100].mxu0 %vm654_vm3, %v4518_v13  ;;  %v4508_v8 = vmul.f32 %v7533_v38, %v9617_v60 }
0x1356   :  { %v4517_v22 = vpack.c.bf16 %v4508_v8, %v4507_v3 }
0x1358   :  { %7085 = vmatmul.mubr.msk.bf16.vlgmr.msra.gmra.mrb[92].mxu1 %vm654_vm3, %v4517_v22 }
0x1359   :  { %7095 = vmatpush3.bf16.msra.mxu1 %v7362_v63 }
0x135a   :  { %7096 = vmatprep.subr.bf16.mxu1 %v7363_v52 }
0x135d   :  { %7097 = vmatpush3.bf16.msra.mxu1 %v7363_v52 }
0x135e   :  { %7098 = vmatprep.subr.bf16.mxu1 %v7364_v10 }
0x1361   :  { %7099 = vmatpush3.bf16.msra.mxu1 %v7364_v10 }
0x1362   :  { %7100 = vmatprep.subr.bf16.mxu1 %v7365_v53 }
0x1365   :  { %7101 = vmatpush3.bf16.msra.mxu1 %v7365_v53 }
0x13ca   :  { %v4571_v21 = vpop.f32.mrb[80].mxu1 }
0x13cb   :  { %v7050_v60 = vpop.f32.mrb[81].mxu1 }
0x13cc   :  { %v4574_v23 = vpop.f32.mrb[82].mxu1 }
0x13cd   :  { %v4936_v51 = vpack.c.bf16 %v4574_v23, %v4571_v21  ;;  %v7051_v32 = vpop.f32.mrb[83].mxu1  ;;  %v7683_v21 = vld [vmem:[%s10518_s8] sm:$0xff] }
0x13ce   :  { %v9696_v60 = vrot.slane %v7683_v21, %v7987_v26 }
0x13cf   :  { %7102 = vmatprep.mubr.msk.bf16.mxu1 %vm120_vm0, %v4936_v51 }
0x13d2   :  { %v4621_v48 = vpop.f32.mrb[88].mxu0 }
0x13d3   :  { %v7056_v39 = vpop.f32.mrb[89].mxu0 }
0x13d4   :  { %v4624_v41 = vpop.f32.mrb[90].mxu0 }
0x13d5   :  { %v4937_v47 = vpack.c.bf16 %v4624_v41, %v4621_v48  ;;  %v7057_v7 = vpop.f32.mrb[91].mxu0 }
0x13d7   :  { %7103 = vmatmul.mubr.msk.bf16.vlgmr.msra.gmra.mrb[96].mxu1 %vm120_vm0, %v4937_v47 }
0x140b   :  { %v4671_v4 = vpop.f32.mrb[84].mxu1 }
0x140c   :  { %v7062_v42 = vpop.f32.mrb[85].mxu1 }
0x140d   :  { %v4674_v9 = vpop.f32.mrb[86].mxu1 }
0x140e   :  { %v4938_v27 = vpack.c.bf16 %v4674_v9, %v4671_v4  ;;  %v7063_v58 = vpop.f32.mrb[87].mxu1 }
0x140f   :  { %v4721_v36 = vpop.f32.mrb[92].mxu0 }
0x1410   :  { %v7068_v30 = vpop.f32.mrb[93].mxu0  ;;  %7106 = vmatprep.mubr.msk.bf16.mxu1 %vm120_vm0, %v4938_v27 }
0x1411   :  { %v4724_v37 = vpop.f32.mrb[94].mxu0 }
0x1412   :  { %v4939_v46 = vpack.c.bf16 %v4724_v37, %v4721_v36  ;;  %v7069_v55 = vpop.f32.mrb[95].mxu0 }
0x1414   :  { %7107 = vmatmul.mubr.msk.bf16.gmra.mrb[100].mxu1 %vm120_vm0, %v4939_v46 }
0x141b   :  { %v4821_v61 = vpop.f32.mrb[96].mxu0 }
0x141c   :  { %v7080_v18 = vpop.f32.mrb[97].mxu0 }
0x141d   :  { %v4824_v6 = vpop.f32.mrb[98].mxu0 }
0x141e   :  { %v4941_v63 = vpack.c.bf16 %v4824_v6, %v4821_v61  ;;  %v7081_v0 = vpop.f32.mrb[99].mxu0 }
0x141f   :  { %v4771_v11 = vpop.f32.mrb[88].mxu1 }
0x1420   :  { %v7074_v12 = vpop.f32.mrb[89].mxu1 }
0x1421   :  { %v4774_v44 = vpop.f32.mrb[90].mxu1 }
0x1422   :  { %v4940_v62 = vpack.c.bf16 %v4774_v44, %v4771_v11  ;;  %v7075_v45 = vpop.f32.mrb[91].mxu1 }
0x1424   :  { %7110 = vmatprep.mubr.msk.bf16.mxu1 %vm120_vm0, %v4940_v62 }
0x1425   :  { %7111 = vmatmul.mubr.msk.bf16.gmra.mrb[104].mxu1 %vm120_vm0, %v4941_v63 }
0x1427   :  { %v4921_v2 = vpop.f32.mrb[100].mxu0 }
0x1428   :  { %v7092_v25 = vpop.f32.mrb[101].mxu0 }
0x1429   :  { %v4924_v13 = vpop.f32.mrb[102].mxu0 }
0x142a   :  { %v4943_v38 = vpack.c.bf16 %v4924_v13, %v4921_v2  ;;  %v7093_v3 = vpop.f32.mrb[103].mxu0 }
0x142b   :  { %v4871_v8 = vpop.f32.mrb[92].mxu1 }
0x142c   :  { %v7086_v22 = vpop.f32.mrb[93].mxu1 }
0x142d   :  { %v4874_v52 = vpop.f32.mrb[94].mxu1 }
0x142e   :  { %v4942_v10 = vpack.c.bf16 %v4874_v52, %v4871_v8  ;;  %v7087_v53 = vpop.f32.mrb[95].mxu1 }
0x1430   :  { %7114 = vmatprep.mubr.msk.bf16.mxu1 %vm120_vm0, %v4942_v10 }
0x1431   :  { %7115 = vmatmul.mubr.msk.bf16.gmra.mrb[108].mxu1 %vm120_vm0, %v4943_v38 }
0x14aa   :  { %v7104_v23 = vpop.f32.mrb[96].mxu1 }
0x14ab   :  { %v5030_v51 = vpop.f32.mrb[97].mxu1  ;;  %v5039_v32 = vadd.f32 %v7104_v23, %v9696_v60 }
0x14ac   :  { %v5031_v48 = vadd.f32 %v5030_v51, %v9696_v60  ;;  %v7105_v39 = vpop.f32.mrb[98].mxu1 }
0x14ad   :  { %v5033_v41 = vpop.f32.mrb[99].mxu1  ;;  %v9705_v4 = vadd.f32 %v5039_v32, %v9269_v5  ;;  %v5042_v42 = vadd.f32 %v7105_v39, %v9696_v60 }
0x14ae   :  { %v9701_v47 = vadd.f32 %v5031_v48, %v9256_v33  ;;  %v5034_v7 = vadd.f32 %v5033_v41, %v9696_v60 }
0x14af   :  { %v9716_v33 = vadd.f32 %v5042_v42, %v9272_v17  ;;  %v5115_v5 = vsel %vm120_vm0, %v9705_v4, 0.0 }
0x14b0   :  { %v9709_v9 = vadd.f32 %v5034_v7, %v9259_v24  ;;  %v5109_v27 = vsel %vm120_vm0, %v9701_v47, 0.0 }
0x14b1   :  { %5110 = vadd.xlane.f32.xlu0 %v5109_v27  ;;  %v5118_v36 = vsel %vm120_vm0, %v9716_v33, 0.0 }
0x14b2   :  { %v5112_v58 = vsel %vm120_vm0, %v9709_v9, 0.0 }
0x14b3   :  { %5113 = vadd.xlane.f32.xlu1 %v5112_v58 }
0x14b5   :  { %5116 = vadd.xlane.f32.xlu0 %v5115_v5 }
0x14b9   :  { %5119 = vadd.xlane.f32.xlu0 %v5118_v36 }
0x14e7   :  { %v7108_v24 = vpop.f32.mrb[100].mxu1 }
0x14e8   :  { %v5046_v30 = vpop.f32.mrb[101].mxu1  ;;  %v5055_v37 = vadd.f32 %v7108_v24, %v9696_v60 }
0x14e9   :  { %v5047_v46 = vadd.f32 %v5046_v30, %v9696_v60  ;;  %v7109_v55 = vpop.f32.mrb[102].mxu1 }
0x14ea   :  { %v5049_v61 = vpop.f32.mrb[103].mxu1  ;;  %v5058_v17 = vadd.f32 %v7109_v55, %v9696_v60  ;;  %v9730_v63 = vadd.f32 %v5055_v37, %v9293_v54 }
0x14eb   :  { %v9725_v18 = vadd.f32 %v5047_v46, %v9282_v50  ;;  %v5050_v6 = vadd.f32 %v5049_v61, %v9696_v60 }
0x14ec   :  { %v9738_v12 = vadd.f32 %v5058_v17, %v9298_v59  ;;  %v5127_v44 = vsel %vm120_vm0, %v9730_v63, 0.0 }
0x14ed   :  { %v9733_v0 = vadd.f32 %v5050_v6, %v9285_v1  ;;  %v5121_v11 = vsel %vm120_vm0, %v9725_v18, 0.0 }
0x14ee   :  { %5122 = vadd.xlane.f32.xlu0 %v5121_v11  ;;  %v5130_v54 = vsel %vm120_vm0, %v9738_v12, 0.0 }
0x14ef   :  { %v5124_v50 = vsel %vm120_vm0, %v9733_v0, 0.0 }
0x14f0   :  { %5125 = vadd.xlane.f32.xlu1 %v5124_v50 }
0x14f2   :  { %5128 = vadd.xlane.f32.xlu0 %v5127_v44 }
0x14f4   :  { %5131 = vadd.xlane.f32.xlu1 %v5130_v54 }
0x14f8   :  { %v7112_v1 = vpop.f32.mrb[104].mxu1 }
0x14f9   :  { %v5062_v62 = vpop.f32.mrb[105].mxu1  ;;  %v5071_v45 = vadd.f32 %v7112_v1, %v9696_v60 }
0x14fa   :  { %v5063_v2 = vadd.f32 %v5062_v62, %v9696_v60  ;;  %v7113_v59 = vpop.f32.mrb[106].mxu1  ;;  %v7366_v62 = vld [vmem:[%s10517_s7 + $0x60] sm:$0xff]  }
0x14fb   :  { %v5065_v25 = vpop.f32.mrb[107].mxu1  ;;  %v5074_v38 = vadd.f32 %v7113_v59, %v9696_v60  ;;  %v9754_v8 = vadd.f32 %v5071_v45, %v9319_v43  ;;  %7118 = vmatprep.subr.bf16.mxu0 %v7366_v62  ;;  %v7368_v45 = vld [vmem:[%s10517_s7 + $0x70] sm:$0xff]  }
0x14fc   :  { %v9749_v13 = vadd.f32 %v5063_v2, %v9309_v15  ;;  %v5066_v3 = vadd.f32 %v5065_v25, %v9696_v60  ;;  %7119 = vmatpush3.bf16.msra.mxu0 %v7366_v62  ;;  %v7369_v2 = vld [vmem:[%s10517_s7 + $0x78] sm:$0xff]  }
0x14fd   :  { %v9762_v10 = vadd.f32 %v5074_v38, %v9322_v34  ;;  %v5139_v53 = vsel %vm120_vm0, %v9754_v8, 0.0 }
0x14fe   :  { %v9757_v22 = vadd.f32 %v5066_v3, %v9312_v31  ;;  %v5133_v52 = vsel %vm120_vm0, %v9749_v13, 0.0 }
0x14ff   :  { %5134 = vadd.xlane.f32.xlu0 %v5133_v52  ;;  %v5142_v31 = vsel %vm120_vm0, %v9762_v10, 0.0 }
0x1500   :  { %v5136_v15 = vsel %vm120_vm0, %v9757_v22, 0.0 }
0x1501   :  { %5137 = vadd.xlane.f32.xlu1 %v5136_v15 }
0x1503   :  { %5140 = vadd.xlane.f32.xlu0 %v5139_v53 }
0x1504   :  { %v7116_v43 = vpop.f32.mrb[108].mxu1 }
0x1505   :  { %5143 = vadd.xlane.f32.xlu1 %v5142_v31  ;;  %v5078_v21 = vpop.f32.mrb[109].mxu1  ;;  %v5087_v23 = vadd.f32 %v7116_v43, %v9696_v60 }
0x1506   :  { %v5079_v51 = vadd.f32 %v5078_v21, %v9696_v60  ;;  %v7117_v34 = vpop.f32.mrb[110].mxu1 }
0x1507   :  { %v5081_v32 = vpop.f32.mrb[111].mxu1  ;;  %v5090_v39 = vadd.f32 %v7117_v34, %v9696_v60  ;;  %v9778_v7 = vadd.f32 %v5087_v23, %v9346_v14 }
0x1508   :  { %v9773_v48 = vadd.f32 %v5079_v51, %v9334_v19  ;;  %v5082_v41 = vadd.f32 %v5081_v32, %v9696_v60 }
0x1509   :  { %v9786_v58 = vadd.f32 %v5090_v39, %v9349_v40  ;;  %v5151_v60 = vsel %vm120_vm0, %v9778_v7, 0.0 }
0x150a   :  { %v9781_v42 = vadd.f32 %v5082_v41, %v9337_v49  ;;  %v5145_v27 = vsel %vm120_vm0, %v9773_v48, 0.0 }
0x150b   :  { %5146 = vadd.xlane.f32.xlu0 %v5145_v27  ;;  %v5154_v14 = vsel %vm120_vm0, %v9786_v58, 0.0 }
0x150c   :  { %v5148_v19 = vsel %vm120_vm0, %v9781_v42, 0.0 }
0x150d   :  { %5149 = vadd.xlane.f32.xlu1 %v5148_v19 }
0x150f   :  { %5152 = vadd.xlane.f32.xlu0 %v5151_v60 }
0x1511   :  { %5155 = vadd.xlane.f32.xlu1 %v5154_v14 }
0x153e   :  { %v5111_v49 = vpop.xlane.xlu0 %5110 }
0x153f   :  { %v5157_v5 = vmul.f32 0.015625, %v5111_v49 }
0x1540   :  { %v5114_v36 = vpop.xlane.xlu1 %5113 }
0x1541   :  { %v9795_v24 = vsub.f32 %v9701_v47, %v5157_v5  ;;  %v5158_v40 = vmul.f32 0.015625, %v5114_v36 }
0x1542   :  { %v5117_v30 = vpop.xlane.xlu0 %5116 }
0x1543   :  { %v9798_v37 = vsub.f32 %v9709_v9, %v5158_v40  ;;  %v5159_v46 = vmul.f32 0.015625, %v5117_v30  ;;  %v5189_v55 = vmul.f32 %v9795_v24, %v9795_v24 }
0x1545   :  { %v9803_v61 = vsub.f32 %v9705_v4, %v5159_v46  ;;  %v5205_v17 = vsel %vm120_vm0, %v5189_v55, 0.0  ;;  %v5190_v6 = vmul.f32 %v9798_v37, %v9798_v37 }
0x1546   :  { %v5120_v11 = vpop.xlane.xlu0 %5119  ;;  %5206 = vadd.xlane.f32.xlu0 %v5205_v17 }
0x1547   :  { %v5160_v47 = vmul.f32 0.015625, %v5120_v11  ;;  %v5208_v50 = vsel %vm120_vm0, %v5190_v6, 0.0  ;;  %v5191_v9 = vmul.f32 %v9803_v61, %v9803_v61 }
0x1548   :  { %5209 = vadd.xlane.f32.xlu1 %v5208_v50 }
0x1549   :  { %v9812_v44 = vsub.f32 %v9716_v33, %v5160_v47  ;;  %v5211_v4 = vsel %vm120_vm0, %v5191_v9, 0.0  ;;  %v7367_v33 = vld [vmem:[%s10517_s7 + $0x68] sm:$0xff]  }
0x154a   :  { %5212 = vadd.xlane.f32.xlu0 %v5211_v4  ;;  %7120 = vmatprep.subr.bf16.mxu0 %v7367_v33 }
0x154b   :  { %v5192_v54 = vmul.f32 %v9812_v44, %v9812_v44  ;;  %7121 = vmatpush3.bf16.msra.mxu0 %v7367_v33 }
0x154c   :  { %7122 = vmatprep.subr.bf16.mxu0 %v7368_v45 }
0x154d   :  { %v5214_v1 = vsel %vm120_vm0, %v5192_v54, 0.0 }
0x154e   :  { %5215 = vadd.xlane.f32.xlu1 %v5214_v1 }
0x154f   :  { %7123 = vmatpush3.bf16.msra.mxu0 %v7368_v45 }
0x1550   :  { %7124 = vmatprep.subr.bf16.mxu0 %v7369_v2 }
0x1553   :  { %7125 = vmatpush3.bf16.msra.mxu0 %v7369_v2 }
0x157b   :  { %v5123_v59 = vpop.xlane.xlu0 %5122 }
0x157c   :  { %v5161_v25 = vmul.f32 0.015625, %v5123_v59 }
0x157d   :  { %v5126_v38 = vpop.xlane.xlu1 %5125 }
0x157e   :  { %v9831_v3 = vsub.f32 %v9725_v18, %v5161_v25  ;;  %v5162_v52 = vmul.f32 0.015625, %v5126_v38 }
0x157f   :  { %v5129_v15 = vpop.xlane.xlu0 %5128 }
0x1580   :  { %v9834_v53 = vsub.f32 %v9733_v0, %v5162_v52  ;;  %v5163_v43 = vmul.f32 0.015625, %v5129_v15  ;;  %v5193_v31 = vmul.f32 %v9831_v3, %v9831_v3 }
0x1581   :  { %v5132_v21 = vpop.xlane.xlu1 %5131 }
0x1582   :  { %v9839_v23 = vsub.f32 %v9730_v63, %v5163_v43  ;;  %v5164_v51 = vmul.f32 0.015625, %v5132_v21  ;;  %v5217_v34 = vsel %vm120_vm0, %v5193_v31, 0.0  ;;  %v5194_v18 = vmul.f32 %v9834_v53, %v9834_v53 }
0x1583   :  { %5218 = vadd.xlane.f32.xlu0 %v5217_v34  ;;  %v7371_v34 = vld [vmem:[%s10517_s7 + $0x88] sm:$0xff]  }
0x1584   :  { %v9845_v32 = vsub.f32 %v9738_v12, %v5164_v51  ;;  %v5220_v0 = vsel %vm120_vm0, %v5194_v18, 0.0  ;;  %v5195_v39 = vmul.f32 %v9839_v23, %v9839_v23 }
0x1585   :  { %5221 = vadd.xlane.f32.xlu1 %v5220_v0 }
0x1586   :  { %v5223_v41 = vsel %vm120_vm0, %v5195_v39, 0.0  ;;  %v5196_v63 = vmul.f32 %v9845_v32, %v9845_v32 }
0x1587   :  { %5224 = vadd.xlane.f32.xlu0 %v5223_v41 }
0x1588   :  { %v5226_v27 = vsel %vm120_vm0, %v5196_v63, 0.0 }
0x1589   :  { %5227 = vadd.xlane.f32.xlu1 %v5226_v27 }
0x158c   :  { %v5135_v19 = vpop.xlane.xlu0 %5134 }
0x158d   :  { %v5165_v60 = vmul.f32 0.015625, %v5135_v19 }
0x158e   :  { %v5138_v14 = vpop.xlane.xlu1 %5137 }
0x158f   :  { %v9855_v12 = vsub.f32 %v9749_v13, %v5165_v60  ;;  %v5166_v49 = vmul.f32 0.015625, %v5138_v14 }
0x1590   :  { %v5141_v5 = vpop.xlane.xlu0 %5140 }
0x1591   :  { %v9858_v36 = vsub.f32 %v9757_v22, %v5166_v49  ;;  %v5167_v40 = vmul.f32 0.015625, %v5141_v5  ;;  %v5197_v30 = vmul.f32 %v9855_v12, %v9855_v12 }
0x1592   :  { %v5144_v46 = vpop.xlane.xlu1 %5143 }
0x1593   :  { %v9863_v55 = vsub.f32 %v9754_v8, %v5167_v40  ;;  %v5168_v17 = vmul.f32 0.015625, %v5144_v46  ;;  %v5229_v6 = vsel %vm120_vm0, %v5197_v30, 0.0  ;;  %v5198_v13 = vmul.f32 %v9858_v36, %v9858_v36  ;;  %v9911_v30 = vld [vmem:[%s10518_s8 + $0x8] sm:$0xff] }
0x1594   :  { %5230 = vadd.xlane.f32.xlu0 %v5229_v6  ;;  %v9915_v46 = vrot.slane %v9911_v30, %v7993_v28 }
0x1595   :  { %v9869_v11 = vsub.f32 %v9762_v10, %v5168_v17  ;;  %v5232_v22 = vsel %vm120_vm0, %v5198_v13, 0.0  ;;  %v5199_v47 = vmul.f32 %v9863_v55, %v9863_v55 }
0x1596   :  { %5233 = vadd.xlane.f32.xlu1 %v5232_v22 }
0x1597   :  { %v5235_v50 = vsel %vm120_vm0, %v5199_v47, 0.0  ;;  %v5200_v8 = vmul.f32 %v9869_v11, %v9869_v11 }
0x1598   :  { %5236 = vadd.xlane.f32.xlu0 %v5235_v50  ;;  %v5147_v9 = vpop.xlane.xlu0 %5146  ;;  %v9922_v50 = vrot.slane %v9911_v30, %v7996_v29 }
0x1599   :  { %v5169_v4 = vmul.f32 0.015625, %v5147_v9  ;;  %v5238_v54 = vsel %vm120_vm0, %v5200_v8, 0.0 }
0x159a   :  { %5239 = vadd.xlane.f32.xlu1 %v5238_v54  ;;  %v5150_v1 = vpop.xlane.xlu1 %5149 }
0x159b   :  { %v9879_v10 = vsub.f32 %v9773_v48, %v5169_v4  ;;  %v5170_v62 = vmul.f32 0.015625, %v5150_v1 }
0x159c   :  { %v5153_v33 = vpop.xlane.xlu0 %5152 }
0x159d   :  { %v9882_v45 = vsub.f32 %v9781_v42, %v5170_v62  ;;  %v5171_v2 = vmul.f32 0.015625, %v5153_v33  ;;  %v5201_v59 = vmul.f32 %v9879_v10, %v9879_v10 }
0x159e   :  { %v5156_v25 = vpop.xlane.xlu1 %5155 }
0x159f   :  { %v9887_v38 = vsub.f32 %v9778_v7, %v5171_v2  ;;  %v5172_v52 = vmul.f32 0.015625, %v5156_v25  ;;  %v5241_v15 = vsel %vm120_vm0, %v5201_v59, 0.0  ;;  %v5202_v48 = vmul.f32 %v9882_v45, %v9882_v45 }
0x15a0   :  { %5242 = vadd.xlane.f32.xlu0 %v5241_v15 }
0x15a1   :  { %v9893_v43 = vsub.f32 %v9786_v58, %v5172_v52  ;;  %v5244_v42 = vsel %vm120_vm0, %v5202_v48, 0.0  ;;  %v5203_v31 = vmul.f32 %v9887_v38, %v9887_v38  ;;  %v7370_v58 = vld [vmem:[%s10517_s7 + $0x80] sm:$0xff]  }
0x15a2   :  { %5245 = vadd.xlane.f32.xlu1 %v5244_v42  ;;  %7142 = vmatprep.subr.bf16.mxu1 %v7370_v58 }
0x15a3   :  { %v5247_v21 = vsel %vm120_vm0, %v5203_v31, 0.0  ;;  %v5204_v7 = vmul.f32 %v9893_v43, %v9893_v43  ;;  %7143 = vmatpush3.bf16.msra.mxu1 %v7370_v58 }
0x15a4   :  { %5248 = vadd.xlane.f32.xlu0 %v5247_v21  ;;  %7144 = vmatprep.subr.bf16.mxu1 %v7371_v34 }
0x15a5   :  { %v5250_v51 = vsel %vm120_vm0, %v5204_v7, 0.0 }
0x15a6   :  { %5251 = vadd.xlane.f32.xlu1 %v5250_v51 }
0x15a7   :  { %7145 = vmatpush3.bf16.msra.mxu1 %v7371_v34 }
0x15d3   :  { %v5207_v18 = vpop.xlane.xlu0 %5206 }
0x15d4   :  { %v5253_v0 = vmul.f32 0.015625, %v5207_v18 }
0x15d5   :  { %v5210_v39 = vpop.xlane.xlu1 %5209 }
0x15d6   :  { %v5269_v41 = vadd.f32 1e-05, %v5253_v0  ;;  %v5254_v63 = vmul.f32 0.015625, %v5210_v39 }
0x15d7   :  { %v5213_v27 = vpop.xlane.xlu0 %5212 }
0x15d8   :  { %7534 = vrsqrt.f32 %v5269_v41  ;;  %v5270_v19 = vadd.f32 1e-05, %v5254_v63  ;;  %v5255_v60 = vmul.f32 0.015625, %v5213_v27 }
0x15da   :  { %7536 = vrsqrt.f32 %v5270_v19  ;;  %v5271_v14 = vadd.f32 1e-05, %v5255_v60 }
0x15db   :  { %v5216_v49 = vpop.xlane.xlu1 %5215 }
0x15dc   :  { %7538 = vrsqrt.f32 %v5271_v14  ;;  %v5256_v5 = vmul.f32 0.015625, %v5216_v49 }
0x15de   :  { %v5272_v40 = vadd.f32 1e-05, %v5256_v5 }
0x15e0   :  { %7540 = vrsqrt.f32 %v5272_v40 }
0x15e2   :  { %v7535_v17 = vpop.eup %7534 }
0x15e3   :  { %v5301_v6 = vmul.f32 %v7535_v17, %v9795_v24 }
0x15e4   :  { %v7537_v13 = vpop.eup %7536 }
0x15e5   :  { %v5302_v22 = vmul.f32 %v7537_v13, %v9798_v37  ;;  %v5321_v47 = vmul.f32 %v9915_v46, %v5301_v6 }
0x15e6   :  { %v7539_v8 = vpop.eup %7538 }
0x15e7   :  { %v5303_v9 = vmul.f32 %v7539_v8, %v9803_v61  ;;  %v5322_v4 = vmul.f32 %v9915_v46, %v5302_v22  ;;  %v9927_v28 = vadd.f32 %v9922_v50, %v5321_v47 }
0x15e9   :  { %v9930_v54 = vadd.f32 %v9922_v50, %v5322_v4  ;;  %v5323_v29 = vmul.f32 %v9915_v46, %v5303_v9 }
0x15ea   :  { %v7541_v24 = vpop.eup %7540 }
0x15eb   :  { %v5304_v37 = vmul.f32 %v7541_v24, %v9812_v44  ;;  %v5365_v1 = vpack.c.bf16 %v9930_v54, %v9927_v28  ;;  %v9939_v62 = vadd.f32 %v9922_v50, %v5323_v29 }
0x15ed   :  { %7126 = vmatprep.mubr.msk.bf16.mxu0 %vm120_vm0, %v5365_v1  ;;  %v5324_v61 = vmul.f32 %v9915_v46, %v5304_v37 }
0x15ef   :  { %v9942_v33 = vadd.f32 %v9922_v50, %v5324_v61 }
0x15f1   :  { %v5366_v2 = vpack.c.bf16 %v9942_v33, %v9939_v62 }
0x15f3   :  { %7127 = vmatmul.mubr.msk.bf16.vlgmr.msra.gmra.mrb[104].mxu0 %vm120_vm0, %v5366_v2 }
0x1610   :  { %v5219_v44 = vpop.xlane.xlu0 %5218 }
0x1611   :  { %v5257_v59 = vmul.f32 0.015625, %v5219_v44 }
0x1612   :  { %v5222_v25 = vpop.xlane.xlu1 %5221 }
0x1613   :  { %v5273_v52 = vadd.f32 1e-05, %v5257_v59  ;;  %v5258_v15 = vmul.f32 0.015625, %v5222_v25 }
0x1614   :  { %v5225_v48 = vpop.xlane.xlu0 %5224 }
0x1615   :  { %7542 = vrsqrt.f32 %v5273_v52  ;;  %v5274_v42 = vadd.f32 1e-05, %v5258_v15  ;;  %v5259_v31 = vmul.f32 0.015625, %v5225_v48 }
0x1616   :  { %v5228_v21 = vpop.xlane.xlu1 %5227 }
0x1617   :  { %7544 = vrsqrt.f32 %v5274_v42  ;;  %v5275_v7 = vadd.f32 1e-05, %v5259_v31  ;;  %v5260_v51 = vmul.f32 0.015625, %v5228_v21 }
0x1619   :  { %7546 = vrsqrt.f32 %v5275_v7  ;;  %v5276_v58 = vadd.f32 1e-05, %v5260_v51 }
0x161b   :  { %7548 = vrsqrt.f32 %v5276_v58 }
0x161f   :  { %v7543_v34 = vpop.eup %7542 }
0x1620   :  { %v5305_v18 = vmul.f32 %v7543_v34, %v9831_v3 }
0x1621   :  { %v7545_v0 = vpop.eup %7544  ;;  %v5231_v39 = vpop.xlane.xlu0 %5230 }
0x1622   :  { %v5261_v41 = vmul.f32 0.015625, %v5231_v39  ;;  %v5306_v63 = vmul.f32 %v7545_v0, %v9834_v53  ;;  %v5325_v27 = vmul.f32 %v9915_v46, %v5305_v18 }
0x1623   :  { %v7547_v19 = vpop.eup %7546  ;;  %v5234_v60 = vpop.xlane.xlu1 %5233 }
0x1624   :  { %v5277_v14 = vadd.f32 1e-05, %v5261_v41  ;;  %v5262_v49 = vmul.f32 0.015625, %v5234_v60  ;;  %v5326_v5 = vmul.f32 %v9915_v46, %v5306_v63  ;;  %v9952_v6 = vadd.f32 %v9922_v50, %v5325_v27 }
0x1625   :  { %v7549_v40 = vpop.eup %7548  ;;  %v5237_v17 = vpop.xlane.xlu0 %5236  ;;  %v5307_v3 = vmul.f32 %v7547_v19, %v9839_v23 }
0x1626   :  { %7550 = vrsqrt.f32 %v5277_v14  ;;  %v5278_v13 = vadd.f32 1e-05, %v5262_v49  ;;  %v5263_v22 = vmul.f32 0.015625, %v5237_v17  ;;  %v9956_v53 = vadd.f32 %v9922_v50, %v5326_v5 }
0x1627   :  { %v5240_v47 = vpop.xlane.xlu1 %5239  ;;  %v5308_v8 = vmul.f32 %v7549_v40, %v9845_v32  ;;  %v5327_v9 = vmul.f32 %v9915_v46, %v5307_v3 }
0x1628   :  { %7552 = vrsqrt.f32 %v5278_v13  ;;  %v5279_v4 = vadd.f32 1e-05, %v5263_v22  ;;  %v5264_v24 = vmul.f32 0.015625, %v5240_v47  ;;  %v5367_v37 = vpack.c.bf16 %v9956_v53, %v9952_v6 }
0x1629   :  { %v5328_v1 = vmul.f32 %v9915_v46, %v5308_v8  ;;  %v9965_v29 = vadd.f32 %v9922_v50, %v5327_v9 }
0x162a   :  { %7554 = vrsqrt.f32 %v5279_v4  ;;  %v5280_v23 = vadd.f32 1e-05, %v5264_v24  ;;  %7130 = vmatprep.mubr.msk.bf16.mxu0 %vm120_vm0, %v5367_v37 }
0x162b   :  { %v9968_v61 = vadd.f32 %v9922_v50, %v5328_v1 }
0x162c   :  { %7556 = vrsqrt.f32 %v5280_v23 }
0x162d   :  { %v5243_v32 = vpop.xlane.xlu0 %5242  ;;  %v5368_v2 = vpack.c.bf16 %v9968_v61, %v9965_v29 }
0x162e   :  { %v5265_v44 = vmul.f32 0.015625, %v5243_v32 }
0x162f   :  { %7131 = vmatmul.mubr.msk.bf16.gmra.mrb[108].mxu0 %vm120_vm0, %v5368_v2  ;;  %v5246_v59 = vpop.xlane.xlu1 %5245 }
0x1630   :  { %v7551_v25 = vpop.eup %7550  ;;  %v5281_v52 = vadd.f32 1e-05, %v5265_v44  ;;  %v5266_v15 = vmul.f32 0.015625, %v5246_v59 }
0x1631   :  { %v5249_v48 = vpop.xlane.xlu0 %5248  ;;  %v5309_v42 = vmul.f32 %v7551_v25, %v9855_v12 }
0x1632   :  { %v7553_v31 = vpop.eup %7552  ;;  %7558 = vrsqrt.f32 %v5281_v52  ;;  %v5282_v21 = vadd.f32 1e-05, %v5266_v15  ;;  %v5267_v7 = vmul.f32 0.015625, %v5249_v48 }
0x1633   :  { %v5252_v51 = vpop.xlane.xlu1 %5251  ;;  %v5310_v58 = vmul.f32 %v7553_v31, %v9858_v36  ;;  %v5329_v34 = vmul.f32 %v9915_v46, %v5309_v42 }
0x1634   :  { %v7555_v18 = vpop.eup %7554  ;;  %7560 = vrsqrt.f32 %v5282_v21  ;;  %v5283_v0 = vadd.f32 1e-05, %v5267_v7  ;;  %v5268_v39 = vmul.f32 0.015625, %v5252_v51 }
0x1635   :  { %v5330_v41 = vmul.f32 %v9915_v46, %v5310_v58  ;;  %v5311_v63 = vmul.f32 %v7555_v18, %v9863_v55  ;;  %v9979_v19 = vadd.f32 %v9922_v50, %v5329_v34 }
0x1636   :  { %v7557_v27 = vpop.eup %7556  ;;  %7562 = vrsqrt.f32 %v5283_v0  ;;  %v5284_v12 = vadd.f32 1e-05, %v5268_v39 }
0x1637   :  { %v9982_v60 = vadd.f32 %v9922_v50, %v5330_v41  ;;  %v5312_v36 = vmul.f32 %v7557_v27, %v9869_v11  ;;  %v5331_v14 = vmul.f32 %v9915_v46, %v5311_v63 }
0x1638   :  { %7564 = vrsqrt.f32 %v5284_v12 }
0x1639   :  { %v5369_v49 = vpack.c.bf16 %v9982_v60, %v9979_v19  ;;  %v5332_v5 = vmul.f32 %v9915_v46, %v5312_v36  ;;  %v9991_v55 = vadd.f32 %v9922_v50, %v5331_v14 }
0x163b   :  { %7134 = vmatprep.mubr.msk.bf16.mxu0 %vm120_vm0, %v5369_v49  ;;  %v9994_v40 = vadd.f32 %v9922_v50, %v5332_v5 }
0x163c   :  { %v7559_v17 = vpop.eup %7558 }
0x163d   :  { %v5370_v11 = vpack.c.bf16 %v9994_v40, %v9991_v55  ;;  %v5313_v3 = vmul.f32 %v7559_v17, %v9879_v10 }
0x163e   :  { %v7561_v13 = vpop.eup %7560 }
0x163f   :  { %7135 = vmatmul.mubr.msk.bf16.gmra.mrb[112].mxu0 %vm120_vm0, %v5370_v11  ;;  %v5314_v22 = vmul.f32 %v7561_v13, %v9882_v45  ;;  %v5333_v47 = vmul.f32 %v9915_v46, %v5313_v3 }
0x1640   :  { %v7563_v8 = vpop.eup %7562 }
0x1641   :  { %v5334_v9 = vmul.f32 %v9915_v46, %v5314_v22  ;;  %v5315_v4 = vmul.f32 %v7563_v8, %v9887_v38  ;;  %v10005_v37 = vadd.f32 %v9922_v50, %v5333_v47 }
0x1642   :  { %v7565_v24 = vpop.eup %7564 }
0x1643   :  { %v10008_v1 = vadd.f32 %v9922_v50, %v5334_v9  ;;  %v5316_v10 = vmul.f32 %v7565_v24, %v9893_v43  ;;  %v5335_v23 = vmul.f32 %v9915_v46, %v5315_v4  ;;  %v7372_v43 = vld [vmem:[%s10517_s7 + $0x90] sm:$0xff]  }
0x1644   :  { %7146 = vmatprep.subr.bf16.mxu1 %v7372_v43 }
0x1645   :  { %v5371_v45 = vpack.c.bf16 %v10008_v1, %v10005_v37  ;;  %v5336_v32 = vmul.f32 %v9915_v46, %v5316_v10  ;;  %v10017_v38 = vadd.f32 %v9922_v50, %v5335_v23  ;;  %7147 = vmatpush3.bf16.msra.mxu1 %v7372_v43  ;;  %v7373_v46 = vld [vmem:[%s10517_s7 + $0x98] sm:$0xff]  }
0x1646   :  { %7148 = vmatprep.subr.bf16.mxu1 %v7373_v46 }
0x1647   :  { %7138 = vmatprep.mubr.msk.bf16.mxu0 %vm120_vm0, %v5371_v45  ;;  %v10020_v2 = vadd.f32 %v9922_v50, %v5336_v32  ;;  %v5376_v50 = vrot.slane %v9911_v30, %v7973_v20 }
0x1649   :  { %v5372_v44 = vpack.c.bf16 %v10020_v2, %v10017_v38  ;;  %7149 = vmatpush3.bf16.msra.mxu1 %v7373_v46 }
0x164b   :  { %7139 = vmatmul.mubr.msk.bf16.gmra.mrb[116].mxu0 %vm120_vm0, %v5372_v44 }
0x16c6   :  { %v7128_v59 = vpop.f32.mrb[104].mxu0 }
0x16c7   :  { %v5468_v25 = vadd.f32 %v7128_v59, %v5376_v50  ;;  %v5459_v52 = vpop.f32.mrb[105].mxu0 }
0x16c8   :  { %v5460_v15 = vadd.f32 %v5459_v52, %v5376_v50  ;;  %v7129_v48 = vpop.f32.mrb[106].mxu0 }
0x16c9   :  { %v5471_v42 = vadd.f32 %v7129_v48, %v5376_v50  ;;  %v5462_v31 = vpop.f32.mrb[107].mxu0  ;;  %v5524_v7 = vmax.f32 %v5468_v25, 0.0 }
0x16ca   :  { %v5463_v21 = vadd.f32 %v5462_v31, %v5376_v50  ;;  %v5522_v58 = vmax.f32 %v5460_v15, 0.0 }
0x16cb   :  { %v5525_v51 = vmax.f32 %v5471_v42, 0.0 }
0x16cc   :  { %v5523_v34 = vmax.f32 %v5463_v21, 0.0 }
0x16cd   :  { %v5547_v18 = vpack.c.bf16 %v5525_v51, %v5524_v7 }
0x16ce   :  { %v5546_v0 = vpack.c.bf16 %v5523_v34, %v5522_v58 }
0x16d0   :  { %7150 = vmatprep.mubr.msk.bf16.mxu1 %vm120_vm0, %v5546_v0 }
0x16d1   :  { %7151 = vmatmul.mubr.msk.bf16.vlgmr.msra.gmra.mrb[112].mxu1 %vm120_vm0, %v5547_v18 }
0x1702   :  { %v7132_v39 = vpop.f32.mrb[108].mxu0 }
0x1703   :  { %v5484_v41 = vadd.f32 %v7132_v39, %v5376_v50  ;;  %v5475_v63 = vpop.f32.mrb[109].mxu0 }
0x1704   :  { %v5476_v27 = vadd.f32 %v5475_v63, %v5376_v50  ;;  %v7133_v12 = vpop.f32.mrb[110].mxu0  ;;  %v10043_v63 = vrot.slane %v9911_v30, %v7964_v16 }
0x1705   :  { %v5487_v36 = vadd.f32 %v7133_v12, %v5376_v50  ;;  %v5478_v14 = vpop.f32.mrb[111].mxu0  ;;  %v5528_v5 = vmax.f32 %v5484_v41, 0.0 }
0x1706   :  { %v5479_v49 = vadd.f32 %v5478_v14, %v5376_v50  ;;  %v5526_v11 = vmax.f32 %v5476_v27, 0.0 }
0x1707   :  { %v5529_v17 = vmax.f32 %v5487_v36, 0.0 }
0x1708   :  { %v5527_v3 = vmax.f32 %v5479_v49, 0.0 }
0x1709   :  { %v5549_v13 = vpack.c.bf16 %v5529_v17, %v5528_v5 }
0x170a   :  { %v5548_v22 = vpack.c.bf16 %v5527_v3, %v5526_v11 }
0x170c   :  { %7154 = vmatprep.mubr.msk.bf16.mxu1 %vm120_vm0, %v5548_v22 }
0x170d   :  { %7155 = vmatmul.mubr.msk.bf16.gmra.mrb[116].mxu1 %vm120_vm0, %v5549_v13 }
0x1712   :  { %v7136_v47 = vpop.f32.mrb[112].mxu0 }
0x1713   :  { %v5500_v8 = vadd.f32 %v7136_v47, %v5376_v50  ;;  %v5491_v9 = vpop.f32.mrb[113].mxu0 }
0x1714   :  { %v5492_v4 = vadd.f32 %v5491_v9, %v5376_v50  ;;  %v7137_v24 = vpop.f32.mrb[114].mxu0 }
0x1715   :  { %v5503_v10 = vadd.f32 %v7137_v24, %v5376_v50  ;;  %v5494_v23 = vpop.f32.mrb[115].mxu0  ;;  %v5532_v32 = vmax.f32 %v5500_v8, 0.0 }
0x1716   :  { %v5495_v45 = vadd.f32 %v5494_v23, %v5376_v50  ;;  %v5530_v43 = vmax.f32 %v5492_v4, 0.0 }
0x1717   :  { %v5533_v44 = vmax.f32 %v5503_v10, 0.0 }
0x1718   :  { %v5531_v46 = vmax.f32 %v5495_v45, 0.0 }
0x1719   :  { %v5551_v59 = vpack.c.bf16 %v5533_v44, %v5532_v32 }
0x171a   :  { %v5550_v25 = vpack.c.bf16 %v5531_v46, %v5530_v43 }
0x171c   :  { %7158 = vmatprep.mubr.msk.bf16.mxu1 %vm120_vm0, %v5550_v25 }
0x171d   :  { %7159 = vmatmul.mubr.msk.bf16.gmra.mrb[120].mxu1 %vm120_vm0, %v5551_v59 }
0x171e   :  { %v7140_v52 = vpop.f32.mrb[116].mxu0 }
0x171f   :  { %v5516_v15 = vadd.f32 %v7140_v52, %v5376_v50  ;;  %v5507_v48 = vpop.f32.mrb[117].mxu0 }
0x1720   :  { %v5508_v42 = vadd.f32 %v5507_v48, %v5376_v50  ;;  %v7141_v31 = vpop.f32.mrb[118].mxu0 }
0x1721   :  { %v5519_v21 = vadd.f32 %v7141_v31, %v5376_v50  ;;  %v5510_v7 = vpop.f32.mrb[119].mxu0  ;;  %v5536_v58 = vmax.f32 %v5516_v15, 0.0 }
0x1722   :  { %v5511_v51 = vadd.f32 %v5510_v7, %v5376_v50  ;;  %v5534_v18 = vmax.f32 %v5508_v42, 0.0 }
0x1723   :  { %v5537_v34 = vmax.f32 %v5519_v21, 0.0 }
0x1724   :  { %v5535_v0 = vmax.f32 %v5511_v51, 0.0 }
0x1725   :  { %v5553_v39 = vpack.c.bf16 %v5537_v34, %v5536_v58 }
0x1726   :  { %v5552_v41 = vpack.c.bf16 %v5535_v0, %v5534_v18 }
0x1728   :  { %7162 = vmatprep.mubr.msk.bf16.mxu1 %vm120_vm0, %v5552_v41 }
0x1729   :  { %7163 = vmatmul.mubr.msk.bf16.gmra.mrb[124].mxu1 %vm120_vm0, %v5553_v39 }
0x17a4   :  { %v7152_v27 = vpop.f32.mrb[112].mxu1 }
0x17a5   :  { %v5649_v12 = vadd.f32 %v7152_v27, %v10043_v63  ;;  %v5640_v36 = vpop.f32.mrb[113].mxu1 }
0x17a6   :  { %v5641_v50 = vadd.f32 %v5640_v36, %v10043_v63  ;;  %v7153_v14 = vpop.f32.mrb[114].mxu1 }
0x17a7   :  { %v10048_v49 = vadd.f32 %v5649_v12, %v9939_v62  ;;  %v5652_v5 = vadd.f32 %v7153_v14, %v10043_v63  ;;  %v5643_v17 = vpop.f32.mrb[115].mxu1 }
0x17a8   :  { %v5644_v11 = vadd.f32 %v5643_v17, %v10043_v63  ;;  %v10053_v3 = vadd.f32 %v5641_v50, %v9927_v28 }
0x17a9   :  { %v10056_v13 = vadd.f32 %v5652_v5, %v9942_v33  ;;  %v5725_v22 = vsel %vm120_vm0, %v10048_v49, 0.0 }
0x17aa   :  { %5726 = vadd.xlane.f32.xlu0 %v5725_v22  ;;  %v10061_v47 = vadd.f32 %v5644_v11, %v9930_v54  ;;  %v5719_v8 = vsel %vm120_vm0, %v10053_v3, 0.0 }
0x17ab   :  { %v5728_v62 = vsel %vm120_vm0, %v10056_v13, 0.0 }
0x17ac   :  { %5729 = vadd.xlane.f32.xlu1 %v5728_v62  ;;  %v5722_v28 = vsel %vm120_vm0, %v10061_v47, 0.0 }
0x17ae   :  { %5720 = vadd.xlane.f32.xlu0 %v5719_v8 }
0x17b0   :  { %5723 = vadd.xlane.f32.xlu1 %v5722_v28 }
0x17e0   :  { %v7156_v33 = vpop.f32.mrb[116].mxu1 }
0x17e1   :  { %v5665_v9 = vadd.f32 %v7156_v33, %v10043_v63  ;;  %v5656_v4 = vpop.f32.mrb[117].mxu1 }
0x17e2   :  { %v5657_v24 = vadd.f32 %v5656_v4, %v10043_v63  ;;  %v7157_v54 = vpop.f32.mrb[118].mxu1 }
0x17e3   :  { %v10072_v10 = vadd.f32 %v5665_v9, %v9965_v29  ;;  %v5668_v23 = vadd.f32 %v7157_v54, %v10043_v63  ;;  %v5659_v45 = vpop.f32.mrb[119].mxu1 }
0x17e4   :  { %v5660_v32 = vadd.f32 %v5659_v45, %v10043_v63  ;;  %v10077_v44 = vadd.f32 %v5657_v24, %v9952_v6 }
0x17e5   :  { %v10080_v43 = vadd.f32 %v5668_v23, %v9968_v61  ;;  %v5737_v46 = vsel %vm120_vm0, %v10072_v10, 0.0 }
0x17e6   :  { %5738 = vadd.xlane.f32.xlu0 %v5737_v46  ;;  %v10085_v59 = vadd.f32 %v5660_v32, %v9956_v53  ;;  %v5731_v25 = vsel %vm120_vm0, %v10077_v44, 0.0 }
0x17e7   :  { %v5740_v29 = vsel %vm120_vm0, %v10080_v43, 0.0 }
0x17e8   :  { %5741 = vadd.xlane.f32.xlu1 %v5740_v29  ;;  %v5734_v6 = vsel %vm120_vm0, %v10085_v59, 0.0 }
0x17ea   :  { %5732 = vadd.xlane.f32.xlu0 %v5731_v25 }
0x17ec   :  { %5735 = vadd.xlane.f32.xlu1 %v5734_v6 }
0x17f0   :  { %v7160_v61 = vpop.f32.mrb[120].mxu1 }
0x17f1   :  { %v5681_v52 = vadd.f32 %v7160_v61, %v10043_v63  ;;  %v5672_v15 = vpop.f32.mrb[121].mxu1 }
0x17f2   :  { %v5673_v48 = vadd.f32 %v5672_v15, %v10043_v63  ;;  %v7161_v53 = vpop.f32.mrb[122].mxu1 }
0x17f3   :  { %v10096_v42 = vadd.f32 %v5681_v52, %v9991_v55  ;;  %v5684_v31 = vadd.f32 %v7161_v53, %v10043_v63  ;;  %v5675_v21 = vpop.f32.mrb[123].mxu1 }
0x17f4   :  { %v5676_v7 = vadd.f32 %v5675_v21, %v10043_v63  ;;  %v10101_v51 = vadd.f32 %v5673_v48, %v9979_v19 }
0x17f5   :  { %v10104_v58 = vadd.f32 %v5684_v31, %v9994_v40  ;;  %v5749_v34 = vsel %vm120_vm0, %v10096_v42, 0.0 }
0x17f6   :  { %5750 = vadd.xlane.f32.xlu0 %v5749_v34  ;;  %v10109_v18 = vadd.f32 %v5676_v7, %v9982_v60  ;;  %v5743_v0 = vsel %vm120_vm0, %v10101_v51, 0.0 }
0x17f7   :  { %v5752_v55 = vsel %vm120_vm0, %v10104_v58, 0.0 }
0x17f8   :  { %5753 = vadd.xlane.f32.xlu1 %v5752_v55  ;;  %v5746_v19 = vsel %vm120_vm0, %v10109_v18, 0.0 }
0x17fa   :  { %5744 = vadd.xlane.f32.xlu0 %v5743_v0 }
0x17fc   :  { %v7164_v40 = vpop.f32.mrb[124].mxu1  ;;  %5747 = vadd.xlane.f32.xlu1 %v5746_v19 }
0x17fd   :  { %v5688_v39 = vpop.f32.mrb[125].mxu1  ;;  %v5697_v41 = vadd.f32 %v7164_v40, %v10043_v63 }
0x17fe   :  { %v5689_v27 = vadd.f32 %v5688_v39, %v10043_v63  ;;  %v7165_v60 = vpop.f32.mrb[126].mxu1 }
0x17ff   :  { %v5691_v12 = vpop.f32.mrb[127].mxu1  ;;  %v5700_v50 = vadd.f32 %v7165_v60, %v10043_v63  ;;  %v10125_v5 = vadd.f32 %v5697_v41, %v10017_v38 }
0x1800   :  { %v10120_v36 = vadd.f32 %v5689_v27, %v10005_v37  ;;  %v5692_v14 = vadd.f32 %v5691_v12, %v10043_v63 }
0x1801   :  { %v10133_v22 = vadd.f32 %v5700_v50, %v10020_v2  ;;  %v5761_v63 = vsel %vm120_vm0, %v10125_v5, 0.0 }
0x1802   :  { %v10128_v17 = vadd.f32 %v5692_v14, %v10008_v1  ;;  %v5755_v11 = vsel %vm120_vm0, %v10120_v36, 0.0  ;;  %v1773_v14 = vrot.slane %v10542_v57, 6 }
0x1803   :  { %5756 = vadd.xlane.f32.xlu0 %v5755_v11  ;;  %v5764_v38 = vsel %vm120_vm0, %v10133_v22, 0.0 }
0x1804   :  { %v5758_v37 = vsel %vm120_vm0, %v10128_v17, 0.0 }
0x1805   :  { %5759 = vadd.xlane.f32.xlu1 %v5758_v37 }
0x1807   :  { %5762 = vadd.xlane.f32.xlu0 %v5761_v63 }
0x1809   :  { %5765 = vadd.xlane.f32.xlu1 %v5764_v38 }
0x1837   :  { %v5727_v1 = vpop.xlane.xlu0 %5726 }
0x1838   :  { %v5769_v62 = vmul.f32 0.015625, %v5727_v1 }
0x1839   :  { %v5730_v8 = vpop.xlane.xlu1 %5729 }
0x183a   :  { %v10142_v28 = vsub.f32 %v10048_v49, %v5769_v62  ;;  %v5770_v2 = vmul.f32 0.015625, %v5730_v8 }
0x183b   :  { %v5721_v33 = vpop.xlane.xlu0 %5720 }
0x183c   :  { %v10145_v9 = vsub.f32 %v10056_v13, %v5770_v2  ;;  %v5767_v4 = vmul.f32 0.015625, %v5721_v33  ;;  %v5801_v24 = vmul.f32 %v10142_v28, %v10142_v28  ;;  %v1776_v33 = vrot.slane %v8422_v35, 5 }
0x183d   :  { %v5724_v54 = vpop.xlane.xlu1 %5723 }
0x183e   :  { %v10150_v23 = vsub.f32 %v10053_v3, %v5767_v4  ;;  %v5768_v45 = vmul.f32 0.015625, %v5724_v54  ;;  %v5821_v32 = vsel %vm120_vm0, %v5801_v24, 0.0  ;;  %v5802_v49 = vmul.f32 %v10145_v9, %v10145_v9 }
0x183f   :  { %5822 = vadd.xlane.f32.xlu0 %v5821_v32 }
0x1840   :  { %v10156_v46 = vsub.f32 %v10061_v47, %v5768_v45  ;;  %v5824_v13 = vsel %vm120_vm0, %v5802_v49, 0.0  ;;  %v5799_v29 = vmul.f32 %v10150_v23, %v10150_v23  ;;  %v10574_v49 = vld [vmem:[#allocation13_spill] sm:$0xff] }
0x1841   :  { %5825 = vadd.xlane.f32.xlu1 %v5824_v13  ;;  %v1779_v13 = vrot.slane %v10574_v49, 4 }
0x1842   :  { %v5815_v25 = vsel %vm120_vm0, %v5799_v29, 0.0  ;;  %v5800_v3 = vmul.f32 %v10156_v46, %v10156_v46 }
0x1843   :  { %5816 = vadd.xlane.f32.xlu0 %v5815_v25 }
0x1844   :  { %v5818_v6 = vsel %vm120_vm0, %v5800_v3, 0.0  ;;  %v10575_v3 = vld [vmem:[#allocation14_spill] sm:$0xff] }
0x1845   :  { %5819 = vadd.xlane.f32.xlu1 %v5818_v6 }
0x1873   :  { %v5739_v61 = vpop.xlane.xlu0 %5738 }
0x1874   :  { %v5773_v52 = vmul.f32 0.015625, %v5739_v61 }
0x1875   :  { %v5742_v15 = vpop.xlane.xlu1 %5741 }
0x1876   :  { %v10166_v47 = vsub.f32 %v10072_v10, %v5773_v52  ;;  %v5774_v48 = vmul.f32 0.015625, %v5742_v15 }
0x1877   :  { %v5733_v53 = vpop.xlane.xlu0 %5732 }
0x1878   :  { %v10169_v31 = vsub.f32 %v10080_v43, %v5774_v48  ;;  %v5771_v21 = vmul.f32 0.015625, %v5733_v53  ;;  %v5805_v7 = vmul.f32 %v10166_v47, %v10166_v47  ;;  %v10576_v53 = vld [vmem:[#allocation15_spill] sm:$0xff] }
0x1879   :  { %v5736_v34 = vpop.xlane.xlu1 %5735 }
0x187a   :  { %v10174_v55 = vsub.f32 %v10077_v44, %v5771_v21  ;;  %v5772_v0 = vmul.f32 0.015625, %v5736_v34  ;;  %v5833_v19 = vsel %vm120_vm0, %v5805_v7, 0.0  ;;  %v5806_v10 = vmul.f32 %v10169_v31, %v10169_v31 }
0x187b   :  { %5834 = vadd.xlane.f32.xlu0 %v5833_v19  ;;  %v1785_v21 = vrot.slane %v10576_v53, 2 }
0x187c   :  { %v10180_v40 = vsub.f32 %v10085_v59, %v5772_v0  ;;  %v5836_v43 = vsel %vm120_vm0, %v5806_v10, 0.0  ;;  %v5803_v39 = vmul.f32 %v10174_v55, %v10174_v55  ;;  %v1772_v59 = vrot.slane %v10545_v56, 7 }
0x187d   :  { %5837 = vadd.xlane.f32.xlu1 %v5836_v43 }
0x187e   :  { %v5827_v41 = vsel %vm120_vm0, %v5803_v39, 0.0  ;;  %v5804_v44 = vmul.f32 %v10180_v40, %v10180_v40  ;;  %v1775_v2 = vsel %vm1774_vm6, %v1773_v14, %v1772_v59 }
0x187f   :  { %5828 = vadd.xlane.f32.xlu0 %v5827_v41 }
0x1880   :  { %v5830_v27 = vsel %vm120_vm0, %v5804_v44, 0.0 }
0x1881   :  { %5831 = vadd.xlane.f32.xlu1 %v5830_v27  ;;  %v10577_v27 = vld [vmem:[#allocation16_spill] sm:$0xff] }
0x1883   :  { %v5751_v60 = vpop.xlane.xlu0 %5750 }
0x1884   :  { %v5777_v12 = vmul.f32 0.015625, %v5751_v60  ;;  %v1788_v60 = vrot.slane %v10577_v27, 1 }
0x1885   :  { %v5754_v50 = vpop.xlane.xlu1 %5753 }
0x1886   :  { %v10192_v11 = vsub.f32 %v10096_v42, %v5777_v12  ;;  %v5778_v37 = vmul.f32 0.015625, %v5754_v50 }
0x1887   :  { %v5745_v63 = vpop.xlane.xlu0 %5744 }
0x1888   :  { %v10195_v38 = vsub.f32 %v10104_v58, %v5778_v37  ;;  %v5775_v1 = vmul.f32 0.015625, %v5745_v63  ;;  %v5809_v62 = vmul.f32 %v10192_v11, %v10192_v11 }
0x1889   :  { %v5748_v8 = vpop.xlane.xlu1 %5747 }
0x188a   :  { %v10202_v4 = vsub.f32 %v10101_v51, %v5775_v1  ;;  %v5776_v42 = vmul.f32 0.015625, %v5748_v8  ;;  %v5845_v24 = vsel %vm120_vm0, %v5809_v62, 0.0  ;;  %v5810_v58 = vmul.f32 %v10195_v38, %v10195_v38  ;;  %v10578_v8 = vld [vmem:[#allocation12_spill] sm:$0xff] }
0x188b   :  { %5846 = vadd.xlane.f32.xlu0 %v5845_v24  ;;  %v1778_v51 = vsel %vm1777_vm7, %v1776_v33, %v1775_v2  ;;  %v1794_v2 = vsel %vm1793_vm13, %v10578_v8, 0.0  ;;  %v10256_v33 = vld [vmem:[%s10519_s9] sm:$0xf] }
0x188c   :  { %v10208_v54 = vsub.f32 %v10109_v18, %v5776_v42  ;;  %v5848_v45 = vsel %vm120_vm0, %v5810_v58, 0.0  ;;  %v5807_v32 = vmul.f32 %v10202_v4, %v10202_v4  ;;  %v1782_v18 = vrot.slane %v10575_v3, 3 }
0x188d   :  { %5849 = vadd.xlane.f32.xlu1 %v5848_v45  ;;  %v1781_v52 = vsel %vm1780_vm8, %v1779_v13, %v1778_v51  ;;  %v6036_v42 = vrot.slane %v10256_v33, 3 }
0x188e   :  { %v5839_v29 = vsel %vm120_vm0, %v5807_v32, 0.0  ;;  %v5808_v25 = vmul.f32 %v10208_v54, %v10208_v54  ;;  %v1784_v0 = vsel %vm1783_vm9, %v1782_v18, %v1781_v52 }
0x188f   :  { %5840 = vadd.xlane.f32.xlu0 %v5839_v29  ;;  %v1787_v44 = vsel %vm1786_vm10, %v1785_v21, %v1784_v0  ;;  %7166 = vpush %v6036_v42  ;;  %v10266_v0 = vrot.slane %v9911_v30, %v7987_v26 }
0x1890   :  { %v5757_v6 = vpop.xlane.xlu0 %5756  ;;  %v5842_v61 = vsel %vm120_vm0, %v5808_v25, 0.0  ;;  %v1790_v63 = vsel %vm1789_vm11, %v1788_v60, %v1787_v44 }
0x1891   :  { %v5779_v15 = vmul.f32 0.015625, %v5757_v6  ;;  %5843 = vadd.xlane.f32.xlu1 %v5842_v61 }
0x1892   :  { %v5760_v48 = vpop.xlane.xlu1 %5759 }
0x1893   :  { %v10223_v7 = vsub.f32 %v10120_v36, %v5779_v15  ;;  %v5780_v34 = vmul.f32 0.015625, %v5760_v48  ;;  %v10579_v15 = vld [vmem:[#allocation11_spill] sm:$0xff] }
0x1894   :  { %v5763_v19 = vpop.xlane.xlu0 %5762  ;;  %v10261_v48 = vrot.slane %v9911_v30, %v10579_v15 }
0x1895   :  { %v10227_v10 = vsub.f32 %v10128_v17, %v5780_v34  ;;  %v5781_v43 = vmul.f32 0.015625, %v5763_v19  ;;  %v5811_v39 = vmul.f32 %v10223_v7, %v10223_v7 }
0x1896   :  { %v5766_v41 = vpop.xlane.xlu1 %5765 }
0x1897   :  { %v10234_v36 = vsub.f32 %v10125_v5, %v5781_v43  ;;  %v5782_v12 = vmul.f32 0.015625, %v5766_v41  ;;  %v5851_v50 = vsel %vm120_vm0, %v5811_v39, 0.0  ;;  %v5812_v17 = vmul.f32 %v10227_v10, %v10227_v10  ;;  %v10580_v39 = vld [vmem:[#allocation10_spill] sm:$0xff] }
0x1898   :  { %5852 = vadd.xlane.f32.xlu0 %v5851_v50  ;;  %v10271_v41 = vrot.slane %v10256_v33, %v10580_v39 }
0x1899   :  { %v10240_v59 = vsub.f32 %v10133_v22, %v5782_v12  ;;  %v5854_v14 = vsel %vm120_vm0, %v5812_v17, 0.0  ;;  %v5813_v37 = vmul.f32 %v10234_v36, %v10234_v36  ;;  %v1798_v22 = vsel %vm1797_vm12, %v1790_v63, 0.0 }
0x189a   :  { %5855 = vadd.xlane.f32.xlu1 %v5854_v14 }
0x189b   :  { %v5857_v5 = vsel %vm120_vm0, %v5813_v37, 0.0  ;;  %v5814_v1 = vmul.f32 %v10240_v59, %v10240_v59 }
0x189c   :  { %5858 = vadd.xlane.f32.xlu0 %v5857_v5 }
0x189d   :  { %v5860_v62 = vsel %vm120_vm0, %v5814_v1, 0.0 }
0x189e   :  { %5861 = vadd.xlane.f32.xlu1 %v5860_v62 }
0x18a0   :  { %1799 = vadd.xlane.f32.xlu0 %v1798_v22 }
0x18a2   :  { %1795 = vadd.xlane.f32.xlu1 %v1794_v2 }
0x18c0   :  { %s7167_s9 = spop %7166 }
0x18cc   :  { %v5823_v24 = vpop.xlane.xlu0 %5822 }
0x18cd   :  { %v5865_v58 = vmul.f32 0.015625, %v5823_v24 }
0x18ce   :  { %v5826_v45 = vpop.xlane.xlu1 %5825 }
0x18cf   :  { %v5881_v32 = vadd.f32 1e-05, %v5865_v58  ;;  %v5866_v13 = vmul.f32 0.015625, %v5826_v45 }
0x18d0   :  { %v5817_v51 = vpop.xlane.xlu0 %5816 }
0x18d1   :  { %7566 = vrsqrt.f32 %v5881_v32  ;;  %v5882_v29 = vadd.f32 1e-05, %v5866_v13  ;;  %v5863_v25 = vmul.f32 0.015625, %v5817_v51 }
0x18d2   :  { %v5820_v18 = vpop.xlane.xlu1 %5819 }
0x18d3   :  { %7568 = vrsqrt.f32 %v5882_v29  ;;  %v5879_v6 = vadd.f32 1e-05, %v5863_v25  ;;  %v5864_v61 = vmul.f32 0.015625, %v5820_v18 }
0x18d5   :  { %7570 = vrsqrt.f32 %v5879_v6  ;;  %v5880_v52 = vadd.f32 1e-05, %v5864_v61 }
0x18d7   :  { %7572 = vrsqrt.f32 %v5880_v52 }
0x18db   :  { %v7567_v21 = vpop.eup %7566 }
0x18dc   :  { %v5913_v34 = vmul.f32 %v7567_v21, %v10142_v28 }
0x18dd   :  { %v7569_v19 = vpop.eup %7568 }
0x18de   :  { %v5933_v43 = vmul.f32 %v10261_v48, %v5913_v34  ;;  %v5914_v44 = vmul.f32 %v7569_v19, %v10145_v9 }
0x18df   :  { %v7571_v60 = vpop.eup %7570 }
0x18e0   :  { %v5953_v12 = vadd.f32 %v10266_v0, %v5933_v43  ;;  %v5934_v50 = vmul.f32 %v10261_v48, %v5914_v44  ;;  %v5911_v28 = vmul.f32 %v7571_v60, %v10150_v23 }
0x18e1   :  { %v7573_v17 = vpop.eup %7572 }
0x18e2   :  { %v5973_v26 = vmul.f32 %v10271_v41, %v5953_v12  ;;  %v5954_v30 = vadd.f32 %v10266_v0, %v5934_v50  ;;  %v5931_v14 = vmul.f32 %v10261_v48, %v5911_v28  ;;  %v5912_v37 = vmul.f32 %v7573_v17, %v10156_v46 }
0x18e4   :  { %v5993_v63 = vsel %vm120_vm0, %v5973_v26, 0.0  ;;  %v5974_v9 = vmul.f32 %v10271_v41, %v5954_v30  ;;  %v5951_v5 = vadd.f32 %v10266_v0, %v5931_v14  ;;  %v5932_v1 = vmul.f32 %v10261_v48, %v5912_v37 }
0x18e5   :  { %5994 = vadd.xlane.f32.xlu0 %v5993_v63 }
0x18e6   :  { %v5996_v23 = vsel %vm120_vm0, %v5974_v9, 0.0  ;;  %v5971_v62 = vmul.f32 %v10271_v41, %v5951_v5  ;;  %v5952_v22 = vadd.f32 %v10266_v0, %v5932_v1 }
0x18e7   :  { %5997 = vadd.xlane.f32.xlu1 %v5996_v23 }
0x18e8   :  { %v5987_v2 = vsel %vm120_vm0, %v5971_v62, 0.0  ;;  %v5972_v46 = vmul.f32 %v10271_v41, %v5952_v22 }
0x18e9   :  { %5988 = vadd.xlane.f32.xlu0 %v5987_v2 }
0x18ea   :  { %v5990_v42 = vsel %vm120_vm0, %v5972_v46, 0.0 }
0x18eb   :  { %5991 = vadd.xlane.f32.xlu1 %v5990_v42 }
0x1908   :  { %v5835_v24 = vpop.xlane.xlu0 %5834 }
0x1909   :  { %v5869_v58 = vmul.f32 0.015625, %v5835_v24 }
0x190a   :  { %v5838_v45 = vpop.xlane.xlu1 %5837 }
0x190b   :  { %v5885_v32 = vadd.f32 1e-05, %v5869_v58  ;;  %v5870_v13 = vmul.f32 0.015625, %v5838_v45 }
0x190c   :  { %v5829_v51 = vpop.xlane.xlu0 %5828 }
0x190d   :  { %7574 = vrsqrt.f32 %v5885_v32  ;;  %v5886_v29 = vadd.f32 1e-05, %v5870_v13  ;;  %v5867_v25 = vmul.f32 0.015625, %v5829_v51 }
0x190e   :  { %v5832_v18 = vpop.xlane.xlu1 %5831 }
0x190f   :  { %7576 = vrsqrt.f32 %v5886_v29  ;;  %v5883_v6 = vadd.f32 1e-05, %v5867_v25  ;;  %v5868_v61 = vmul.f32 0.015625, %v5832_v18 }
0x1911   :  { %7578 = vrsqrt.f32 %v5883_v6  ;;  %v5884_v52 = vadd.f32 1e-05, %v5868_v61 }
0x1913   :  { %7580 = vrsqrt.f32 %v5884_v52 }
0x1917   :  { %v7575_v15 = vpop.eup %7574 }
0x1918   :  { %v5847_v21 = vpop.xlane.xlu0 %5846  ;;  %v5917_v34 = vmul.f32 %v7575_v15, %v10166_v47 }
0x1919   :  { %v7577_v19 = vpop.eup %7576  ;;  %v5873_v43 = vmul.f32 0.015625, %v5847_v21 }
0x191a   :  { %v5850_v39 = vpop.xlane.xlu1 %5849  ;;  %v5937_v44 = vmul.f32 %v10261_v48, %v5917_v34  ;;  %v5918_v60 = vmul.f32 %v7577_v19, %v10169_v31 }
0x191b   :  { %v7579_v12 = vpop.eup %7578  ;;  %v5889_v50 = vadd.f32 1e-05, %v5873_v43  ;;  %v5874_v28 = vmul.f32 0.015625, %v5850_v39 }
0x191c   :  { %v5841_v17 = vpop.xlane.xlu0 %5840  ;;  %v5957_v26 = vadd.f32 %v10266_v0, %v5937_v44  ;;  %v5938_v30 = vmul.f32 %v10261_v48, %v5918_v60  ;;  %v5915_v14 = vmul.f32 %v7579_v12, %v10174_v55 }
0x191d   :  { %v7581_v37 = vpop.eup %7580  ;;  %7582 = vrsqrt.f32 %v5889_v50  ;;  %v5890_v47 = vadd.f32 1e-05, %v5874_v28  ;;  %v5871_v63 = vmul.f32 0.015625, %v5841_v17 }
0x191e   :  { %v5844_v9 = vpop.xlane.xlu1 %5843  ;;  %v5977_v5 = vmul.f32 %v10271_v41, %v5957_v26  ;;  %v5958_v1 = vadd.f32 %v10266_v0, %v5938_v30  ;;  %v5935_v31 = vmul.f32 %v10261_v48, %v5915_v14  ;;  %v5916_v23 = vmul.f32 %v7581_v37, %v10180_v40 }
0x191f   :  { %7584 = vrsqrt.f32 %v5890_v47  ;;  %v5887_v62 = vadd.f32 1e-05, %v5871_v63  ;;  %v5872_v22 = vmul.f32 0.015625, %v5844_v9 }
0x1920   :  { %v6005_v2 = vsel %vm120_vm0, %v5977_v5, 0.0  ;;  %v5978_v55 = vmul.f32 %v10271_v41, %v5958_v1  ;;  %v5955_v46 = vadd.f32 %v10266_v0, %v5935_v31  ;;  %v5936_v42 = vmul.f32 %v10261_v48, %v5916_v23 }
0x1921   :  { %7586 = vrsqrt.f32 %v5887_v62  ;;  %v5888_v24 = vadd.f32 1e-05, %v5872_v22  ;;  %6006 = vadd.xlane.f32.xlu0 %v6005_v2 }
0x1922   :  { %v6008_v58 = vsel %vm120_vm0, %v5978_v55, 0.0  ;;  %v5975_v45 = vmul.f32 %v10271_v41, %v5955_v46  ;;  %v5956_v40 = vadd.f32 %v10266_v0, %v5936_v42 }
0x1923   :  { %7588 = vrsqrt.f32 %v5888_v24  ;;  %6009 = vadd.xlane.f32.xlu1 %v6008_v58 }
0x1924   :  { %v5999_v32 = vsel %vm120_vm0, %v5975_v45, 0.0  ;;  %v5976_v13 = vmul.f32 %v10271_v41, %v5956_v40 }
0x1925   :  { %6000 = vadd.xlane.f32.xlu0 %v5999_v32  ;;  %v5853_v51 = vpop.xlane.xlu0 %5852 }
0x1926   :  { %v5875_v29 = vmul.f32 0.015625, %v5853_v51  ;;  %v6002_v25 = vsel %vm120_vm0, %v5976_v13, 0.0 }
0x1927   :  { %v7583_v18 = vpop.eup %7582  ;;  %6003 = vadd.xlane.f32.xlu1 %v6002_v25  ;;  %v5856_v6 = vpop.xlane.xlu1 %5855 }
0x1928   :  { %v5891_v61 = vadd.f32 1e-05, %v5875_v29  ;;  %v5876_v52 = vmul.f32 0.015625, %v5856_v6  ;;  %v5921_v15 = vmul.f32 %v7583_v18, %v10192_v11 }
0x1929   :  { %v7585_v21 = vpop.eup %7584  ;;  %v5859_v34 = vpop.xlane.xlu0 %5858 }
0x192a   :  { %7590 = vrsqrt.f32 %v5891_v61  ;;  %v5892_v19 = vadd.f32 1e-05, %v5876_v52  ;;  %v5877_v43 = vmul.f32 0.015625, %v5859_v34  ;;  %v5941_v39 = vmul.f32 %v10261_v48, %v5921_v15 }
0x192b   :  { %v7587_v44 = vpop.eup %7586  ;;  %v5862_v60 = vpop.xlane.xlu1 %5861  ;;  %v5922_v12 = vmul.f32 %v7585_v21, %v10195_v38 }
0x192c   :  { %7592 = vrsqrt.f32 %v5892_v19  ;;  %v5893_v50 = vadd.f32 1e-05, %v5877_v43  ;;  %v5878_v28 = vmul.f32 0.015625, %v5862_v60  ;;  %v5961_v17 = vadd.f32 %v10266_v0, %v5941_v39 }
0x192d   :  { %v7589_v26 = vpop.eup %7588  ;;  %v5942_v30 = vmul.f32 %v10261_v48, %v5922_v12  ;;  %v5919_v11 = vmul.f32 %v7587_v44, %v10202_v4  ;;  %v1800_v14 = vpop.xlane.xlu0 %1799 }
0x192e   :  { %7594 = vrsqrt.f32 %v5893_v50  ;;  %v5894_v37 = vadd.f32 1e-05, %v5878_v28  ;;  %v5981_v47 = vmul.f32 %v10271_v41, %v5961_v17  ;;  %v5920_v63 = vmul.f32 %v7589_v26, %v10208_v54 }
0x192f   :  { %v5962_v9 = vadd.f32 %v10266_v0, %v5942_v30  ;;  %v5939_v38 = vmul.f32 %v10261_v48, %v5919_v11  ;;  %v1803_v5 = vmul.f32 0.015625, %v1800_v14  ;;  %v1796_v32 = vpop.xlane.xlu1 %1795 }
0x1930   :  { %7596 = vrsqrt.f32 %v5894_v37  ;;  %v6017_v1 = vsel %vm120_vm0, %v5981_v47, 0.0  ;;  %v5940_v31 = vmul.f32 %v10261_v48, %v5920_v63  ;;  %v1802_v21 = vmul.f32 0.015625, %v1796_v32 }
0x1931   :  { %6018 = vadd.xlane.f32.xlu0 %v6017_v1  ;;  %v5982_v4 = vmul.f32 %v10271_v41, %v5962_v9  ;;  %v5959_v23 = vadd.f32 %v10266_v0, %v5939_v38  ;;  %v1806_v62 = vrot.slane %v1803_v5, 1  ;;  %v1807_v22 = vrot.slane %v1803_v5, 2 }
0x1932   :  { %v5960_v2 = vadd.f32 %v10266_v0, %v5940_v31  ;;  %v1808_v54 = vrot.slane %v1803_v5, 3  ;;  %v1809_v55 = vrot.slane %v1803_v5, 4  ;;  %v1810_v24 = vrot.slane %v1803_v5, 5 }
0x1933   :  { %v6020_v46 = vsel %vm120_vm0, %v5982_v4, 0.0  ;;  %v5979_v42 = vmul.f32 %v10271_v41, %v5959_v23  ;;  %v1811_v58 = vrot.slane %v1803_v5, 6  ;;  %v10330_v13 = vsub.f32 %v10545_v56, %v1806_v62 }
0x1934   :  { %v7591_v45 = vpop.eup %7590  ;;  %6021 = vadd.xlane.f32.xlu1 %v6020_v46  ;;  %v5980_v40 = vmul.f32 %v10271_v41, %v5960_v2  ;;  %v10335_v25 = vsub.f32 %v10542_v57, %v1807_v22  ;;  %v10338_v18 = vsub.f32 %v8422_v35, %v1808_v54  ;;  %v1812_v52 = vrot.slane %v1803_v5, 7 }
0x1935   :  { %v6011_v51 = vsel %vm120_vm0, %v5979_v42, 0.0  ;;  %v5923_v29 = vmul.f32 %v7591_v45, %v10223_v7  ;;  %v10342_v15 = vsub.f32 %v10574_v49, %v1809_v55  ;;  %v10345_v56 = vsub.f32 %v10575_v3, %v1810_v24 }
0x1936   :  { %v7593_v6 = vpop.eup %7592  ;;  %6012 = vadd.xlane.f32.xlu0 %v6011_v51  ;;  %v6014_v61 = vsel %vm120_vm0, %v5980_v40, 0.0  ;;  %v10349_v57 = vsub.f32 %v10576_v53, %v1811_v58  ;;  %v1830_v35 = vmul.f32 %v10330_v13, %v10330_v13  ;;  %v1831_v19 = vmul.f32 %v10335_v25, %v10335_v25 }
0x1937   :  { %v5924_v7 = vmul.f32 %v7593_v6, %v10227_v10  ;;  %v1832_v49 = vmul.f32 %v10338_v18, %v10338_v18  ;;  %v1833_v3 = vmul.f32 %v10342_v15, %v10342_v15  ;;  %v5943_v53 = vmul.f32 %v10261_v48, %v5923_v29 }
0x1938   :  { %v7595_v34 = vpop.eup %7594  ;;  %6015 = vadd.xlane.f32.xlu1 %v6014_v61  ;;  %v1834_v39 = vmul.f32 %v10345_v56, %v10345_v56  ;;  %v10365_v60 = vsub.f32 %v10577_v27, %v1812_v52  ;;  %v1835_v12 = vmul.f32 %v10349_v57, %v10349_v57  ;;  %v1845_v50 = vrot.slane %v1830_v35, 7 }
0x1939   :  { %v5944_v43 = vmul.f32 %v10261_v48, %v5924_v7  ;;  %v5925_v10 = vmul.f32 %v7595_v34, %v10234_v36  ;;  %v1846_v28 = vrot.slane %v1831_v19, 6  ;;  %v10370_v17 = vsub.f32 %v10578_v8, %v1802_v21 }
0x193a   :  { %v7597_v44 = vpop.eup %7596  ;;  %v1848_v14 = vrot.slane %v1832_v49, 5  ;;  %v1850_v37 = vrot.slane %v1833_v3, 4  ;;  %v1852_v27 = vrot.slane %v1834_v39, 3  ;;  %v5963_v8 = vadd.f32 %v10266_v0, %v5943_v53 }
0x193b   :  { %v5964_v26 = vadd.f32 %v10266_v0, %v5944_v43  ;;  %v5945_v36 = vmul.f32 %v10261_v48, %v5925_v10  ;;  %v5926_v30 = vmul.f32 %v7597_v44, %v10240_v59  ;;  %v1847_v11 = vsel %vm1774_vm6, %v1846_v28, %v1845_v50 }
0x193c   :  { %v1836_v38 = vmul.f32 %v10365_v60, %v10365_v60  ;;  %v1849_v5 = vsel %vm1777_vm7, %v1848_v14, %v1847_v11  ;;  %v1854_v1 = vrot.slane %v1835_v12, 2  ;;  %v5983_v54 = vmul.f32 %v10271_v41, %v5963_v8 }
0x193d   :  { %v5984_v47 = vmul.f32 %v10271_v41, %v5964_v26  ;;  %v5965_v63 = vadd.f32 %v10266_v0, %v5945_v36  ;;  %v5946_v9 = vmul.f32 %v10261_v48, %v5926_v30  ;;  %v1851_v23 = vsel %vm1780_vm8, %v1850_v37, %v1849_v5 }
0x193e   :  { %v1853_v62 = vsel %vm1783_vm9, %v1852_v27, %v1851_v23  ;;  %v1829_v48 = vmul.f32 %v10370_v17, %v10370_v17  ;;  %v1856_v55 = vrot.slane %v1836_v38, 1  ;;  %v6023_v42 = vsel %vm120_vm0, %v5983_v54, 0.0 }
0x193f   :  { %v6026_v59 = vsel %vm120_vm0, %v5984_v47, 0.0  ;;  %v5985_v31 = vmul.f32 %v10271_v41, %v5965_v63  ;;  %v5966_v4 = vadd.f32 %v10266_v0, %v5946_v9  ;;  %v1855_v0 = vsel %vm1786_vm10, %v1854_v1, %v1853_v62 }
0x1940   :  { %6027 = vadd.xlane.f32.xlu1 %v6026_v59  ;;  %v1860_v24 = vsel %vm1793_vm13, %v1829_v48, 0.0  ;;  %v1857_v58 = vsel %vm1789_vm11, %v1856_v55, %v1855_v0  ;;  %v10399_v51 = vstv %s7167_s9 }
0x1941   :  { %v6029_v22 = vsel %vm120_vm0, %v5985_v31, 0.0  ;;  %v5986_v2 = vmul.f32 %v10271_v41, %v5966_v4  ;;  %v1863_v45 = vsel %vm1797_vm12, %v1857_v58, 0.0 }
0x1942   :  { %6030 = vadd.xlane.f32.xlu0 %v6029_v22 }
0x1943   :  { %v6032_v46 = vsel %vm120_vm0, %v5986_v2, 0.0 }
0x1944   :  { %6033 = vadd.xlane.f32.xlu1 %v6032_v46 }
0x1946   :  { %6024 = vadd.xlane.f32.xlu0 %v6023_v42 }
0x1948   :  { %1861 = vadd.xlane.f32.xlu1 %v1860_v24 }
0x194a   :  { %1864 = vadd.xlane.f32.xlu0 %v1863_v45 }
0x1972   :  { %v5995_v41 = vpop.xlane.xlu0 %5994 }
0x1973   :  { %v6042_v6 = vadd.f32 %v10399_v51, %v5995_v41 }
0x1974   :  { %v5998_v40 = vpop.xlane.xlu1 %5997 }
0x1975   :  { %v6043_v52 = vadd.f32 %v10399_v51, %v5998_v40  ;;  %v6490_v34 = vmul.f32 -1.442695, %v6042_v6 }
0x1976   :  { %v5989_v29 = vpop.xlane.xlu0 %5988 }
0x1977   :  { %v6040_v7 = vadd.f32 %v10399_v51, %v5989_v29  ;;  %v6491_v3 = vmul.f32 -1.442695, %v6043_v52  ;;  %7598 = vpow2.f32 %v6490_v34 }
0x1978   :  { %v5992_v32 = vpop.xlane.xlu1 %5991 }
0x1979   :  { %v6041_v35 = vadd.f32 %v10399_v51, %v5992_v32  ;;  %v6488_v43 = vmul.f32 -1.442695, %v6040_v7  ;;  %7600 = vpow2.f32 %v6491_v3  ;;  %v10581_v3 = vlaneseq }
0x197b   :  { %v6489_v10 = vmul.f32 -1.442695, %v6041_v35  ;;  %7602 = vpow2.f32 %v6488_v43  ;;  %v6169_v43 = vand.u32 127, %v10581_v3 }
0x197d   :  { %7604 = vpow2.f32 %v6489_v10 }
0x1981   :  { %v7599_v14 = vpop.eup %7598 }
0x1982   :  { %v6106_v9 = vadd.f32 1.0, %v7599_v14  ;;  %v6174_v14 = vadd.s32 4294967288, %v6169_v43 }
0x1983   :  { %v7601_v27 = vpop.eup %7600 }
0x1984   :  { %v6107_v31 = vadd.f32 1.0, %v7601_v27 }
0x1985   :  { %v7603_v63 = vpop.eup %7602 }
0x1986   :  { %v6104_v23 = vadd.f32 1.0, %v7603_v63 }
0x1987   :  { %v7605_v38 = vpop.eup %7604 }
0x1988   :  { %v6105_v22 = vadd.f32 1.0, %v7605_v38  ;;  %v10582_v38 = vld [vmem:[#allocation9_spill] sm:$0xff] }
0x19ae   :  { %v6007_v21 = vpop.xlane.xlu0 %6006 }
0x19af   :  { %v6046_v19 = vadd.f32 %v10399_v51, %v6007_v21 }
0x19b0   :  { %v6010_v61 = vpop.xlane.xlu1 %6009 }
0x19b1   :  { %v6494_v44 = vmul.f32 -1.442695, %v6046_v19  ;;  %v6047_v12 = vadd.f32 %v10399_v51, %v6010_v61 }
0x19b2   :  { %v6001_v53 = vpop.xlane.xlu0 %6000 }
0x19b3   :  { %v6044_v50 = vadd.f32 %v10399_v51, %v6001_v53  ;;  %7606 = vpow2.f32 %v6494_v44  ;;  %v6495_v26 = vmul.f32 -1.442695, %v6047_v12 }
0x19b4   :  { %v6004_v49 = vpop.xlane.xlu1 %6003 }
0x19b5   :  { %v6045_v39 = vadd.f32 %v10399_v51, %v6004_v49  ;;  %v6492_v30 = vmul.f32 -1.442695, %v6044_v50 }
0x19b7   :  { %v6493_v28 = vmul.f32 -1.442695, %v6045_v39 }
0x19b9   :  { %7608 = vpow2.f32 %v6493_v28 }
0x19ba   :  { %7610 = vpow2.f32 %v6495_v26 }
0x19bb   :  { %7612 = vpow2.f32 %v6492_v30 }
0x19bd   :  { %v7607_v59 = vpop.eup %7606 }
0x19be   :  { %v6019_v36 = vpop.xlane.xlu0 %6018  ;;  %v6110_v54 = vadd.f32 1.0, %v7607_v59 }
0x19bf   :  { %v6050_v4 = vadd.f32 %v10399_v51, %v6019_v36 }
0x19c1   :  { %v6022_v11 = vpop.xlane.xlu1 %6021  ;;  %v6498_v55 = vmul.f32 -1.442695, %v6050_v4  ;;  %v10424_v4 = vsub.s32 %v6169_v43, %v10582_v38 }
0x19c2   :  { %v6051_v62 = vadd.f32 %v10399_v51, %v6022_v11 }
0x19c3   :  { %v6013_v37 = vpop.xlane.xlu0 %6012  ;;  %v7609_v2 = vpop.eup %7608 }
0x19c4   :  { %v6048_v47 = vadd.f32 %v10399_v51, %v6013_v37  ;;  %v7611_v46 = vpop.eup %7610  ;;  %v6499_v0 = vmul.f32 -1.442695, %v6051_v62  ;;  %v6109_v24 = vadd.f32 1.0, %v7609_v2 }
0x19c5   :  { %v6016_v8 = vpop.xlane.xlu1 %6015  ;;  %v7613_v42 = vpop.eup %7612  ;;  %v6111_v40 = vadd.f32 1.0, %v7611_v46 }
0x19c6   :  { %v6496_v5 = vmul.f32 -1.442695, %v6048_v47  ;;  %v6049_v1 = vadd.f32 %v10399_v51, %v6016_v8  ;;  %v6108_v32 = vadd.f32 1.0, %v7613_v42 }
0x19c8   :  { %7614 = vpow2.f32 %v6496_v5  ;;  %v6497_v48 = vmul.f32 -1.442695, %v6049_v1  ;;  %v10421_v5 = vsub.s32 %v6174_v14, %v10582_v38 }
0x19c9   :  { %7616 = vrcp.f32 %v6106_v9 }
0x19ca   :  { %7618 = vpow2.f32 %v6497_v48 }
0x19cb   :  { %7620 = vrcp.f32 %v6107_v31 }
0x19cc   :  { %7622 = vrcp.f32 %v6104_v23 }
0x19cd   :  { %7624 = vrcp.f32 %v6105_v22  ;;  %v6028_v58 = vpop.xlane.xlu1 %6027 }
0x19ce   :  { %7626 = vrcp.f32 %v6110_v54  ;;  %v6053_v45 = vadd.f32 %v10399_v51, %v6028_v58 }
0x19cf   :  { %7628 = vpow2.f32 %v6498_v55  ;;  %v6031_v41 = vpop.xlane.xlu0 %6030 }
0x19d0   :  { %7630 = vpow2.f32 %v6499_v0  ;;  %v6501_v29 = vmul.f32 -1.442695, %v6053_v45  ;;  %v6054_v6 = vadd.f32 %v10399_v51, %v6031_v41 }
0x19d1   :  { %7632 = vrcp.f32 %v6109_v24  ;;  %v6034_v61 = vpop.xlane.xlu1 %6033 }
0x19d2   :  { %v7615_v52 = vpop.eup %7614  ;;  %7634 = vpow2.f32 %v6501_v29  ;;  %v6502_v21 = vmul.f32 -1.442695, %v6054_v6  ;;  %v6055_v7 = vadd.f32 %v10399_v51, %v6034_v61 }
0x19d3   :  { %v10416_v34 = vpop.eup %7616  ;;  %7636 = vrcp.f32 %v6111_v40  ;;  %v6112_v35 = vadd.f32 1.0, %v7615_v52  ;;  %v6025_v19 = vpop.xlane.xlu0 %6024 }
0x19d4   :  { %v7619_v49 = vpop.eup %7618  ;;  %7638 = vrcp.f32 %v6108_v32  ;;  %v6503_v10 = vmul.f32 -1.442695, %v6055_v7  ;;  %v6052_v53 = vadd.f32 %v10399_v51, %v6025_v19  ;;  %v6184_v40 = vrot.slane %v10416_v34, %v10424_v4 }
0x19d5   :  { %v7621_v39 = vpop.eup %7620  ;;  %7640 = vrcp.f32 %v6112_v35  ;;  %v6113_v44 = vadd.f32 1.0, %v7619_v49  ;;  %v1862_v12 = vpop.xlane.xlu1 %1861  ;;  %v1900_v32 = vrot.slane %v10256_v33, %v7973_v20  ;;  %v1912_v34 = vrot.slane %v10256_v33, %v7964_v16 }
0x19d6   :  { %v7623_v50 = vpop.eup %7622  ;;  %7642 = vpow2.f32 %v6502_v21  ;;  %v6500_v28 = vmul.f32 -1.442695, %v6052_v53  ;;  %v1866_v26 = vmul.f32 0.015625, %v1862_v12  ;;  %v6188_v55 = vrot.slane %v7621_v39, %v10421_v5 }
0x19d7   :  { %v7625_v36 = vpop.eup %7624  ;;  %7644 = vrcp.f32 %v6113_v44  ;;  %v1865_v30 = vpop.xlane.xlu0 %1864  ;;  %v6173_v46 = vrot.slane %v7623_v50, %v10424_v4 }
0x19d8   :  { %v7627_v11 = vpop.eup %7626  ;;  %7646 = vpow2.f32 %v6503_v10  ;;  %v1868_v37 = vadd.f32 1e-05, %v1866_v26  ;;  %v1867_v27 = vmul.f32 0.015625, %v1865_v30  ;;  %v6178_v23 = vrot.slane %v7625_v36, %v10421_v5 }
0x19d9   :  { %v7629_v47 = vpop.eup %7628  ;;  %7648 = vpow2.f32 %v6500_v28  ;;  %v6202_v6 = vrot.slane %v7627_v11, %v10424_v4  ;;  %v6189_v35 = vsel %vm6179_vm14, %v6188_v55, %v6184_v40 }
0x19da   :  { %v7631_v63 = vpop.eup %7630  ;;  %7650 = vrsqrt.f32 %v1868_v37  ;;  %v1869_v51 = vadd.f32 1e-05, %v1867_v27  ;;  %v6114_v62 = vadd.f32 1.0, %v7629_v47  ;;  %v6180_v41 = vsel %vm6179_vm14, %v6178_v23, %v6173_v46 }
0x19db   :  { %v7633_v9 = vpop.eup %7632  ;;  %v6115_v59 = vadd.f32 1.0, %v7631_v63  ;;  %v6244_v20 = vsel %vm1774_vm6, %v6189_v35, %v6180_v41 }
0x19dc   :  { %v7635_v8 = vpop.eup %7634  ;;  %7652 = vrsqrt.f32 %v1869_v51  ;;  %v6197_v22 = vrot.slane %v7633_v9, %v10421_v5 }
0x19dd   :  { %v7637_v1 = vpop.eup %7636  ;;  %v6117_v2 = vadd.f32 1.0, %v7635_v8  ;;  %7654 = vrcp.f32 %v6115_v59 }
0x19de   :  { %v7639_v31 = vpop.eup %7638  ;;  %v6206_v42 = vrot.slane %v7637_v1, %v10421_v5  ;;  %7656 = vrcp.f32 %v6114_v62 }
0x19df   :  { %v7641_v48 = vpop.eup %7640  ;;  %v6193_v24 = vrot.slane %v7639_v31, %v10424_v4  ;;  %7658 = vrcp.f32 %v6117_v2 }
0x19e0   :  { %v7643_v54 = vpop.eup %7642  ;;  %v6207_v19 = vsel %vm6179_vm14, %v6206_v42, %v6202_v6  ;;  %v6211_v43 = vrot.slane %v7641_v48, %v10424_v4 }
0x19e1   :  { %v7645_v0 = vpop.eup %7644  ;;  %v6118_v58 = vadd.f32 1.0, %v7643_v54  ;;  %v6198_v52 = vsel %vm6179_vm14, %v6197_v22, %v6193_v24 }
0x19e2   :  { %v7647_v45 = vpop.eup %7646  ;;  %v6215_v10 = vrot.slane %v7645_v0, %v10421_v5  ;;  %v6245_v53 = vsel %vm1777_vm7, %v6198_v52, %v6244_v20 }
0x19e3   :  { %v7649_v29 = vpop.eup %7648  ;;  %v6119_v61 = vadd.f32 1.0, %v7647_v45  ;;  %7660 = vrcp.f32 %v6118_v58 }
0x19e4   :  { %v7651_v21 = vpop.eup %7650  ;;  %v6116_v7 = vadd.f32 1.0, %v7649_v29  ;;  %v6216_v14 = vsel %vm6179_vm14, %v6215_v10, %v6211_v43 }
0x19e5   :  { %7662 = vrcp.f32 %v6119_v61  ;;  %v1889_v49 = vmul.f32 %v7651_v21, %v10370_v17 }
0x19e6   :  { %v7653_v3 = vpop.eup %7652  ;;  %7664 = vrcp.f32 %v6116_v7 }
0x19e7   :  { %v1874_v39 = vrot.slane %v7653_v3, 1  ;;  %v1875_v44 = vrot.slane %v7653_v3, 2  ;;  %v1876_v12 = vrot.slane %v7653_v3, 3  ;;  %v1877_v50 = vrot.slane %v7653_v3, 4  ;;  %v7655_v63 = vpop.eup %7654 }
0x19e8   :  { %v1878_v16 = vrot.slane %v7653_v3, 5  ;;  %v1879_v33 = vrot.slane %v7653_v3, 6  ;;  %v1880_v28 = vrot.slane %v7653_v3, 7  ;;  %v1901_v26 = vmul.f32 %v1900_v32, %v1889_v49 }
0x19e9   :  { %v1890_v36 = vmul.f32 %v1874_v39, %v10330_v13  ;;  %v1891_v17 = vmul.f32 %v1875_v44, %v10335_v25  ;;  %v1892_v30 = vmul.f32 %v1876_v12, %v10338_v18  ;;  %v1893_v11 = vmul.f32 %v1877_v50, %v10342_v15  ;;  %v7657_v13 = vpop.eup %7656 }
0x19ea   :  { %v1894_v37 = vmul.f32 %v1878_v16, %v10345_v56  ;;  %v1895_v27 = vmul.f32 %v1879_v33, %v10349_v57  ;;  %v1896_v47 = vmul.f32 %v1880_v28, %v10365_v60  ;;  %v1913_v18 = vadd.f32 %v1912_v34, %v1901_v26  ;;  %v7659_v31 = vpop.eup %7658 }
0x19eb   :  { %v1902_v51 = vmul.f32 %v1900_v32, %v1890_v36  ;;  %v1903_v9 = vmul.f32 %v1900_v32, %v1891_v17  ;;  %v1904_v8 = vmul.f32 %v1900_v32, %v1892_v30  ;;  %v1905_v38 = vmul.f32 %v1900_v32, %v1893_v11 }
0x19ec   :  { %v1906_v1 = vmul.f32 %v1900_v32, %v1894_v37  ;;  %v1907_v25 = vmul.f32 %v1900_v32, %v1895_v27  ;;  %v1908_v59 = vmul.f32 %v1900_v32, %v1896_v47  ;;  %v6224_v57 = vrot.slane %v7655_v63, %v10421_v5  ;;  %1944 = vst.msk [vmem:[#allocation5 - $0x7] sm:$0x80] %vm1793_vm13, %v1913_v18 }
0x19ed   :  { %v1914_v15 = vadd.f32 %v1912_v34, %v1902_v51  ;;  %v1915_v23 = vadd.f32 %v1912_v34, %v1903_v9  ;;  %v1916_v62 = vadd.f32 %v1912_v34, %v1904_v8  ;;  %v1917_v48 = vadd.f32 %v1912_v34, %v1905_v38  ;;  %v7661_v56 = vpop.eup %7660 }
0x19ee   :  { %v6246_v60 = vsel %vm1780_vm8, %v6207_v19, %v6245_v53  ;;  %v1918_v22 = vadd.f32 %v1912_v34, %v1906_v1  ;;  %v1919_v54 = vadd.f32 %v1912_v34, %v1907_v25  ;;  %v6220_v24 = vrot.slane %v7657_v13, %v10424_v4 }
0x19ef   :  { %v7663_v2 = vpop.eup %7662  ;;  %v1929_v55 = vrot.slane %v1914_v15, 7  ;;  %v1930_v46 = vrot.slane %v1915_v23, 6  ;;  %v1932_v0 = vrot.slane %v1916_v62, 5  ;;  %v6247_v45 = vsel %vm1783_vm9, %v6216_v14, %v6246_v60 }
0x19f0   :  { %v7665_v42 = vpop.eup %7664  ;;  %v6242_v58 = vrot.slane %v7663_v2, %v10421_v5  ;;  %v1920_v40 = vadd.f32 %v1912_v34, %v1908_v59  ;;  %v6233_v32 = vrot.slane %v7659_v31, %v10421_v5  ;;  %v1934_v6 = vrot.slane %v1917_v48, 4 }
0x19f1   :  { %v6229_v41 = vrot.slane %v7665_v42, %v10424_v4  ;;  %v1931_v29 = vsel %vm1774_vm6, %v1930_v46, %v1929_v55  ;;  %v6225_v61 = vsel %vm6179_vm14, %v6224_v57, %v6220_v24  ;;  %v6238_v52 = vrot.slane %v7661_v56, %v10424_v4 }
0x19f2   :  { %v1933_v21 = vsel %vm1777_vm7, %v1932_v0, %v1931_v29  ;;  %v1936_v7 = vrot.slane %v1918_v22, 3  ;;  %v6248_v34 = vsel %vm1786_vm10, %v6225_v61, %v6247_v45  ;;  %v1938_v19 = vrot.slane %v1919_v54, 2 }
0x19f3   :  { %v6234_v35 = vsel %vm6179_vm14, %v6233_v32, %v6229_v41  ;;  %v1935_v5 = vsel %vm1780_vm8, %v1934_v6, %v1933_v21  ;;  %v6243_v20 = vsel %vm6179_vm14, %v6242_v58, %v6238_v52  ;;  %v1940_v4 = vrot.slane %v1920_v40, 1 }
0x19f4   :  { %v6249_v49 = vsel %vm1789_vm11, %v6234_v35, %v6248_v34  ;;  %v1937_v3 = vsel %vm1783_vm9, %v1936_v7, %v1935_v5 }
0x19f5   :  { %v6251_v43 = vsel %vm6250_vm15, %v6243_v20, %v6249_v49  ;;  %v1939_v10 = vsel %vm1786_vm10, %v1938_v19, %v1937_v3 }
0x19f6   :  { %6253 = vst.msk [vmem:[#allocation3] sm:$0xff] %vm2662_vm5, %v6251_v43  ;;  %v1941_v53 = vsel %vm1789_vm11, %v1940_v4, %v1939_v10 }
0x19f7   :  { %7696 = shalt.err (!%p7693_p5)
}
0x19f8   :  { %s7697_s25 = scalar_lea.hbm %s10520_s10, 128 }
0x19f9   :  { %p7698_p6 = scmp.ne.s32.totalorder %s10520_s10, %s7697_s25  ;;  %p7701_p7 = scmp.lt.u32.totalorder %s7697_s25, %s10520_s10 }
0x19fb   :  { %p7703_p8 = pnand %p7701_p7, %p7698_p6 }
0x19fd   :  { %7706 = shalt.err (!%p7703_p8)
}
0x19fe   :  { %6263 = dma.vmem_to_hbm [thread:$0]  %s6261_s19, 128, %s10520_s10, [#allocation4]   ;;  %1945 = vst.msk [vmem:[#allocation5 + $0x1] sm:$0x7f] %vm1797_vm12, %v1941_v53 }
0x19ff   :  { %s7707_s29 = scalar_lea.vmem %s10476_s21, 128  ;;  %p7712_p10 = scmp.lt.s32.totalorder %s10476_s21, %s10476_s21 }
0x1a00   :  { %p7708_p9 = scmp.ne.s32.totalorder %s10476_s21, %s7707_s29  ;;  %p7713_p11 = scmp.lt.s32.totalorder %s7707_s29, %s7707_s29 }
0x1a02   :  { %p7714_p12 = por %p7713_p11, %p7712_p10 }
0x1a04   :  { %p7715_p13 = pnand %p7714_p12, %p7708_p9 }
0x1a06   :  { %7718 = shalt.err (!%p7715_p13)
}
0x1a07   :  { %s7719_s13 = scalar_lea.hbm %s10521_s11, 128 }
0x1a08   :  { %p7720_p0 = scmp.ne.s32.totalorder %s10521_s11, %s7719_s13  ;;  %p7723_p1 = scmp.lt.u32.totalorder %s7719_s13, %s10521_s11 }
0x1a0a   :  { %p7725_p2 = pnand %p7723_p1, %p7720_p0 }
0x1a0c   :  { %7728 = shalt.err (!%p7725_p2)
}
0x1a0d   :  { %6273 = dma.vmem_to_hbm [thread:$0]  %s10476_s21, 128, %s10521_s11, [#allocation6]  }
0x1a0e   :  { %7765 = dma.done.wait [#allocation4], 128  }
0x1a0f   :  { %7766 = vsyncadd [#allocation4], 4294967168 }
0x1a10   :  { %7767 = dma.done.wait [#allocation6], 128  }
0x1a11   :  { %7768 = vsyncadd [#allocation6], 4294967168 }
0x1a12   :  { %6280 = vsyncpa [#allocation4], 1 }
0x1a13   :  { %6281 = vsyncpa [#allocation6], 1 }

</bundles_post_ra>
